<compile_context>
chip_gen: v5e
topology: v5e:2x2
jax: 0.10.0
libtpu: 0.0.40
codegen_flags: <defaults>
</compile_context>

<pallas_src>
import functools

import numpy as np

import jax
import jax.numpy as jnp
from jax.experimental import pallas as pl
from jax.experimental.pallas import tpu as pltpu

BN_EPS = 1e-5
_VMEM_LIMIT = 32 * 1024 * 1024  # explicit scoped-VMEM limit (v5e default is 16 MiB)


# ----------------------------------------------------------------------------
# Fused kernel: the whole generator forward in one pallas_call.
#
# Activation layout everywhere: rows = n*H + h, cols = w*C + c (C minor on lanes).
# ConvTranspose2d(stride s, kernel K):  Y = sum_kh  Hs_kh @ X @ W2_kh   where
#   Hs_kh[n*Hout+oh, n'*Hin+ih] = (n == n') & (oh == s*ih + kh)          (0/1)
#   W2_kh[iw*Cin+ci, ow*Cout+co] = w[ci, co, kh, ow - s*iw]   (valid taps only)
# ----------------------------------------------------------------------------
def _generator_kernel(*args, blocks):
    o_ref = args[-1]
    refs = args[:-1]

    x = refs[0][...].astype(jnp.bfloat16)        # (N*1, 1*z_dim) == noise
    cur = 1
    for blk in blocks:
        k = blk["k"]

        # --- ConvTranspose2d: K taps, each = H-scatter matmul + folded W/chan matmul.
        acc = None
        for kh in range(k):
            w2 = refs[cur + kh][...]             # (Win*Cin, Wout*Cout)  bf16
            hs = refs[cur + k + kh][...]         # (N*Hout, N*Hin)       bf16 0/1
            # 0/1 selection: exact in bf16 (each output row copies <= 1 input row).
            xs = jnp.dot(hs, x, preferred_element_type=jnp.float32).astype(jnp.bfloat16)
            y = jnp.dot(xs, w2, preferred_element_type=jnp.float32)
            acc = y if acc is None else acc + y
        cur += 2 * k

        if blk["final"]:
            # --- bias + tanh (conv bias only matters in this non-BN block).
            bias_full = refs[cur][...]           # (1, Wout*Cout) f32, pre-tiled
            cur += 1
            o_ref[...] = jnp.tanh(acc + bias_full)
        else:
            # --- BatchNorm2d (training-mode batch stats, biased var) + ReLU.
            # The conv bias is dropped: it cancels exactly in (x - mean).
            gc = refs[cur][...]                  # (Wout*Cout, Cout) f32 group-sum
            gct = refs[cur + 1][...]             # (Cout, Wout*Cout) f32 broadcast
            gamma = refs[cur + 2][...]           # (1, Cout) f32
            beta = refs[cur + 3][...]            # (1, Cout) f32
            cur += 4

            inv_n = blk["inv_rows"]
            rs = jnp.sum(acc, axis=0, keepdims=True)           # (1, Wout*Cout)
            rs2 = jnp.sum(acc * acc, axis=0, keepdims=True)
            mean = jnp.dot(rs, gc, preferred_element_type=jnp.float32) * inv_n
            ex2 = jnp.dot(rs2, gc, preferred_element_type=jnp.float32) * inv_n
            var = jnp.maximum(ex2 - mean * mean, 0.0)
            scale = gamma * jax.lax.rsqrt(var + BN_EPS)         # rsqrt -> EUP
            shift = beta - mean * scale
            scale_f = jnp.dot(scale, gct, preferred_element_type=jnp.float32)
            shift_f = jnp.dot(shift, gct, preferred_element_type=jnp.float32)
            x = jnp.maximum(acc * scale_f + shift_f, 0.0).astype(jnp.bfloat16)


# ----------------------------------------------------------------------------
# Host-side constant builders (run once at init; all tiny).
# ----------------------------------------------------------------------------
def _w2_tap(w, kh, stride, k, win, wout):
    """(Win*Cin, Wout*Cout) folded channel-mix + W-axis scatter for tap row kh."""
    wnp = np.asarray(w)                               # (Cin, Cout, K, K)
    cin, cout = wnp.shape[0], wnp.shape[1]
    iw = np.arange(win)[:, None]
    ow = np.arange(wout)[None, :]
    kw = ow - stride * iw                             # (Win, Wout)
    valid = (kw >= 0) & (kw < k)
    kw_c = np.clip(kw, 0, k - 1)
    t = wnp[:, :, kh, :][:, :, kw_c]                  # (Cin, Cout, Win, Wout)
    t = np.where(valid[None, None], t, 0.0)
    t = np.transpose(t, (2, 0, 3, 1)).reshape(win * cin, wout * cout)
    return jnp.asarray(t, dtype=jnp.bfloat16)


def _h_scatter(n, kh, stride, hin, hout):
    """(N*Hout, N*Hin) 0/1 block-diagonal H-axis scatter for tap row kh."""
    oh = np.arange(hout)[:, None]
    ih = np.arange(hin)[None, :]
    e = (oh == stride * ih + kh).astype(np.float32)   # (Hout, Hin)
    return jnp.asarray(np.kron(np.eye(n, dtype=np.float32), e), dtype=jnp.bfloat16)


def _conv_cfg(z_dim, im_chan, hidden_dim):
    # (Cin, Cout, K, stride, final) — mirrors Generator.make_gen_block sequence.
    return [
        (z_dim, hidden_dim * 4, 3, 2, False),
        (hidden_dim * 4, hidden_dim * 2, 4, 1, False),
        (hidden_dim * 2, hidden_dim, 3, 2, False),
        (hidden_dim, im_chan, 4, 2, True),
    ]


def init_params(key, z_dim=16, im_chan=1, hidden_dim=16):
    """Deterministic raw parameters in PyTorch ConvTranspose2d layout."""
    params = []
    for (cin, cout, k, s, fin) in _conv_cfg(z_dim, im_chan, hidden_dim):
        key, wk, bk = jax.random.split(key, 3)
        scale = 1.0 / float(cin * k * k) ** 0.5
        w = jax.random.uniform(wk, (cin, cout, k, k), jnp.float32, -scale, scale)
        b = jax.random.uniform(bk, (cout,), jnp.float32, -scale, scale)
        params.append((w, b))
    return params


def build_generator(params, *, batch, z_dim=16, im_chan=1, hidden_dim=16):
    """Precompute all kernel constants and return the fused forward callable."""
    cfg = _conv_cfg(z_dim, im_chan, hidden_dim)
    consts, blocks = [], []
    flops, trans = 0, 0
    h = w_sp = 1
    for (cin, cout, k, s, fin), (wt, bias) in zip(cfg, params):
        hin, win = h, w_sp
        hout, wout = (hin - 1) * s + k, (win - 1) * s + k
        for kh in range(k):
            consts.append(_w2_tap(wt, kh, s, k, win, wout))
        for kh in range(k):
            consts.append(_h_scatter(batch, kh, s, hin, hout))
        if fin:
            bias_full = np.tile(np.asarray(bias), wout).reshape(1, wout * cout)
            consts.append(jnp.asarray(bias_full, dtype=jnp.float32))
        else:
            # Conv bias is a no-op before training-mode BN -> not passed at all.
            gc = np.tile(np.eye(cout, dtype=np.float32), (wout, 1))  # (Wout*Cout, Cout)
            consts.append(jnp.asarray(gc))
            consts.append(jnp.asarray(np.ascontiguousarray(gc.T)))
            consts.append(jnp.ones((1, cout), jnp.float32))   # BN gamma
            consts.append(jnp.zeros((1, cout), jnp.float32))  # BN beta
        flops += 2 * k * (batch * hout) * (batch * hin) * (win * cin)      # hs @ x
        flops += 2 * k * (batch * hout) * (win * cin) * (wout * cout)      # xs @ w2
        trans += (batch * hout * wout * cout) if fin else cout
        blocks.append(dict(k=k, final=fin, inv_rows=1.0 / float(batch * hout * wout)))
        h, w_sp = hout, wout

    out_rows, out_cols = batch * h, w_sp * im_chan
    n_in = 1 + len(consts)
    bytes_accessed = (
        batch * z_dim * 4
        + sum(int(np.prod(c.shape)) * c.dtype.itemsize for c in consts)
        + out_rows * out_cols * 4
    )
    vmem_spec = pl.BlockSpec(memory_space=pltpu.MemorySpace.VMEM)

    fused = pl.pallas_call(
        functools.partial(_generator_kernel, blocks=tuple(blocks)),
        out_shape=jax.ShapeDtypeStruct((out_rows, out_cols), jnp.float32),
        in_specs=[vmem_spec] * n_in,
        out_specs=vmem_spec,
        compiler_params=pltpu.CompilerParams(vmem_limit_bytes=_VMEM_LIMIT),
        cost_estimate=pl.CostEstimate(flops=int(flops), transcendentals=int(trans),
                                      bytes_accessed=int(bytes_accessed)),
    )

    consts = tuple(consts)
    final_h, final_w = h, w_sp

    def forward(noise):
        """noise: (N, z_dim) -> images (N, im_chan, 28, 28), NCHW like PyTorch."""
        out2d = fused(noise, *consts)                       # (N*H, W*C)
        img = out2d.reshape(batch, final_h, final_w, im_chan)
        return jnp.transpose(img, (0, 3, 1, 2))

    return forward


if __name__ == "__main__":
    key = jax.random.PRNGKey(0)
    pkey, nkey = jax.random.split(key)

    z_dim, im_chan, hidden_dim, batch = 16, 1, 16, 2
    params = init_params(pkey, z_dim=z_dim, im_chan=im_chan, hidden_dim=hidden_dim)
    gen = build_generator(params, batch=batch, z_dim=z_dim, im_chan=im_chan,
                          hidden_dim=hidden_dim)
    noise = jax.random.normal(nkey, (batch, z_dim), jnp.float32)

    fwd = jax.jit(gen)
    out = jax.block_until_ready(fwd(noise))

    assert out.shape == (batch, im_chan, 28, 28), out.shape
    assert bool(jnp.all(jnp.isfinite(out)))
    assert bool(jnp.all(jnp.abs(out) <= 1.0))  # tanh output range
    print("KERNEL_OK")
</pallas_src>

<mosaic_0001>
module attributes {stable_mosaic.version = 11 : i64} {
  func.func @_generator_kernel(%arg0: memref<2x16xf32, #tpu.memory_space<vmem>>, %arg1: memref<16x192xbf16, #tpu.memory_space<vmem>>, %arg2: memref<16x192xbf16, #tpu.memory_space<vmem>>, %arg3: memref<16x192xbf16, #tpu.memory_space<vmem>>, %arg4: memref<6x2xbf16, #tpu.memory_space<vmem>>, %arg5: memref<6x2xbf16, #tpu.memory_space<vmem>>, %arg6: memref<6x2xbf16, #tpu.memory_space<vmem>>, %arg7: memref<192x64xf32, #tpu.memory_space<vmem>>, %arg8: memref<64x192xf32, #tpu.memory_space<vmem>>, %arg9: memref<1x64xf32, #tpu.memory_space<vmem>>, %arg10: memref<1x64xf32, #tpu.memory_space<vmem>>, %arg11: memref<192x192xbf16, #tpu.memory_space<vmem>>, %arg12: memref<192x192xbf16, #tpu.memory_space<vmem>>, %arg13: memref<192x192xbf16, #tpu.memory_space<vmem>>, %arg14: memref<192x192xbf16, #tpu.memory_space<vmem>>, %arg15: memref<12x6xbf16, #tpu.memory_space<vmem>>, %arg16: memref<12x6xbf16, #tpu.memory_space<vmem>>, %arg17: memref<12x6xbf16, #tpu.memory_space<vmem>>, %arg18: memref<12x6xbf16, #tpu.memory_space<vmem>>, %arg19: memref<192x32xf32, #tpu.memory_space<vmem>>, %arg20: memref<32x192xf32, #tpu.memory_space<vmem>>, %arg21: memref<1x32xf32, #tpu.memory_space<vmem>>, %arg22: memref<1x32xf32, #tpu.memory_space<vmem>>, %arg23: memref<192x208xbf16, #tpu.memory_space<vmem>>, %arg24: memref<192x208xbf16, #tpu.memory_space<vmem>>, %arg25: memref<192x208xbf16, #tpu.memory_space<vmem>>, %arg26: memref<26x12xbf16, #tpu.memory_space<vmem>>, %arg27: memref<26x12xbf16, #tpu.memory_space<vmem>>, %arg28: memref<26x12xbf16, #tpu.memory_space<vmem>>, %arg29: memref<208x16xf32, #tpu.memory_space<vmem>>, %arg30: memref<16x208xf32, #tpu.memory_space<vmem>>, %arg31: memref<1x16xf32, #tpu.memory_space<vmem>>, %arg32: memref<1x16xf32, #tpu.memory_space<vmem>>, %arg33: memref<208x28xbf16, #tpu.memory_space<vmem>>, %arg34: memref<208x28xbf16, #tpu.memory_space<vmem>>, %arg35: memref<208x28xbf16, #tpu.memory_space<vmem>>, %arg36: memref<208x28xbf16, #tpu.memory_space<vmem>>, %arg37: memref<56x26xbf16, #tpu.memory_space<vmem>>, %arg38: memref<56x26xbf16, #tpu.memory_space<vmem>>, %arg39: memref<56x26xbf16, #tpu.memory_space<vmem>>, %arg40: memref<56x26xbf16, #tpu.memory_space<vmem>>, %arg41: memref<1x28xf32, #tpu.memory_space<vmem>>, %arg42: memref<56x28xf32, #tpu.memory_space<vmem>>) attributes {dimension_semantics = [], scalar_prefetch = 0 : i64, scratch_operands = 0 : i64, tpu.core_type = #tpu.core_type<tc>} {
    %c0 = arith.constant 0 : index
    %c0_0 = arith.constant 0 : index
    %0 = vector.load %arg0[%c0, %c0_0] : memref<2x16xf32, #tpu.memory_space<vmem>>, vector<2x16xf32>
    %1 = arith.truncf %0 : vector<2x16xf32> to vector<2x16xbf16>
    %c0_1 = arith.constant 0 : index
    %c0_2 = arith.constant 0 : index
    %2 = vector.load %arg1[%c0_1, %c0_2] : memref<16x192xbf16, #tpu.memory_space<vmem>>, vector<16x192xbf16>
    %c0_3 = arith.constant 0 : index
    %c0_4 = arith.constant 0 : index
    %3 = vector.load %arg4[%c0_3, %c0_4] : memref<6x2xbf16, #tpu.memory_space<vmem>>, vector<6x2xbf16>
    %cst = arith.constant dense<0.000000e+00> : vector<6x16xf32>
    %4 = tpu.matmul %3, %1, %cst {dimension_numbers = #tpu.dot_dimension_numbers<[1], [0], [0], [1], [0, 0, 1, 1], [], []>} : vector<6x2xbf16>, vector<2x16xbf16>, vector<6x16xf32> -> vector<6x16xf32>
    %5 = arith.truncf %4 : vector<6x16xf32> to vector<6x16xbf16>
    %cst_5 = arith.constant dense<0.000000e+00> : vector<6x192xf32>
    %6 = tpu.matmul %5, %2, %cst_5 {dimension_numbers = #tpu.dot_dimension_numbers<[1], [0], [0], [1], [0, 0, 1, 1], [], []>} : vector<6x16xbf16>, vector<16x192xbf16>, vector<6x192xf32> -> vector<6x192xf32>
    %c0_6 = arith.constant 0 : index
    %c0_7 = arith.constant 0 : index
    %7 = vector.load %arg2[%c0_6, %c0_7] : memref<16x192xbf16, #tpu.memory_space<vmem>>, vector<16x192xbf16>
    %c0_8 = arith.constant 0 : index
    %c0_9 = arith.constant 0 : index
    %8 = vector.load %arg5[%c0_8, %c0_9] : memref<6x2xbf16, #tpu.memory_space<vmem>>, vector<6x2xbf16>
    %cst_10 = arith.constant dense<0.000000e+00> : vector<6x16xf32>
    %9 = tpu.matmul %8, %1, %cst_10 {dimension_numbers = #tpu.dot_dimension_numbers<[1], [0], [0], [1], [0, 0, 1, 1], [], []>} : vector<6x2xbf16>, vector<2x16xbf16>, vector<6x16xf32> -> vector<6x16xf32>
    %10 = arith.truncf %9 : vector<6x16xf32> to vector<6x16xbf16>
    %cst_11 = arith.constant dense<0.000000e+00> : vector<6x192xf32>
    %11 = tpu.matmul %10, %7, %cst_11 {dimension_numbers = #tpu.dot_dimension_numbers<[1], [0], [0], [1], [0, 0, 1, 1], [], []>} : vector<6x16xbf16>, vector<16x192xbf16>, vector<6x192xf32> -> vector<6x192xf32>
    %12 = arith.addf %6, %11 : vector<6x192xf32>
    %c0_12 = arith.constant 0 : index
    %c0_13 = arith.constant 0 : index
    %13 = vector.load %arg3[%c0_12, %c0_13] : memref<16x192xbf16, #tpu.memory_space<vmem>>, vector<16x192xbf16>
    %c0_14 = arith.constant 0 : index
    %c0_15 = arith.constant 0 : index
    %14 = vector.load %arg6[%c0_14, %c0_15] : memref<6x2xbf16, #tpu.memory_space<vmem>>, vector<6x2xbf16>
    %cst_16 = arith.constant dense<0.000000e+00> : vector<6x16xf32>
    %15 = tpu.matmul %14, %1, %cst_16 {dimension_numbers = #tpu.dot_dimension_numbers<[1], [0], [0], [1], [0, 0, 1, 1], [], []>} : vector<6x2xbf16>, vector<2x16xbf16>, vector<6x16xf32> -> vector<6x16xf32>
    %16 = arith.truncf %15 : vector<6x16xf32> to vector<6x16xbf16>
    %cst_17 = arith.constant dense<0.000000e+00> : vector<6x192xf32>
    %17 = tpu.matmul %16, %13, %cst_17 {dimension_numbers = #tpu.dot_dimension_numbers<[1], [0], [0], [1], [0, 0, 1, 1], [], []>} : vector<6x16xbf16>, vector<16x192xbf16>, vector<6x192xf32> -> vector<6x192xf32>
    %18 = arith.addf %12, %17 : vector<6x192xf32>
    %c0_18 = arith.constant 0 : index
    %c0_19 = arith.constant 0 : index
    %19 = vector.load %arg7[%c0_18, %c0_19] : memref<192x64xf32, #tpu.memory_space<vmem>>, vector<192x64xf32>
    %c0_20 = arith.constant 0 : index
    %c0_21 = arith.constant 0 : index
    %20 = vector.load %arg8[%c0_20, %c0_21] : memref<64x192xf32, #tpu.memory_space<vmem>>, vector<64x192xf32>
    %c0_22 = arith.constant 0 : index
    %c0_23 = arith.constant 0 : index
    %21 = vector.load %arg9[%c0_22, %c0_23] : memref<1x64xf32, #tpu.memory_space<vmem>>, vector<1x64xf32>
    %c0_24 = arith.constant 0 : index
    %c0_25 = arith.constant 0 : index
    %22 = vector.load %arg10[%c0_24, %c0_25] : memref<1x64xf32, #tpu.memory_space<vmem>>, vector<1x64xf32>
    %cst_26 = arith.constant dense<0.000000e+00> : vector<192xf32>
    %23 = vector.multi_reduction <add>, %18, %cst_26 [0] : vector<6x192xf32> to vector<192xf32>
    %24 = vector.shape_cast %23 : vector<192xf32> to vector<1x192xf32>
    %25 = arith.mulf %18, %18 : vector<6x192xf32>
    %cst_27 = arith.constant dense<0.000000e+00> : vector<192xf32>
    %26 = vector.multi_reduction <add>, %25, %cst_27 [0] : vector<6x192xf32> to vector<192xf32>
    %27 = vector.shape_cast %26 : vector<192xf32> to vector<1x192xf32>
    %cst_28 = arith.constant dense<0.000000e+00> : vector<1x64xf32>
    %28 = tpu.matmul %24, %19, %cst_28 {dimension_numbers = #tpu.dot_dimension_numbers<[1], [0], [0], [1], [0, 0, 1, 1], [], []>} : vector<1x192xf32>, vector<192x64xf32>, vector<1x64xf32> -> vector<1x64xf32>
    %cst_29 = arith.constant 0.055555556 : f32
    %29 = vector.broadcast %cst_29 : f32 to vector<1x64xf32>
    %30 = arith.mulf %28, %29 : vector<1x64xf32>
    %cst_30 = arith.constant dense<0.000000e+00> : vector<1x64xf32>
    %31 = tpu.matmul %27, %19, %cst_30 {dimension_numbers = #tpu.dot_dimension_numbers<[1], [0], [0], [1], [0, 0, 1, 1], [], []>} : vector<1x192xf32>, vector<192x64xf32>, vector<1x64xf32> -> vector<1x64xf32>
    %cst_31 = arith.constant 0.055555556 : f32
    %32 = vector.broadcast %cst_31 : f32 to vector<1x64xf32>
    %33 = arith.mulf %31, %32 : vector<1x64xf32>
    %34 = arith.mulf %30, %30 : vector<1x64xf32>
    %35 = arith.subf %33, %34 : vector<1x64xf32>
    %cst_32 = arith.constant 0.000000e+00 : f32
    %36 = vector.broadcast %cst_32 : f32 to vector<1x64xf32>
    %37 = arith.maximumf %35, %36 : vector<1x64xf32>
    %cst_33 = arith.constant 9.99999974E-6 : f32
    %38 = vector.broadcast %cst_33 : f32 to vector<1x64xf32>
    %39 = arith.addf %37, %38 : vector<1x64xf32>
    %40 = math.rsqrt %39 : vector<1x64xf32>
    %41 = arith.mulf %21, %40 : vector<1x64xf32>
    %42 = arith.mulf %30, %41 : vector<1x64xf32>
    %43 = arith.subf %22, %42 : vector<1x64xf32>
    %cst_34 = arith.constant dense<0.000000e+00> : vector<1x192xf32>
    %44 = tpu.matmul %41, %20, %cst_34 {dimension_numbers = #tpu.dot_dimension_numbers<[1], [0], [0], [1], [0, 0, 1, 1], [], []>} : vector<1x64xf32>, vector<64x192xf32>, vector<1x192xf32> -> vector<1x192xf32>
    %cst_35 = arith.constant dense<0.000000e+00> : vector<1x192xf32>
    %45 = tpu.matmul %43, %20, %cst_35 {dimension_numbers = #tpu.dot_dimension_numbers<[1], [0], [0], [1], [0, 0, 1, 1], [], []>} : vector<1x64xf32>, vector<64x192xf32>, vector<1x192xf32> -> vector<1x192xf32>
    %46 = vector.broadcast %44 : vector<1x192xf32> to vector<6x192xf32>
    %47 = arith.mulf %18, %46 : vector<6x192xf32>
    %48 = vector.broadcast %45 : vector<1x192xf32> to vector<6x192xf32>
    %49 = arith.addf %47, %48 : vector<6x192xf32>
    %cst_36 = arith.constant 0.000000e+00 : f32
    %50 = vector.broadcast %cst_36 : f32 to vector<6x192xf32>
    %51 = arith.maximumf %49, %50 : vector<6x192xf32>
    %52 = arith.truncf %51 : vector<6x192xf32> to vector<6x192xbf16>
    %c0_37 = arith.constant 0 : index
    %c0_38 = arith.constant 0 : index
    %53 = vector.load %arg11[%c0_37, %c0_38] : memref<192x192xbf16, #tpu.memory_space<vmem>>, vector<192x192xbf16>
    %c0_39 = arith.constant 0 : index
    %c0_40 = arith.constant 0 : index
    %54 = vector.load %arg15[%c0_39, %c0_40] : memref<12x6xbf16, #tpu.memory_space<vmem>>, vector<12x6xbf16>
    %cst_41 = arith.constant dense<0.000000e+00> : vector<12x192xf32>
    %55 = tpu.matmul %54, %52, %cst_41 {dimension_numbers = #tpu.dot_dimension_numbers<[1], [0], [0], [1], [0, 0, 1, 1], [], []>} : vector<12x6xbf16>, vector<6x192xbf16>, vector<12x192xf32> -> vector<12x192xf32>
    %56 = arith.truncf %55 : vector<12x192xf32> to vector<12x192xbf16>
    %cst_42 = arith.constant dense<0.000000e+00> : vector<12x192xf32>
    %57 = tpu.matmul %56, %53, %cst_42 {dimension_numbers = #tpu.dot_dimension_numbers<[1], [0], [0], [1], [0, 0, 1, 1], [], []>} : vector<12x192xbf16>, vector<192x192xbf16>, vector<12x192xf32> -> vector<12x192xf32>
    %c0_43 = arith.constant 0 : index
    %c0_44 = arith.constant 0 : index
    %58 = vector.load %arg12[%c0_43, %c0_44] : memref<192x192xbf16, #tpu.memory_space<vmem>>, vector<192x192xbf16>
    %c0_45 = arith.constant 0 : index
    %c0_46 = arith.constant 0 : index
    %59 = vector.load %arg16[%c0_45, %c0_46] : memref<12x6xbf16, #tpu.memory_space<vmem>>, vector<12x6xbf16>
    %cst_47 = arith.constant dense<0.000000e+00> : vector<12x192xf32>
    %60 = tpu.matmul %59, %52, %cst_47 {dimension_numbers = #tpu.dot_dimension_numbers<[1], [0], [0], [1], [0, 0, 1, 1], [], []>} : vector<12x6xbf16>, vector<6x192xbf16>, vector<12x192xf32> -> vector<12x192xf32>
    %61 = arith.truncf %60 : vector<12x192xf32> to vector<12x192xbf16>
    %cst_48 = arith.constant dense<0.000000e+00> : vector<12x192xf32>
    %62 = tpu.matmul %61, %58, %cst_48 {dimension_numbers = #tpu.dot_dimension_numbers<[1], [0], [0], [1], [0, 0, 1, 1], [], []>} : vector<12x192xbf16>, vector<192x192xbf16>, vector<12x192xf32> -> vector<12x192xf32>
    %63 = arith.addf %57, %62 : vector<12x192xf32>
    %c0_49 = arith.constant 0 : index
    %c0_50 = arith.constant 0 : index
    %64 = vector.load %arg13[%c0_49, %c0_50] : memref<192x192xbf16, #tpu.memory_space<vmem>>, vector<192x192xbf16>
    %c0_51 = arith.constant 0 : index
    %c0_52 = arith.constant 0 : index
    %65 = vector.load %arg17[%c0_51, %c0_52] : memref<12x6xbf16, #tpu.memory_space<vmem>>, vector<12x6xbf16>
    %cst_53 = arith.constant dense<0.000000e+00> : vector<12x192xf32>
    %66 = tpu.matmul %65, %52, %cst_53 {dimension_numbers = #tpu.dot_dimension_numbers<[1], [0], [0], [1], [0, 0, 1, 1], [], []>} : vector<12x6xbf16>, vector<6x192xbf16>, vector<12x192xf32> -> vector<12x192xf32>
    %67 = arith.truncf %66 : vector<12x192xf32> to vector<12x192xbf16>
    %cst_54 = arith.constant dense<0.000000e+00> : vector<12x192xf32>
    %68 = tpu.matmul %67, %64, %cst_54 {dimension_numbers = #tpu.dot_dimension_numbers<[1], [0], [0], [1], [0, 0, 1, 1], [], []>} : vector<12x192xbf16>, vector<192x192xbf16>, vector<12x192xf32> -> vector<12x192xf32>
    %69 = arith.addf %63, %68 : vector<12x192xf32>
    %c0_55 = arith.constant 0 : index
    %c0_56 = arith.constant 0 : index
    %70 = vector.load %arg14[%c0_55, %c0_56] : memref<192x192xbf16, #tpu.memory_space<vmem>>, vector<192x192xbf16>
    %c0_57 = arith.constant 0 : index
    %c0_58 = arith.constant 0 : index
    %71 = vector.load %arg18[%c0_57, %c0_58] : memref<12x6xbf16, #tpu.memory_space<vmem>>, vector<12x6xbf16>
    %cst_59 = arith.constant dense<0.000000e+00> : vector<12x192xf32>
    %72 = tpu.matmul %71, %52, %cst_59 {dimension_numbers = #tpu.dot_dimension_numbers<[1], [0], [0], [1], [0, 0, 1, 1], [], []>} : vector<12x6xbf16>, vector<6x192xbf16>, vector<12x192xf32> -> vector<12x192xf32>
    %73 = arith.truncf %72 : vector<12x192xf32> to vector<12x192xbf16>
    %cst_60 = arith.constant dense<0.000000e+00> : vector<12x192xf32>
    %74 = tpu.matmul %73, %70, %cst_60 {dimension_numbers = #tpu.dot_dimension_numbers<[1], [0], [0], [1], [0, 0, 1, 1], [], []>} : vector<12x192xbf16>, vector<192x192xbf16>, vector<12x192xf32> -> vector<12x192xf32>
    %75 = arith.addf %69, %74 : vector<12x192xf32>
    %c0_61 = arith.constant 0 : index
    %c0_62 = arith.constant 0 : index
    %76 = vector.load %arg19[%c0_61, %c0_62] : memref<192x32xf32, #tpu.memory_space<vmem>>, vector<192x32xf32>
    %c0_63 = arith.constant 0 : index
    %c0_64 = arith.constant 0 : index
    %77 = vector.load %arg20[%c0_63, %c0_64] : memref<32x192xf32, #tpu.memory_space<vmem>>, vector<32x192xf32>
    %c0_65 = arith.constant 0 : index
    %c0_66 = arith.constant 0 : index
    %78 = vector.load %arg21[%c0_65, %c0_66] : memref<1x32xf32, #tpu.memory_space<vmem>>, vector<1x32xf32>
    %c0_67 = arith.constant 0 : index
    %c0_68 = arith.constant 0 : index
    %79 = vector.load %arg22[%c0_67, %c0_68] : memref<1x32xf32, #tpu.memory_space<vmem>>, vector<1x32xf32>
    %cst_69 = arith.constant dense<0.000000e+00> : vector<192xf32>
    %80 = vector.multi_reduction <add>, %75, %cst_69 [0] : vector<12x192xf32> to vector<192xf32>
    %81 = vector.shape_cast %80 : vector<192xf32> to vector<1x192xf32>
    %82 = arith.mulf %75, %75 : vector<12x192xf32>
    %cst_70 = arith.constant dense<0.000000e+00> : vector<192xf32>
    %83 = vector.multi_reduction <add>, %82, %cst_70 [0] : vector<12x192xf32> to vector<192xf32>
    %84 = vector.shape_cast %83 : vector<192xf32> to vector<1x192xf32>
    %cst_71 = arith.constant dense<0.000000e+00> : vector<1x32xf32>
    %85 = tpu.matmul %81, %76, %cst_71 {dimension_numbers = #tpu.dot_dimension_numbers<[1], [0], [0], [1], [0, 0, 1, 1], [], []>} : vector<1x192xf32>, vector<192x32xf32>, vector<1x32xf32> -> vector<1x32xf32>
    %cst_72 = arith.constant 0.013888889 : f32
    %86 = vector.broadcast %cst_72 : f32 to vector<1x32xf32>
    %87 = arith.mulf %85, %86 : vector<1x32xf32>
    %cst_73 = arith.constant dense<0.000000e+00> : vector<1x32xf32>
    %88 = tpu.matmul %84, %76, %cst_73 {dimension_numbers = #tpu.dot_dimension_numbers<[1], [0], [0], [1], [0, 0, 1, 1], [], []>} : vector<1x192xf32>, vector<192x32xf32>, vector<1x32xf32> -> vector<1x32xf32>
    %cst_74 = arith.constant 0.013888889 : f32
    %89 = vector.broadcast %cst_74 : f32 to vector<1x32xf32>
    %90 = arith.mulf %88, %89 : vector<1x32xf32>
    %91 = arith.mulf %87, %87 : vector<1x32xf32>
    %92 = arith.subf %90, %91 : vector<1x32xf32>
    %cst_75 = arith.constant 0.000000e+00 : f32
    %93 = vector.broadcast %cst_75 : f32 to vector<1x32xf32>
    %94 = arith.maximumf %92, %93 : vector<1x32xf32>
    %cst_76 = arith.constant 9.99999974E-6 : f32
    %95 = vector.broadcast %cst_76 : f32 to vector<1x32xf32>
    %96 = arith.addf %94, %95 : vector<1x32xf32>
    %97 = math.rsqrt %96 : vector<1x32xf32>
    %98 = arith.mulf %78, %97 : vector<1x32xf32>
    %99 = arith.mulf %87, %98 : vector<1x32xf32>
    %100 = arith.subf %79, %99 : vector<1x32xf32>
    %cst_77 = arith.constant dense<0.000000e+00> : vector<1x192xf32>
    %101 = tpu.matmul %98, %77, %cst_77 {dimension_numbers = #tpu.dot_dimension_numbers<[1], [0], [0], [1], [0, 0, 1, 1], [], []>} : vector<1x32xf32>, vector<32x192xf32>, vector<1x192xf32> -> vector<1x192xf32>
    %cst_78 = arith.constant dense<0.000000e+00> : vector<1x192xf32>
    %102 = tpu.matmul %100, %77, %cst_78 {dimension_numbers = #tpu.dot_dimension_numbers<[1], [0], [0], [1], [0, 0, 1, 1], [], []>} : vector<1x32xf32>, vector<32x192xf32>, vector<1x192xf32> -> vector<1x192xf32>
    %103 = vector.broadcast %101 : vector<1x192xf32> to vector<12x192xf32>
    %104 = arith.mulf %75, %103 : vector<12x192xf32>
    %105 = vector.broadcast %102 : vector<1x192xf32> to vector<12x192xf32>
    %106 = arith.addf %104, %105 : vector<12x192xf32>
    %cst_79 = arith.constant 0.000000e+00 : f32
    %107 = vector.broadcast %cst_79 : f32 to vector<12x192xf32>
    %108 = arith.maximumf %106, %107 : vector<12x192xf32>
    %109 = arith.truncf %108 : vector<12x192xf32> to vector<12x192xbf16>
    %c0_80 = arith.constant 0 : index
    %c0_81 = arith.constant 0 : index
    %110 = vector.load %arg23[%c0_80, %c0_81] : memref<192x208xbf16, #tpu.memory_space<vmem>>, vector<192x208xbf16>
    %c0_82 = arith.constant 0 : index
    %c0_83 = arith.constant 0 : index
    %111 = vector.load %arg26[%c0_82, %c0_83] : memref<26x12xbf16, #tpu.memory_space<vmem>>, vector<26x12xbf16>
    %cst_84 = arith.constant dense<0.000000e+00> : vector<26x192xf32>
    %112 = tpu.matmul %111, %109, %cst_84 {dimension_numbers = #tpu.dot_dimension_numbers<[1], [0], [0], [1], [0, 0, 1, 1], [], []>} : vector<26x12xbf16>, vector<12x192xbf16>, vector<26x192xf32> -> vector<26x192xf32>
    %113 = arith.truncf %112 : vector<26x192xf32> to vector<26x192xbf16>
    %cst_85 = arith.constant dense<0.000000e+00> : vector<26x208xf32>
    %114 = tpu.matmul %113, %110, %cst_85 {dimension_numbers = #tpu.dot_dimension_numbers<[1], [0], [0], [1], [0, 0, 1, 1], [], []>} : vector<26x192xbf16>, vector<192x208xbf16>, vector<26x208xf32> -> vector<26x208xf32>
    %c0_86 = arith.constant 0 : index
    %c0_87 = arith.constant 0 : index
    %115 = vector.load %arg24[%c0_86, %c0_87] : memref<192x208xbf16, #tpu.memory_space<vmem>>, vector<192x208xbf16>
    %c0_88 = arith.constant 0 : index
    %c0_89 = arith.constant 0 : index
    %116 = vector.load %arg27[%c0_88, %c0_89] : memref<26x12xbf16, #tpu.memory_space<vmem>>, vector<26x12xbf16>
    %cst_90 = arith.constant dense<0.000000e+00> : vector<26x192xf32>
    %117 = tpu.matmul %116, %109, %cst_90 {dimension_numbers = #tpu.dot_dimension_numbers<[1], [0], [0], [1], [0, 0, 1, 1], [], []>} : vector<26x12xbf16>, vector<12x192xbf16>, vector<26x192xf32> -> vector<26x192xf32>
    %118 = arith.truncf %117 : vector<26x192xf32> to vector<26x192xbf16>
    %cst_91 = arith.constant dense<0.000000e+00> : vector<26x208xf32>
    %119 = tpu.matmul %118, %115, %cst_91 {dimension_numbers = #tpu.dot_dimension_numbers<[1], [0], [0], [1], [0, 0, 1, 1], [], []>} : vector<26x192xbf16>, vector<192x208xbf16>, vector<26x208xf32> -> vector<26x208xf32>
    %120 = arith.addf %114, %119 : vector<26x208xf32>
    %c0_92 = arith.constant 0 : index
    %c0_93 = arith.constant 0 : index
    %121 = vector.load %arg25[%c0_92, %c0_93] : memref<192x208xbf16, #tpu.memory_space<vmem>>, vector<192x208xbf16>
    %c0_94 = arith.constant 0 : index
    %c0_95 = arith.constant 0 : index
    %122 = vector.load %arg28[%c0_94, %c0_95] : memref<26x12xbf16, #tpu.memory_space<vmem>>, vector<26x12xbf16>
    %cst_96 = arith.constant dense<0.000000e+00> : vector<26x192xf32>
    %123 = tpu.matmul %122, %109, %cst_96 {dimension_numbers = #tpu.dot_dimension_numbers<[1], [0], [0], [1], [0, 0, 1, 1], [], []>} : vector<26x12xbf16>, vector<12x192xbf16>, vector<26x192xf32> -> vector<26x192xf32>
    %124 = arith.truncf %123 : vector<26x192xf32> to vector<26x192xbf16>
    %cst_97 = arith.constant dense<0.000000e+00> : vector<26x208xf32>
    %125 = tpu.matmul %124, %121, %cst_97 {dimension_numbers = #tpu.dot_dimension_numbers<[1], [0], [0], [1], [0, 0, 1, 1], [], []>} : vector<26x192xbf16>, vector<192x208xbf16>, vector<26x208xf32> -> vector<26x208xf32>
    %126 = arith.addf %120, %125 : vector<26x208xf32>
    %c0_98 = arith.constant 0 : index
    %c0_99 = arith.constant 0 : index
    %127 = vector.load %arg29[%c0_98, %c0_99] : memref<208x16xf32, #tpu.memory_space<vmem>>, vector<208x16xf32>
    %c0_100 = arith.constant 0 : index
    %c0_101 = arith.constant 0 : index
    %128 = vector.load %arg30[%c0_100, %c0_101] : memref<16x208xf32, #tpu.memory_space<vmem>>, vector<16x208xf32>
    %c0_102 = arith.constant 0 : index
    %c0_103 = arith.constant 0 : index
    %129 = vector.load %arg31[%c0_102, %c0_103] : memref<1x16xf32, #tpu.memory_space<vmem>>, vector<1x16xf32>
    %c0_104 = arith.constant 0 : index
    %c0_105 = arith.constant 0 : index
    %130 = vector.load %arg32[%c0_104, %c0_105] : memref<1x16xf32, #tpu.memory_space<vmem>>, vector<1x16xf32>
    %cst_106 = arith.constant dense<0.000000e+00> : vector<208xf32>
    %131 = vector.multi_reduction <add>, %126, %cst_106 [0] : vector<26x208xf32> to vector<208xf32>
    %132 = vector.shape_cast %131 : vector<208xf32> to vector<1x208xf32>
    %133 = arith.mulf %126, %126 : vector<26x208xf32>
    %cst_107 = arith.constant dense<0.000000e+00> : vector<208xf32>
    %134 = vector.multi_reduction <add>, %133, %cst_107 [0] : vector<26x208xf32> to vector<208xf32>
    %135 = vector.shape_cast %134 : vector<208xf32> to vector<1x208xf32>
    %cst_108 = arith.constant dense<0.000000e+00> : vector<1x16xf32>
    %136 = tpu.matmul %132, %127, %cst_108 {dimension_numbers = #tpu.dot_dimension_numbers<[1], [0], [0], [1], [0, 0, 1, 1], [], []>} : vector<1x208xf32>, vector<208x16xf32>, vector<1x16xf32> -> vector<1x16xf32>
    %cst_109 = arith.constant 2.958580e-03 : f32
    %137 = vector.broadcast %cst_109 : f32 to vector<1x16xf32>
    %138 = arith.mulf %136, %137 : vector<1x16xf32>
    %cst_110 = arith.constant dense<0.000000e+00> : vector<1x16xf32>
    %139 = tpu.matmul %135, %127, %cst_110 {dimension_numbers = #tpu.dot_dimension_numbers<[1], [0], [0], [1], [0, 0, 1, 1], [], []>} : vector<1x208xf32>, vector<208x16xf32>, vector<1x16xf32> -> vector<1x16xf32>
    %cst_111 = arith.constant 2.958580e-03 : f32
    %140 = vector.broadcast %cst_111 : f32 to vector<1x16xf32>
    %141 = arith.mulf %139, %140 : vector<1x16xf32>
    %142 = arith.mulf %138, %138 : vector<1x16xf32>
    %143 = arith.subf %141, %142 : vector<1x16xf32>
    %cst_112 = arith.constant 0.000000e+00 : f32
    %144 = vector.broadcast %cst_112 : f32 to vector<1x16xf32>
    %145 = arith.maximumf %143, %144 : vector<1x16xf32>
    %cst_113 = arith.constant 9.99999974E-6 : f32
    %146 = vector.broadcast %cst_113 : f32 to vector<1x16xf32>
    %147 = arith.addf %145, %146 : vector<1x16xf32>
    %148 = math.rsqrt %147 : vector<1x16xf32>
    %149 = arith.mulf %129, %148 : vector<1x16xf32>
    %150 = arith.mulf %138, %149 : vector<1x16xf32>
    %151 = arith.subf %130, %150 : vector<1x16xf32>
    %cst_114 = arith.constant dense<0.000000e+00> : vector<1x208xf32>
    %152 = tpu.matmul %149, %128, %cst_114 {dimension_numbers = #tpu.dot_dimension_numbers<[1], [0], [0], [1], [0, 0, 1, 1], [], []>} : vector<1x16xf32>, vector<16x208xf32>, vector<1x208xf32> -> vector<1x208xf32>
    %cst_115 = arith.constant dense<0.000000e+00> : vector<1x208xf32>
    %153 = tpu.matmul %151, %128, %cst_115 {dimension_numbers = #tpu.dot_dimension_numbers<[1], [0], [0], [1], [0, 0, 1, 1], [], []>} : vector<1x16xf32>, vector<16x208xf32>, vector<1x208xf32> -> vector<1x208xf32>
    %154 = vector.broadcast %152 : vector<1x208xf32> to vector<26x208xf32>
    %155 = arith.mulf %126, %154 : vector<26x208xf32>
    %156 = vector.broadcast %153 : vector<1x208xf32> to vector<26x208xf32>
    %157 = arith.addf %155, %156 : vector<26x208xf32>
    %cst_116 = arith.constant 0.000000e+00 : f32
    %158 = vector.broadcast %cst_116 : f32 to vector<26x208xf32>
    %159 = arith.maximumf %157, %158 : vector<26x208xf32>
    %160 = arith.truncf %159 : vector<26x208xf32> to vector<26x208xbf16>
    %c0_117 = arith.constant 0 : index
    %c0_118 = arith.constant 0 : index
    %161 = vector.load %arg33[%c0_117, %c0_118] : memref<208x28xbf16, #tpu.memory_space<vmem>>, vector<208x28xbf16>
    %c0_119 = arith.constant 0 : index
    %c0_120 = arith.constant 0 : index
    %162 = vector.load %arg37[%c0_119, %c0_120] : memref<56x26xbf16, #tpu.memory_space<vmem>>, vector<56x26xbf16>
    %cst_121 = arith.constant dense<0.000000e+00> : vector<56x208xf32>
    %163 = tpu.matmul %162, %160, %cst_121 {dimension_numbers = #tpu.dot_dimension_numbers<[1], [0], [0], [1], [0, 0, 1, 1], [], []>} : vector<56x26xbf16>, vector<26x208xbf16>, vector<56x208xf32> -> vector<56x208xf32>
    %164 = arith.truncf %163 : vector<56x208xf32> to vector<56x208xbf16>
    %cst_122 = arith.constant dense<0.000000e+00> : vector<56x28xf32>
    %165 = tpu.matmul %164, %161, %cst_122 {dimension_numbers = #tpu.dot_dimension_numbers<[1], [0], [0], [1], [0, 0, 1, 1], [], []>} : vector<56x208xbf16>, vector<208x28xbf16>, vector<56x28xf32> -> vector<56x28xf32>
    %c0_123 = arith.constant 0 : index
    %c0_124 = arith.constant 0 : index
    %166 = vector.load %arg34[%c0_123, %c0_124] : memref<208x28xbf16, #tpu.memory_space<vmem>>, vector<208x28xbf16>
    %c0_125 = arith.constant 0 : index
    %c0_126 = arith.constant 0 : index
    %167 = vector.load %arg38[%c0_125, %c0_126] : memref<56x26xbf16, #tpu.memory_space<vmem>>, vector<56x26xbf16>
    %cst_127 = arith.constant dense<0.000000e+00> : vector<56x208xf32>
    %168 = tpu.matmul %167, %160, %cst_127 {dimension_numbers = #tpu.dot_dimension_numbers<[1], [0], [0], [1], [0, 0, 1, 1], [], []>} : vector<56x26xbf16>, vector<26x208xbf16>, vector<56x208xf32> -> vector<56x208xf32>
    %169 = arith.truncf %168 : vector<56x208xf32> to vector<56x208xbf16>
    %cst_128 = arith.constant dense<0.000000e+00> : vector<56x28xf32>
    %170 = tpu.matmul %169, %166, %cst_128 {dimension_numbers = #tpu.dot_dimension_numbers<[1], [0], [0], [1], [0, 0, 1, 1], [], []>} : vector<56x208xbf16>, vector<208x28xbf16>, vector<56x28xf32> -> vector<56x28xf32>
    %171 = arith.addf %165, %170 : vector<56x28xf32>
    %c0_129 = arith.constant 0 : index
    %c0_130 = arith.constant 0 : index
    %172 = vector.load %arg35[%c0_129, %c0_130] : memref<208x28xbf16, #tpu.memory_space<vmem>>, vector<208x28xbf16>
    %c0_131 = arith.constant 0 : index
    %c0_132 = arith.constant 0 : index
    %173 = vector.load %arg39[%c0_131, %c0_132] : memref<56x26xbf16, #tpu.memory_space<vmem>>, vector<56x26xbf16>
    %cst_133 = arith.constant dense<0.000000e+00> : vector<56x208xf32>
    %174 = tpu.matmul %173, %160, %cst_133 {dimension_numbers = #tpu.dot_dimension_numbers<[1], [0], [0], [1], [0, 0, 1, 1], [], []>} : vector<56x26xbf16>, vector<26x208xbf16>, vector<56x208xf32> -> vector<56x208xf32>
    %175 = arith.truncf %174 : vector<56x208xf32> to vector<56x208xbf16>
    %cst_134 = arith.constant dense<0.000000e+00> : vector<56x28xf32>
    %176 = tpu.matmul %175, %172, %cst_134 {dimension_numbers = #tpu.dot_dimension_numbers<[1], [0], [0], [1], [0, 0, 1, 1], [], []>} : vector<56x208xbf16>, vector<208x28xbf16>, vector<56x28xf32> -> vector<56x28xf32>
    %177 = arith.addf %171, %176 : vector<56x28xf32>
    %c0_135 = arith.constant 0 : index
    %c0_136 = arith.constant 0 : index
    %178 = vector.load %arg36[%c0_135, %c0_136] : memref<208x28xbf16, #tpu.memory_space<vmem>>, vector<208x28xbf16>
    %c0_137 = arith.constant 0 : index
    %c0_138 = arith.constant 0 : index
    %179 = vector.load %arg40[%c0_137, %c0_138] : memref<56x26xbf16, #tpu.memory_space<vmem>>, vector<56x26xbf16>
    %cst_139 = arith.constant dense<0.000000e+00> : vector<56x208xf32>
    %180 = tpu.matmul %179, %160, %cst_139 {dimension_numbers = #tpu.dot_dimension_numbers<[1], [0], [0], [1], [0, 0, 1, 1], [], []>} : vector<56x26xbf16>, vector<26x208xbf16>, vector<56x208xf32> -> vector<56x208xf32>
    %181 = arith.truncf %180 : vector<56x208xf32> to vector<56x208xbf16>
    %cst_140 = arith.constant dense<0.000000e+00> : vector<56x28xf32>
    %182 = tpu.matmul %181, %178, %cst_140 {dimension_numbers = #tpu.dot_dimension_numbers<[1], [0], [0], [1], [0, 0, 1, 1], [], []>} : vector<56x208xbf16>, vector<208x28xbf16>, vector<56x28xf32> -> vector<56x28xf32>
    %183 = arith.addf %177, %182 : vector<56x28xf32>
    %c0_141 = arith.constant 0 : index
    %c0_142 = arith.constant 0 : index
    %184 = vector.load %arg41[%c0_141, %c0_142] : memref<1x28xf32, #tpu.memory_space<vmem>>, vector<1x28xf32>
    %185 = vector.broadcast %184 : vector<1x28xf32> to vector<56x28xf32>
    %186 = arith.addf %183, %185 : vector<56x28xf32>
    %187 = math.tanh %186 : vector<56x28xf32>
    %c0_143 = arith.constant 0 : index
    %c0_144 = arith.constant 0 : index
    %188 = vector.load %arg42[%c0_143, %c0_144] : memref<56x28xf32, #tpu.memory_space<vmem>>, vector<56x28xf32>
    tpu.vector_store %arg42[%c0_143, %c0_144], %187 {strides = array<i32>} : memref<56x28xf32, #tpu.memory_space<vmem>>, vector<56x28xf32>,
    return
  }
}

</mosaic_0001>

<bundles_post_ra>
// kernel: forward.1
= control target key start
LH: loop header
LB: loop body
LE: loop exit
PB: predicated region body
PF: predicated region fallthrough
CT: control target
= control target key end

     0   :  { %s7135_s6 = smov 1   ;;  %s7136_s10 = smov 2   ;;  %s8165_s0 = inlined_call_operand.smem [shape: u32[43], index: -1, kind: input, shape index: {}] }
   0x1   :  { %s7225_s5 = sld [smem:[%s8165_s0]]   ;;  %s7137_s14 = smov 3  }
   0x2   :  { %s7230_s9 = sld [smem:[%s8165_s0 + %s7135_s6]]   ;;  %s7138_s18 = smov 4  }
   0x3   :  { %s7235_s13 = sld [smem:[%s8165_s0 + %s7136_s10]]   ;;  %s7139_s22 = smov 5  }
   0x4   :  { %s7240_s17 = sld [smem:[%s8165_s0 + %s7137_s14]]   ;;  %s7140_s26 = smov 6  }
   0x5   :  { %s7245_s21 = sld [smem:[%s8165_s0 + %s7138_s18]]   ;;  %s7141_s30 = smov 7  }
   0x6   :  { %s7250_s25 = sld [smem:[%s8165_s0 + %s7139_s22]]   ;;  %s7142_s4 = smov 8  }
   0x7   :  { %8185 = sst [smem:[#allocation72_spill]] %s7225_s5  ;;  %s7143_s10 = smov 9  }
   0x8   :  { %s7255_s29 = sld [smem:[%s8165_s0 + %s7140_s26]]   ;;  %s7144_s15 = smov 10  }
   0x9   :  { %8186 = sst [smem:[#allocation73_spill]] %s7235_s13  ;;  %s7145_s20 = smov 11  }
   0xa   :  { %s7260_s3 = sld [smem:[%s8165_s0 + %s7141_s30]]   ;;  %s7146_s26 = smov 12  }
   0xb   :  { %8187 = sst [smem:[#allocation74_spill]] %s7245_s21  ;;  %s7147_s1 = smov 13  }
   0xc   :  { %s7265_s8 = sld [smem:[%s8165_s0 + %s7142_s4]]   ;;  %s7148_s7 = smov 14  }
   0xd   :  { %s7270_s14 = sld [smem:[%s8165_s0 + %s7143_s10]]   ;;  %s7150_s22 = smov 16  }
   0xe   :  { %8188 = sst [smem:[#allocation75_spill]] %s7255_s29  ;;  %s7151_s28 = smov 17  }
   0xf   :  { %s7275_s19 = sld [smem:[%s8165_s0 + %s7144_s15]]   ;;  %s7149_s15 = smov 15  }
  0x10   :  { %s7280_s24 = sld [smem:[%s8165_s0 + %s7145_s20]]  }
  0x11   :  { %s7285_s30 = sld [smem:[%s8165_s0 + %s7146_s26]]  }
  0x12   :  { %8189 = sst [smem:[#allocation76_spill]] %s7265_s8 }
  0x13   :  { %8190 = sst [smem:[#allocation77_spill]] %s7270_s14 }
  0x14   :  { %s7290_s6 = sld [smem:[%s8165_s0 + %s7147_s1]]  }
  0x15   :  { %8191 = sst [smem:[#allocation78_spill]] %s7275_s19 }
  0x16   :  { %s7295_s12 = sld [smem:[%s8165_s0 + %s7148_s7]]   ;;  %s7152_s7 = smov 18  }
  0x17   :  { %8192 = sst [smem:[#allocation79_spill]] %s7285_s30 }
  0x18   :  { %s7300_s20 = sld [smem:[%s8165_s0 + %s7149_s15]]   ;;  %s7153_s15 = smov 19  }
  0x19   :  { %s7305_s27 = sld [smem:[%s8165_s0 + %s7150_s22]]   ;;  %s7154_s22 = smov 20  }
  0x1a   :  { %s7310_s4 = sld [smem:[%s8165_s0 + %s7151_s28]]   ;;  %s7155_s28 = smov 21  }
  0x1b   :  { %s7315_s19 = sld [smem:[%s8165_s0 + %s7152_s7]]   ;;  %s7156_s7 = smov 22  }
  0x1c   :  { %8193 = sst [smem:[#allocation80_spill]] %s7295_s12 }
  0x1d   :  { %s7320_s14 = sld [smem:[%s8165_s0 + %s7153_s15]]   ;;  %s7157_s15 = smov 23  }
  0x1e   :  { %s7330_s12 = sld [smem:[%s8165_s0 + %s7155_s28]]   ;;  %s7159_s28 = smov 25  }
  0x1f   :  { %8194 = sst [smem:[#allocation81_spill]] %s7305_s27 }
  0x20   :  { %s7325_s27 = sld [smem:[%s8165_s0 + %s7154_s22]]   ;;  %s7158_s22 = smov 24  }
  0x21   :  { %8195 = sst [smem:[#allocation82_spill]] %s7315_s19 }
  0x22   :  { %s7335_s19 = sld [smem:[%s8165_s0 + %s7156_s7]]   ;;  %s7160_s7 = smov 26  }
  0x23   :  { %8196 = sst [smem:[#allocation83_spill]] %s7320_s14 }
  0x24   :  { %8197 = sst [smem:[#allocation84_spill]] %s7330_s12 }
  0x25   :  { %s7340_s14 = sld [smem:[%s8165_s0 + %s7157_s15]]   ;;  %s7161_s15 = smov 27  }
  0x26   :  { %s7345_s30 = sld [smem:[%s8165_s0 + %s7158_s22]]   ;;  %s7162_s22 = smov 28  }
  0x27   :  { %s7350_s12 = sld [smem:[%s8165_s0 + %s7159_s28]]   ;;  %s7163_s28 = smov 29  }
  0x28   :  { %8198 = sst [smem:[#allocation85_spill]] %s7335_s19 }
  0x29   :  { %s7355_s19 = sld [smem:[%s8165_s0 + %s7160_s7]]   ;;  %s7164_s7 = smov 30  }
  0x2a   :  { %s7365_s8 = sld [smem:[%s8165_s0 + %s7162_s22]]   ;;  %s7166_s22 = smov 32  }
  0x2b   :  { %8199 = sst [smem:[#allocation86_spill]] %s7340_s14 }
  0x2c   :  { %s7360_s14 = sld [smem:[%s8165_s0 + %s7161_s15]]   ;;  %s7165_s15 = smov 31  }
  0x2d   :  { %8200 = sst [smem:[#allocation87_spill]] %s7350_s12 }
  0x2e   :  { %s7370_s12 = sld [smem:[%s8165_s0 + %s7163_s28]]   ;;  %s7167_s28 = smov 33  }
  0x2f   :  { %s7375_s29 = sld [smem:[%s8165_s0 + %s7164_s7]]   ;;  %s7168_s7 = smov 34  }
  0x30   :  { %s7385_s21 = sld [smem:[%s8165_s0 + %s7166_s22]]   ;;  %s7170_s22 = smov 36  }
  0x32   :  { %8201 = sst [smem:[#allocation88_spill]] %s7360_s14 }
  0x33   :  { %s7380_s14 = sld [smem:[%s8165_s0 + %s7165_s15]]   ;;  %s7169_s15 = smov 35  }
  0x34   :  { %8202 = sst [smem:[#allocation89_spill]] %s7370_s12 }
  0x35   :  { %8203 = sst [smem:[#allocation90_spill]] %s7375_s29 }
  0x36   :  { %8205 = sst [smem:[#allocation92_spill]] %s7385_s21 }
  0x37   :  { %s7390_s12 = sld [smem:[%s8165_s0 + %s7167_s28]]   ;;  %s7171_s28 = smov 37  }
  0x38   :  { %s7395_s29 = sld [smem:[%s8165_s0 + %s7168_s7]]   ;;  %s7172_s7 = smov 38  }
  0x39   :  { %8204 = sst [smem:[#allocation91_spill]] %s7380_s14 }
  0x3a   :  { %s7400_s14 = sld [smem:[%s8165_s0 + %s7169_s15]]   ;;  %s7173_s15 = smov 39  }
  0x3b   :  { %s7405_s21 = sld [smem:[%s8165_s0 + %s7170_s22]]   ;;  %s7174_s22 = smov 40  }
  0x3c   :  { %s7410_s13 = sld [smem:[%s8165_s0 + %s7171_s28]]   ;;  %s7175_s28 = smov 41  }
  0x3d   :  { %s7420_s5 = sld [smem:[%s8165_s0 + %s7173_s15]]  }
  0x3e   :  { %8206 = sst [smem:[#allocation93_spill]] %s7395_s29 }
  0x3f   :  { %s7415_s29 = sld [smem:[%s8165_s0 + %s7172_s7]]   ;;  %s7176_s7 = smov 42  }
  0x41   :  { %8207 = sst [smem:[#allocation94_spill]] %s7405_s21 }
  0x42   :  { %8208 = sst [smem:[#allocation95_spill]] %s7410_s13 }
  0x43   :  { %s7425_s21 = sld [smem:[%s8165_s0 + %s7174_s22]]  }
  0x44   :  { %s7430_s13 = sld [smem:[%s8165_s0 + %s7175_s28]]  }
  0x45   :  { %8209 = sst [smem:[#allocation96_spill]] %s7415_s29 }
  0x46   :  { %s7435_s29 = sld [smem:[%s8165_s0 + %s7176_s7]]  }
  0x47   :  { %90 = vsyncpa [#allocation3], 0 }
  0x48   :  { %91 = vsyncpa [#allocation6], 0 }
  0x49   :  { %92 = vsyncpa [#allocation9], 0 }
  0x4a   :  { %93 = vsyncpa [#allocation12], 0 }
  0x4b   :  { %94 = vsyncpa [#allocation15], 0 }
  0x4c   :  { %95 = vsyncpa [#allocation18], 0 }
  0x4d   :  { %96 = vsyncpa [#allocation21], 0 }
  0x4e   :  { %97 = vsyncpa [#allocation24], 0 }
  0x4f   :  { %98 = vsyncpa [#allocation27], 0 }
  0x50   :  { %99 = vsyncpa [#allocation30], 0 }
  0x51   :  { %100 = vsyncpa [#allocation33], 0 }
  0x52   :  { %101 = vsyncpa [#allocation36], 0 }
  0x53   :  { %102 = vsyncpa [#allocation39], 0 }
  0x54   :  { %103 = vsyncpa [#allocation42], 0 }
  0x55   :  { %104 = vsyncpa [#allocation45], 0 }
  0x56   :  { %105 = vsyncpa [#allocation48], 0 }
  0x57   :  { %106 = vsyncpa [#allocation51], 0  ;;  %s123_s0 = sshll.u32 %s7230_s9, 4  ;;  %s124_s0 = int_to_ptr.hbm [resolvable:$true] %s123_s0 }
  0x58   :  { %107 = vsyncpa [#allocation4], 0  ;;  %s7177_s15 = smov [#allocation5]   ;;  %s149_s18 = sshll.u32 %s7240_s17, 4  ;;  %s150_s18 = int_to_ptr.hbm [resolvable:$true] %s149_s18 }
  0x59   :  { %s125_s16 = sshll.u32 %s7177_s15, 4  ;;  %s6283_s22 = sshra.s32 %s124_s0, 4  ;;  %s126_s16 = int_to_ptr.vmem [resolvable:$true] %s125_s16  ;;  %s6284_s22 = int_to_ptr.hbm [resolvable:$true] %s6283_s22 }
  0x5a   :  { %s6285_s23 = scalar_lea.hbm %s6284_s22, 16  ;;  %s6287_s26 = scalar_lea.hbm %s7230_s9, 16 }
  0x5b   :  { %p6286_p0 = scmp.ne.s32.totalorder %s6284_s22, %s6285_s23  ;;  %p6288_p1 = scmp.lt.s32.totalorder %s6284_s22, %s7230_s9 }
  0x5c   :  { %p6289_p2 = scmp.lt.s32.totalorder %s6287_s26, %s6285_s23 }
  0x5e   :  { %p6290_p3 = por %p6289_p2, %p6288_p1 }
  0x60   :  { %p6291_p4 = pnand %p6290_p3, %p6286_p0 }
  0x62   :  { %6294 = shalt.err (!%p6291_p4)
}
  0x63   :  { %s7178_s28 = smov 128   ;;  %s7179_s1 = smov 8  }
  0x64   :  { %131 = dma.hbm_to_vmem [thread:$0]  %s124_s0, 256, %s126_s16, [#allocation6], %s7178_s28, %s7178_s28, %s7179_s1  }
  0x65   :  { %s7180_s2 = smov [#allocation8]   ;;  %s174_s10 = sshll.u32 %s7250_s25, 4  ;;  %s175_s10 = int_to_ptr.hbm [resolvable:$true] %s174_s10 }
  0x66   :  { %s151_s7 = sshll.u32 %s7180_s2, 4  ;;  %s6307_s9 = sshra.s32 %s150_s18, 4  ;;  %s152_s7 = int_to_ptr.vmem [resolvable:$true] %s151_s7  ;;  %s6308_s9 = int_to_ptr.hbm [resolvable:$true] %s6307_s9 }
  0x67   :  { %s6309_s11 = scalar_lea.hbm %s6308_s9, 16  ;;  %s6311_s15 = scalar_lea.hbm %s7240_s17, 16 }
  0x68   :  { %p6310_p5 = scmp.ne.s32.totalorder %s6308_s9, %s6309_s11  ;;  %p6312_p6 = scmp.lt.s32.totalorder %s6308_s9, %s7240_s17 }
  0x69   :  { %p6313_p7 = scmp.lt.s32.totalorder %s6311_s15, %s6309_s11 }
  0x6b   :  { %p6314_p8 = por %p6313_p7, %p6312_p6 }
  0x6d   :  { %p6315_p9 = pnand %p6314_p8, %p6310_p5 }
  0x6f   :  { %6318 = shalt.err (!%p6315_p9)
}
  0x70   :  { %157 = dma.hbm_to_vmem [thread:$0]  %s150_s18, 256, %s152_s7, [#allocation9], %s7178_s28, %s7178_s28, %s7179_s1  }
  0x71   :  { %s195_s0 = sshll.u32 %s7260_s3, 4  ;;  %s7181_s16 = smov [#allocation11]   ;;  %s7451_s0 = int_to_ptr.hbm [resolvable:$true] %s195_s0 }
  0x72   :  { %s176_s22 = sshll.u32 %s7181_s16, 4  ;;  %s6331_s23 = sshra.s32 %s175_s10, 4  ;;  %s177_s22 = int_to_ptr.vmem [resolvable:$true] %s176_s22  ;;  %s6332_s23 = int_to_ptr.hbm [resolvable:$true] %s6331_s23 }
  0x73   :  { %s6333_s17 = scalar_lea.hbm %s6332_s23, 4  ;;  %s6335_s26 = scalar_lea.hbm %s7250_s25, 4 }
  0x74   :  { %p6334_p10 = scmp.ne.s32.totalorder %s6332_s23, %s6333_s17  ;;  %p6336_p11 = scmp.lt.s32.totalorder %s6332_s23, %s7250_s25 }
  0x75   :  { %p6337_p12 = scmp.lt.s32.totalorder %s6335_s26, %s6333_s17 }
  0x77   :  { %p6338_p13 = por %p6337_p12, %p6336_p11 }
  0x79   :  { %p6339_p0 = pnand %p6338_p13, %p6334_p10 }
  0x7b   :  { %6342 = shalt.err (!%p6339_p0)
}
  0x7c   :  { %179 = dma.hbm_to_vmem [thread:$0]  %s175_s10, 64, %s177_s22, [#allocation12]  }
  0x7d   :  { %s7182_s18 = smov [#allocation14]   ;;  %s225_s7 = sshll.u32 %s7280_s24, 4  ;;  %s7456_s7 = int_to_ptr.hbm [resolvable:$true] %s225_s7 }
  0x7e   :  { %s197_s2 = sshll.u32 %s7182_s18, 4  ;;  %s6355_s9 = sshra.s32 %s7451_s0, 4  ;;  %s198_s2 = int_to_ptr.vmem [resolvable:$true] %s197_s2  ;;  %s6356_s9 = int_to_ptr.hbm [resolvable:$true] %s6355_s9 }
  0x7f   :  { %s6357_s11 = scalar_lea.hbm %s6356_s9, 192  ;;  %s6359_s25 = scalar_lea.hbm %s7260_s3, 192 }
  0x80   :  { %p6358_p1 = scmp.ne.s32.totalorder %s6356_s9, %s6357_s11  ;;  %p6360_p2 = scmp.lt.s32.totalorder %s6356_s9, %s7260_s3 }
  0x81   :  { %p6361_p3 = scmp.lt.s32.totalorder %s6359_s25, %s6357_s11 }
  0x83   :  { %p6362_p4 = por %p6361_p3, %p6360_p2 }
  0x85   :  { %p6363_p5 = pnand %p6362_p4, %p6358_p1 }
  0x87   :  { %6366 = shalt.err (!%p6363_p5)
}
  0x88   :  { %203 = dma.hbm_to_vmem [thread:$0]  %s7451_s0, 3072, %s198_s2, [#allocation15], %s7178_s28, %s7178_s28, %s7179_s1  }
  0x89   :  { %s251_s10 = sshll.u32 %s7290_s6, 4  ;;  %s7183_s15 = smov [#allocation17]   ;;  %s7466_s10 = int_to_ptr.hbm [resolvable:$true] %s251_s10 }
  0x8a   :  { %s227_s16 = sshll.u32 %s7183_s15, 4  ;;  %s6379_s3 = sshra.s32 %s7456_s7, 4  ;;  %s228_s16 = int_to_ptr.vmem [resolvable:$true] %s227_s16  ;;  %s6380_s3 = int_to_ptr.hbm [resolvable:$true] %s6379_s3 }
  0x8b   :  { %s6381_s22 = scalar_lea.hbm %s6380_s3, 192  ;;  %s6383_s23 = scalar_lea.hbm %s7280_s24, 192 }
  0x8c   :  { %p6382_p6 = scmp.ne.s32.totalorder %s6380_s3, %s6381_s22  ;;  %p6384_p7 = scmp.lt.s32.totalorder %s6380_s3, %s7280_s24 }
  0x8d   :  { %p6385_p8 = scmp.lt.s32.totalorder %s6383_s23, %s6381_s22 }
  0x8f   :  { %p6386_p9 = por %p6385_p8, %p6384_p7 }
  0x91   :  { %p6387_p10 = pnand %p6386_p9, %p6382_p6 }
  0x93   :  { %6390 = shalt.err (!%p6387_p10)
}
  0x94   :  { %233 = dma.hbm_to_vmem [thread:$0]  %s7456_s7, 3072, %s228_s16, [#allocation18], %s7178_s28, %s7178_s28, %s7179_s1  }
  0x95   :  { %s7184_s0 = smov [#allocation20]   ;;  %s277_s26 = sshll.u32 %s7300_s20, 4  ;;  %s7476_s26 = int_to_ptr.hbm [resolvable:$true] %s277_s26 }
  0x96   :  { %s253_s17 = sshll.u32 %s7184_s0, 4  ;;  %s6403_s24 = sshra.s32 %s7466_s10, 4  ;;  %s254_s17 = int_to_ptr.vmem [resolvable:$true] %s253_s17  ;;  %s6404_s24 = int_to_ptr.hbm [resolvable:$true] %s6403_s24 }
  0x97   :  { %s6405_s18 = scalar_lea.hbm %s6404_s24, 192  ;;  %s6407_s2 = scalar_lea.hbm %s7290_s6, 192 }
  0x98   :  { %p6406_p11 = scmp.ne.s32.totalorder %s6404_s24, %s6405_s18  ;;  %p6408_p12 = scmp.lt.s32.totalorder %s6404_s24, %s7290_s6 }
  0x99   :  { %p6409_p13 = scmp.lt.s32.totalorder %s6407_s2, %s6405_s18 }
  0x9b   :  { %p6410_p0 = por %p6409_p13, %p6408_p12 }
  0x9d   :  { %p6411_p1 = pnand %p6410_p0, %p6406_p11 }
  0x9f   :  { %6414 = shalt.err (!%p6411_p1)
}
  0xa0   :  { %259 = dma.hbm_to_vmem [thread:$0]  %s7466_s10, 3072, %s254_s17, [#allocation21], %s7178_s28, %s7178_s28, %s7179_s1  }
  0xa1   :  { %s7185_s7 = smov [#allocation23]   ;;  %s303_s11 = sshll.u32 %s7310_s4, 4  ;;  %s304_s11 = int_to_ptr.hbm [resolvable:$true] %s303_s11 }
  0xa2   :  { %s279_s9 = sshll.u32 %s7185_s7, 4  ;;  %s6427_s25 = sshra.s32 %s7476_s26, 4  ;;  %s280_s9 = int_to_ptr.vmem [resolvable:$true] %s279_s9  ;;  %s6428_s25 = int_to_ptr.hbm [resolvable:$true] %s6427_s25 }
  0xa3   :  { %s6429_s6 = scalar_lea.hbm %s6428_s25, 8  ;;  %s6431_s15 = scalar_lea.hbm %s7300_s20, 8 }
  0xa4   :  { %p6430_p2 = scmp.ne.s32.totalorder %s6428_s25, %s6429_s6  ;;  %p6432_p3 = scmp.lt.s32.totalorder %s6428_s25, %s7300_s20 }
  0xa5   :  { %p6433_p4 = scmp.lt.s32.totalorder %s6431_s15, %s6429_s6 }
  0xa7   :  { %p6434_p5 = por %p6433_p4, %p6432_p3 }
  0xa9   :  { %p6435_p6 = pnand %p6434_p5, %p6430_p2 }
  0xab   :  { %6438 = shalt.err (!%p6435_p6)
}
  0xac   :  { %s7186_s16 = smov 64   ;;  %s7187_s3 = smov 4  }
  0xad   :  { %285 = dma.hbm_to_vmem [thread:$0]  %s7476_s26, 128, %s280_s9, [#allocation24], %s7186_s16, %s7186_s16, %s7187_s3  }
  0xae   :  { %s7188_s10 = smov [#allocation26]   ;;  %s6451_s23 = sshra.s32 %s304_s11, 4  ;;  %s6452_s23 = int_to_ptr.hbm [resolvable:$true] %s6451_s23 }
  0xaf   :  { %s305_s22 = sshll.u32 %s7188_s10, 4  ;;  %s6453_s20 = scalar_lea.hbm %s6452_s23, 8  ;;  %s306_s22 = int_to_ptr.vmem [resolvable:$true] %s305_s22 }
  0xb0   :  { %p6454_p7 = scmp.ne.s32.totalorder %s6452_s23, %s6453_s20  ;;  %s6455_s0 = scalar_lea.hbm %s7310_s4, 8 }
  0xb1   :  { %p6456_p8 = scmp.lt.s32.totalorder %s6452_s23, %s7310_s4  ;;  %p6457_p9 = scmp.lt.s32.totalorder %s6455_s0, %s6453_s20 }
  0xb3   :  { %p6458_p10 = por %p6457_p9, %p6456_p8 }
  0xb5   :  { %p6459_p11 = pnand %p6458_p10, %p6454_p7 }
  0xb7   :  { %6462 = shalt.err (!%p6459_p11)
}
  0xb8   :  { %311 = dma.hbm_to_vmem [thread:$0]  %s304_s11, 128, %s306_s22, [#allocation27], %s7186_s16, %s7186_s16, %s7187_s3  }
  0xb9   :  { %s331_s17 = sshll.u32 %s7325_s27, 4  ;;  %s7189_s26 = smov [#allocation29]   ;;  %s332_s17 = int_to_ptr.hbm [resolvable:$true] %s331_s17 }
  0xba   :  { %s333_s24 = sshll.u32 %s7189_s26, 4  ;;  %s361_s18 = sshll.u32 %s7345_s30, 4  ;;  %s334_s24 = int_to_ptr.vmem [resolvable:$true] %s333_s24  ;;  %s362_s18 = int_to_ptr.hbm [resolvable:$true] %s361_s18 }
  0xbb   :  { %s6475_s2 = sshra.s32 %s332_s17, 4  ;;  %s6479_s7 = scalar_lea.hbm %s7325_s27, 64  ;;  %s6476_s2 = int_to_ptr.hbm [resolvable:$true] %s6475_s2 }
  0xbc   :  { %s6477_s4 = scalar_lea.hbm %s6476_s2, 64  ;;  %p6480_p13 = scmp.lt.s32.totalorder %s6476_s2, %s7325_s27 }
  0xbd   :  { %p6478_p12 = scmp.ne.s32.totalorder %s6476_s2, %s6477_s4  ;;  %p6481_p0 = scmp.lt.s32.totalorder %s6479_s7, %s6477_s4 }
  0xbf   :  { %p6482_p1 = por %p6481_p0, %p6480_p13 }
  0xc1   :  { %p6483_p2 = pnand %p6482_p1, %p6478_p12 }
  0xc3   :  { %6486 = shalt.err (!%p6483_p2)
}
  0xc4   :  { %s7190_s9 = smov 256   ;;  %s7191_s11 = smov 16  }
  0xc5   :  { %339 = dma.hbm_to_vmem [thread:$0]  %s332_s17, 1024, %s334_s24, [#allocation30], %s7190_s9, %s7190_s9, %s7191_s11  }
  0xc6   :  { %s7192_s25 = smov [#allocation32]   ;;  %s387_s15 = sshll.u32 %s7355_s19, 4  ;;  %s7506_s15 = int_to_ptr.hbm [resolvable:$true] %s387_s15 }
  0xc7   :  { %s363_s6 = sshll.u32 %s7192_s25, 4  ;;  %s6499_s27 = sshra.s32 %s362_s18, 4  ;;  %s364_s6 = int_to_ptr.vmem [resolvable:$true] %s363_s6  ;;  %s6500_s27 = int_to_ptr.hbm [resolvable:$true] %s6499_s27 }
  0xc8   :  { %s6501_s10 = scalar_lea.hbm %s6500_s27, 192  ;;  %s6503_s22 = scalar_lea.hbm %s7345_s30, 192 }
  0xc9   :  { %p6502_p3 = scmp.ne.s32.totalorder %s6500_s27, %s6501_s10  ;;  %p6504_p4 = scmp.lt.s32.totalorder %s6500_s27, %s7345_s30 }
  0xca   :  { %p6505_p5 = scmp.lt.s32.totalorder %s6503_s22, %s6501_s10 }
  0xcc   :  { %p6506_p6 = por %p6505_p5, %p6504_p4 }
  0xce   :  { %p6507_p7 = pnand %p6506_p6, %p6502_p3 }
  0xd0   :  { %6510 = shalt.err (!%p6507_p7)
}
  0xd1   :  { %369 = dma.hbm_to_vmem [thread:$0]  %s362_s18, 3072, %s364_s6, [#allocation33], %s7178_s28, %s7178_s28, %s7179_s1  }
  0xd2   :  { %s413_s23 = sshll.u32 %s7365_s8, 4  ;;  %s7193_s20 = smov [#allocation35]   ;;  %s7514_s23 = int_to_ptr.hbm [resolvable:$true] %s413_s23 }
  0xd3   :  { %s389_s0 = sshll.u32 %s7193_s20, 4  ;;  %s6523_s17 = sshra.s32 %s7506_s15, 4  ;;  %s390_s0 = int_to_ptr.vmem [resolvable:$true] %s389_s0  ;;  %s6524_s17 = int_to_ptr.hbm [resolvable:$true] %s6523_s17 }
  0xd4   :  { %s6525_s30 = scalar_lea.hbm %s6524_s17, 16  ;;  %s6527_s26 = scalar_lea.hbm %s7355_s19, 16 }
  0xd5   :  { %p6526_p8 = scmp.ne.s32.totalorder %s6524_s17, %s6525_s30  ;;  %p6528_p9 = scmp.lt.s32.totalorder %s6524_s17, %s7355_s19 }
  0xd6   :  { %p6529_p10 = scmp.lt.s32.totalorder %s6527_s26, %s6525_s30 }
  0xd8   :  { %p6530_p11 = por %p6529_p10, %p6528_p9 }
  0xda   :  { %p6531_p12 = pnand %p6530_p11, %p6526_p8 }
  0xdc   :  { %6534 = shalt.err (!%p6531_p12)
}
  0xdd   :  { %395 = dma.hbm_to_vmem [thread:$0]  %s7506_s15, 256, %s390_s0, [#allocation36], %s7186_s16, %s7186_s16, %s7187_s3  }
  0xde   :  { %s7194_s24 = smov [#allocation38]   ;;  %s445_s2 = sshll.u32 %s7390_s12, 4  ;;  %s7524_s2 = int_to_ptr.hbm [resolvable:$true] %s445_s2 }
  0xdf   :  { %s415_s18 = sshll.u32 %s7194_s24, 4  ;;  %s6547_s19 = sshra.s32 %s7514_s23, 4  ;;  %s416_s18 = int_to_ptr.vmem [resolvable:$true] %s415_s18  ;;  %s6548_s19 = int_to_ptr.hbm [resolvable:$true] %s6547_s19 }
  0xe0   :  { %s6549_s4 = scalar_lea.hbm %s6548_s19, 16  ;;  %s6551_s7 = scalar_lea.hbm %s7365_s8, 16 }
  0xe1   :  { %p6550_p13 = scmp.ne.s32.totalorder %s6548_s19, %s6549_s4  ;;  %p6552_p0 = scmp.lt.s32.totalorder %s6548_s19, %s7365_s8 }
  0xe2   :  { %p6553_p1 = scmp.lt.s32.totalorder %s6551_s7, %s6549_s4 }
  0xe4   :  { %p6554_p2 = por %p6553_p1, %p6552_p0 }
  0xe6   :  { %p6555_p3 = pnand %p6554_p2, %p6550_p13 }
  0xe8   :  { %6558 = shalt.err (!%p6555_p3)
}
  0xe9   :  { %421 = dma.hbm_to_vmem [thread:$0]  %s7514_s23, 256, %s416_s18, [#allocation39], %s7186_s16, %s7186_s16, %s7187_s3  }
  0xea   :  { %s471_s25 = sshll.u32 %s7400_s14, 4  ;;  %s7195_s6 = smov [#allocation41]   ;;  %s7534_s25 = int_to_ptr.hbm [resolvable:$true] %s471_s25 }
  0xeb   :  { %s447_s15 = sshll.u32 %s7195_s6, 4  ;;  %s6571_s8 = sshra.s32 %s7524_s2, 4  ;;  %s448_s15 = int_to_ptr.vmem [resolvable:$true] %s447_s15  ;;  %s6572_s8 = int_to_ptr.hbm [resolvable:$true] %s6571_s8 }
  0xec   :  { %s6573_s27 = scalar_lea.hbm %s6572_s8, 104  ;;  %s6575_s10 = scalar_lea.hbm %s7390_s12, 104 }
  0xed   :  { %p6574_p4 = scmp.ne.s32.totalorder %s6572_s8, %s6573_s27  ;;  %p6576_p5 = scmp.lt.s32.totalorder %s6572_s8, %s7390_s12 }
  0xee   :  { %p6577_p6 = scmp.lt.s32.totalorder %s6575_s10, %s6573_s27 }
  0xf0   :  { %p6578_p7 = por %p6577_p6, %p6576_p5 }
  0xf2   :  { %p6579_p8 = pnand %p6578_p7, %p6574_p4 }
  0xf4   :  { %6582 = shalt.err (!%p6579_p8)
}
  0xf5   :  { %s8210_s22 = sld [smem:[#allocation95_spill]]  ;;  %s7196_s23 = smov [#allocation44]  }
  0xf6   :  { %453 = dma.hbm_to_vmem [thread:$0]  %s7524_s2, 1664, %s448_s15, [#allocation42], %s7186_s16, %s7186_s16, %s7187_s3  }
  0xf7   :  { %s473_s20 = sshll.u32 %s7196_s23, 4  ;;  %s6595_s12 = sshra.s32 %s7534_s25, 4  ;;  %s474_s20 = int_to_ptr.vmem [resolvable:$true] %s473_s20  ;;  %s6596_s12 = int_to_ptr.hbm [resolvable:$true] %s6595_s12 }
  0xf8   :  { %s6597_s17 = scalar_lea.hbm %s6596_s12, 104  ;;  %s6599_s30 = scalar_lea.hbm %s7400_s14, 104 }
  0xf9   :  { %p6598_p9 = scmp.ne.s32.totalorder %s6596_s12, %s6597_s17  ;;  %p6600_p10 = scmp.lt.s32.totalorder %s6596_s12, %s7400_s14 }
  0xfa   :  { %p6601_p11 = scmp.lt.s32.totalorder %s6599_s30, %s6597_s17 }
  0xfb   :  { %s497_s0 = sshll.u32 %s8210_s22, 4  ;;  %s7544_s0 = int_to_ptr.hbm [resolvable:$true] %s497_s0 }
  0xfc   :  { %p6602_p12 = por %p6601_p11, %p6600_p10 }
  0xfe   :  { %p6603_p13 = pnand %p6602_p12, %p6598_p9 }
 0x100   :  { %6606 = shalt.err (!%p6603_p13)
}
 0x101   :  { %479 = dma.hbm_to_vmem [thread:$0]  %s7534_s25, 1664, %s474_s20, [#allocation45], %s7186_s16, %s7186_s16, %s7187_s3  }
 0x102   :  { %s523_s26 = sshll.u32 %s7420_s5, 4  ;;  %s7197_s24 = smov [#allocation47]   ;;  %s7554_s26 = int_to_ptr.hbm [resolvable:$true] %s523_s26 }
 0x103   :  { %s499_s18 = sshll.u32 %s7197_s24, 4  ;;  %s6619_s14 = sshra.s32 %s7544_s0, 4  ;;  %s500_s18 = int_to_ptr.vmem [resolvable:$true] %s499_s18  ;;  %s6620_s14 = int_to_ptr.hbm [resolvable:$true] %s6619_s14 }
 0x104   :  { %s6621_s2 = scalar_lea.hbm %s6620_s14, 28  ;;  %s6623_s19 = scalar_lea.hbm %s8210_s22, 28 }
 0x105   :  { %p6622_p0 = scmp.ne.s32.totalorder %s6620_s14, %s6621_s2  ;;  %p6624_p1 = scmp.lt.s32.totalorder %s6620_s14, %s8210_s22 }
 0x106   :  { %p6625_p2 = scmp.lt.s32.totalorder %s6623_s19, %s6621_s2 }
 0x108   :  { %p6626_p3 = por %p6625_p2, %p6624_p1 }
 0x10a   :  { %p6627_p4 = pnand %p6626_p3, %p6622_p0 }
 0x10c   :  { %6630 = shalt.err (!%p6627_p4)
}
 0x10d   :  { %s8211_s4 = sld [smem:[#allocation72_spill]]  ;;  %s7198_s7 = smov [#allocation50]  }
 0x10e   :  { %505 = dma.hbm_to_vmem [thread:$0]  %s7544_s0, 448, %s500_s18, [#allocation48], %s7186_s16, %s7186_s16, %s7187_s3  }
 0x10f   :  { %s525_s25 = sshll.u32 %s7198_s7, 4  ;;  %s6643_s15 = sshra.s32 %s7554_s26, 4  ;;  %s526_s25 = int_to_ptr.vmem [resolvable:$true] %s525_s25  ;;  %s6644_s15 = int_to_ptr.hbm [resolvable:$true] %s6643_s15 }
 0x110   :  { %s6645_s8 = scalar_lea.hbm %s6644_s15, 28  ;;  %s6647_s27 = scalar_lea.hbm %s7420_s5, 28 }
 0x111   :  { %p6646_p5 = scmp.ne.s32.totalorder %s6644_s15, %s6645_s8  ;;  %p6648_p6 = scmp.lt.s32.totalorder %s6644_s15, %s7420_s5 }
 0x112   :  { %p6649_p7 = scmp.lt.s32.totalorder %s6647_s27, %s6645_s8 }
 0x113   :  { %s113_s6 = sshll.u32 %s8211_s4, 4  ;;  %s114_s6 = int_to_ptr.hbm [resolvable:$true] %s113_s6 }
 0x114   :  { %p6650_p8 = por %p6649_p7, %p6648_p6 }
 0x116   :  { %p6651_p9 = pnand %p6650_p8, %p6646_p5 }
 0x118   :  { %6654 = shalt.err (!%p6651_p9)
}
 0x119   :  { %s8212_s10 = sld [smem:[#allocation73_spill]]  ;;  %s7199_s23 = smov [#allocation2]  }
 0x11a   :  { %531 = dma.hbm_to_vmem [thread:$0]  %s7554_s26, 448, %s526_s25, [#allocation51], %s7186_s16, %s7186_s16, %s7187_s3  }
 0x11b   :  { %s115_s20 = sshll.u32 %s7199_s23, 4  ;;  %s6667_s0 = sshra.s32 %s114_s6, 4  ;;  %s116_s20 = int_to_ptr.vmem [resolvable:$true] %s115_s20  ;;  %s6668_s0 = int_to_ptr.hbm [resolvable:$true] %s6667_s0 }
 0x11c   :  { %s6669_s5 = scalar_lea.hbm %s6668_s0, 2  ;;  %s6671_s12 = scalar_lea.hbm %s8211_s4, 2 }
 0x11d   :  { %p6670_p10 = scmp.ne.s32.totalorder %s6668_s0, %s6669_s5  ;;  %p6672_p11 = scmp.lt.s32.totalorder %s6668_s0, %s8211_s4 }
 0x11e   :  { %p6673_p12 = scmp.lt.s32.totalorder %s6671_s12, %s6669_s5 }
 0x11f   :  { %s136_s22 = sshll.u32 %s8212_s10, 4  ;;  %s7572_s22 = int_to_ptr.hbm [resolvable:$true] %s136_s22 }
 0x120   :  { %p6674_p13 = por %p6673_p12, %p6672_p11 }
 0x122   :  { %p6675_p0 = pnand %p6674_p13, %p6670_p10 }
 0x124   :  { %6678 = shalt.err (!%p6675_p0)
}
 0x125   :  { %118 = dma.hbm_to_vmem [thread:$0]  %s114_s6, 32, %s116_s20, [#allocation3]  }
 0x126   :  { %s8213_s17 = sld [smem:[#allocation74_spill]]  ;;  %s7200_s30 = smov [#allocation7]  }
 0x127   :  { %s138_s26 = sshll.u32 %s7200_s30, 4  ;;  %s6691_s18 = sshra.s32 %s7572_s22, 4  ;;  %s139_s26 = int_to_ptr.vmem [resolvable:$true] %s138_s26  ;;  %s6692_s18 = int_to_ptr.hbm [resolvable:$true] %s6691_s18 }
 0x128   :  { %s6693_s14 = scalar_lea.hbm %s6692_s18, 16  ;;  %s6695_s2 = scalar_lea.hbm %s8212_s10, 16 }
 0x129   :  { %p6694_p1 = scmp.ne.s32.totalorder %s6692_s18, %s6693_s14  ;;  %p6696_p2 = scmp.lt.s32.totalorder %s6692_s18, %s8212_s10 }
 0x12a   :  { %p6697_p3 = scmp.lt.s32.totalorder %s6695_s2, %s6693_s14 }
 0x12c   :  { %s163_s24 = sshll.u32 %s8213_s17, 4  ;;  %p6698_p4 = por %p6697_p3, %p6696_p2  ;;  %s164_s24 = int_to_ptr.hbm [resolvable:$true] %s163_s24 }
 0x12e   :  { %p6699_p5 = pnand %p6698_p4, %p6694_p1 }
 0x130   :  { %6702 = shalt.err (!%p6699_p5)
}
 0x131   :  { %s8214_s19 = sld [smem:[#allocation75_spill]]  ;;  %s7201_s7 = smov [#allocation10]  }
 0x132   :  { %144 = dma.hbm_to_vmem [thread:$0]  %s7572_s22, 256, %s139_s26, [#allocation6], %s7178_s28, %s7178_s28, %s7179_s1  }
 0x133   :  { %s165_s25 = sshll.u32 %s7201_s7, 4  ;;  %s6715_s6 = sshra.s32 %s164_s24, 4  ;;  %s166_s25 = int_to_ptr.vmem [resolvable:$true] %s165_s25  ;;  %s6716_s6 = int_to_ptr.hbm [resolvable:$true] %s6715_s6 }
 0x134   :  { %s6717_s15 = scalar_lea.hbm %s6716_s6, 4  ;;  %s6719_s8 = scalar_lea.hbm %s8213_s17, 4 }
 0x135   :  { %p6718_p6 = scmp.ne.s32.totalorder %s6716_s6, %s6717_s15  ;;  %p6720_p7 = scmp.lt.s32.totalorder %s6716_s6, %s8213_s17 }
 0x136   :  { %p6721_p8 = scmp.lt.s32.totalorder %s6719_s8, %s6717_s15 }
 0x137   :  { %s185_s4 = sshll.u32 %s8214_s19, 4  ;;  %s186_s4 = int_to_ptr.hbm [resolvable:$true] %s185_s4 }
 0x138   :  { %p6722_p9 = por %p6721_p8, %p6720_p7 }
 0x13a   :  { %p6723_p10 = pnand %p6722_p9, %p6718_p6 }
 0x13c   :  { %6726 = shalt.err (!%p6723_p10)
}
 0x13d   :  { %168 = dma.hbm_to_vmem [thread:$0]  %s164_s24, 64, %s166_s25, [#allocation9]  }
 0x13e   :  { %s8215_s27 = sld [smem:[#allocation76_spill]]  ;;  %s7202_s10 = smov [#allocation13]  }
 0x13f   :  { %s187_s22 = sshll.u32 %s7202_s10, 4  ;;  %s6739_s20 = sshra.s32 %s186_s4, 4  ;;  %s188_s22 = int_to_ptr.vmem [resolvable:$true] %s187_s22  ;;  %s6740_s20 = int_to_ptr.hbm [resolvable:$true] %s6739_s20 }
 0x140   :  { %s6741_s0 = scalar_lea.hbm %s6740_s20, 4  ;;  %s6743_s5 = scalar_lea.hbm %s8214_s19, 4 }
 0x141   :  { %p6742_p11 = scmp.ne.s32.totalorder %s6740_s20, %s6741_s0  ;;  %p6744_p12 = scmp.lt.s32.totalorder %s6740_s20, %s8214_s19 }
 0x142   :  { %p6745_p13 = scmp.lt.s32.totalorder %s6743_s5, %s6741_s0 }
 0x144   :  { %s208_s23 = sshll.u32 %s8215_s27, 4  ;;  %p6746_p0 = por %p6745_p13, %p6744_p12  ;;  %s7588_s23 = int_to_ptr.hbm [resolvable:$true] %s208_s23 }
 0x146   :  { %p6747_p1 = pnand %p6746_p0, %p6742_p11 }
 0x148   :  { %6750 = shalt.err (!%p6747_p1)
}
 0x149   :  { %190 = dma.hbm_to_vmem [thread:$0]  %s186_s4, 64, %s188_s22, [#allocation12]  }
 0x14a   :  { %s8216_s12 = sld [smem:[#allocation79_spill]]  ;;  %s7203_s30 = smov [#allocation16]  }
 0x14b   :  { %s210_s26 = sshll.u32 %s7203_s30, 4  ;;  %s6763_s24 = sshra.s32 %s7588_s23, 4  ;;  %s211_s26 = int_to_ptr.vmem [resolvable:$true] %s210_s26  ;;  %s6764_s24 = int_to_ptr.hbm [resolvable:$true] %s6763_s24 }
 0x14c   :  { %s6765_s18 = scalar_lea.hbm %s6764_s24, 128  ;;  %s6767_s14 = scalar_lea.hbm %s8215_s27, 128 }
 0x14d   :  { %p6766_p2 = scmp.ne.s32.totalorder %s6764_s24, %s6765_s18  ;;  %p6768_p3 = scmp.lt.s32.totalorder %s6764_s24, %s8215_s27 }
 0x14e   :  { %p6769_p4 = scmp.lt.s32.totalorder %s6767_s14, %s6765_s18 }
 0x150   :  { %s238_s17 = sshll.u32 %s8216_s12, 4  ;;  %p6770_p5 = por %p6769_p4, %p6768_p3  ;;  %s7593_s17 = int_to_ptr.hbm [resolvable:$true] %s238_s17 }
 0x152   :  { %p6771_p6 = pnand %p6770_p5, %p6766_p2 }
 0x154   :  { %6774 = shalt.err (!%p6771_p6)
}
 0x155   :  { %s8217_s2 = sld [smem:[#allocation80_spill]]  ;;  %s7204_s19 = smov [#allocation19]  }
 0x156   :  { %216 = dma.hbm_to_vmem [thread:$0]  %s7588_s23, 2048, %s211_s26, [#allocation15], %s7190_s9, %s7190_s9, %s7191_s11  }
 0x157   :  { %s240_s4 = sshll.u32 %s7204_s19, 4  ;;  %s6787_s25 = sshra.s32 %s7593_s17, 4  ;;  %s241_s4 = int_to_ptr.vmem [resolvable:$true] %s240_s4  ;;  %s6788_s25 = int_to_ptr.hbm [resolvable:$true] %s6787_s25 }
 0x158   :  { %s6789_s6 = scalar_lea.hbm %s6788_s25, 192  ;;  %s6791_s15 = scalar_lea.hbm %s8216_s12, 192 }
 0x159   :  { %p6790_p7 = scmp.ne.s32.totalorder %s6788_s25, %s6789_s6  ;;  %p6792_p8 = scmp.lt.s32.totalorder %s6788_s25, %s8216_s12 }
 0x15a   :  { %p6793_p9 = scmp.lt.s32.totalorder %s6791_s15, %s6789_s6 }
 0x15b   :  { %s264_s7 = sshll.u32 %s8217_s2, 4  ;;  %s7603_s7 = int_to_ptr.hbm [resolvable:$true] %s264_s7 }
 0x15c   :  { %p6794_p10 = por %p6793_p9, %p6792_p8 }
 0x15e   :  { %p6795_p11 = pnand %p6794_p10, %p6790_p7 }
 0x160   :  { %6798 = shalt.err (!%p6795_p11)
}
 0x161   :  { %s8218_s9 = sld [smem:[#allocation81_spill]]  ;;  %s7205_s8 = smov [#allocation22]  }
 0x162   :  { %246 = dma.hbm_to_vmem [thread:$0]  %s7593_s17, 3072, %s241_s4, [#allocation18], %s7178_s28, %s7178_s28, %s7179_s1  }
 0x163   :  { %s266_s27 = sshll.u32 %s7205_s8, 4  ;;  %s6811_s10 = sshra.s32 %s7603_s7, 4  ;;  %s267_s27 = int_to_ptr.vmem [resolvable:$true] %s266_s27  ;;  %s6812_s10 = int_to_ptr.hbm [resolvable:$true] %s6811_s10 }
 0x164   :  { %s6813_s22 = scalar_lea.hbm %s6812_s10, 192  ;;  %s6815_s23 = scalar_lea.hbm %s8217_s2, 192 }
 0x165   :  { %p6814_p12 = scmp.ne.s32.totalorder %s6812_s10, %s6813_s22  ;;  %p6816_p13 = scmp.lt.s32.totalorder %s6812_s10, %s8217_s2 }
 0x166   :  { %p6817_p0 = scmp.lt.s32.totalorder %s6815_s23, %s6813_s22 }
 0x167   :  { %s290_s11 = sshll.u32 %s8218_s9, 4  ;;  %s7613_s11 = int_to_ptr.hbm [resolvable:$true] %s290_s11 }
 0x168   :  { %p6818_p1 = por %p6817_p0, %p6816_p13 }
 0x16a   :  { %p6819_p2 = pnand %p6818_p1, %p6814_p12 }
 0x16c   :  { %6822 = shalt.err (!%p6819_p2)
}
 0x16d   :  { %s8219_s20 = sld [smem:[#allocation83_spill]]  ;;  %s7206_s0 = smov [#allocation25]  }
 0x16e   :  { %272 = dma.hbm_to_vmem [thread:$0]  %s7603_s7, 3072, %s267_s27, [#allocation21], %s7178_s28, %s7178_s28, %s7179_s1  }
 0x16f   :  { %s292_s5 = sshll.u32 %s7206_s0, 4  ;;  %s6835_s17 = sshra.s32 %s7613_s11, 4  ;;  %s293_s5 = int_to_ptr.vmem [resolvable:$true] %s292_s5  ;;  %s6836_s17 = int_to_ptr.hbm [resolvable:$true] %s6835_s17 }
 0x170   :  { %s6837_s30 = scalar_lea.hbm %s6836_s17, 8  ;;  %s6839_s26 = scalar_lea.hbm %s8218_s9, 8 }
 0x171   :  { %p6838_p3 = scmp.ne.s32.totalorder %s6836_s17, %s6837_s30  ;;  %p6840_p4 = scmp.lt.s32.totalorder %s6836_s17, %s8218_s9 }
 0x172   :  { %p6841_p5 = scmp.lt.s32.totalorder %s6839_s26, %s6837_s30 }
 0x173   :  { %s318_s12 = sshll.u32 %s8219_s20, 4  ;;  %s7623_s12 = int_to_ptr.hbm [resolvable:$true] %s318_s12 }
 0x174   :  { %p6842_p6 = por %p6841_p5, %p6840_p4 }
 0x176   :  { %p6843_p7 = pnand %p6842_p6, %p6838_p3 }
 0x178   :  { %6846 = shalt.err (!%p6843_p7)
}
 0x179   :  { %s8220_s24 = sld [smem:[#allocation86_spill]]  ;;  %s7207_s14 = smov [#allocation28]  }
 0x17a   :  { %298 = dma.hbm_to_vmem [thread:$0]  %s7613_s11, 128, %s293_s5, [#allocation24], %s7186_s16, %s7186_s16, %s7187_s3  }
 0x17b   :  { %s320_s2 = sshll.u32 %s7207_s14, 4  ;;  %s6859_s19 = sshra.s32 %s7623_s12, 4  ;;  %s321_s2 = int_to_ptr.vmem [resolvable:$true] %s320_s2  ;;  %s6860_s19 = int_to_ptr.hbm [resolvable:$true] %s6859_s19 }
 0x17c   :  { %s6861_s4 = scalar_lea.hbm %s6860_s19, 192  ;;  %s6863_s7 = scalar_lea.hbm %s8219_s20, 192 }
 0x17d   :  { %p6862_p8 = scmp.ne.s32.totalorder %s6860_s19, %s6861_s4  ;;  %p6864_p9 = scmp.lt.s32.totalorder %s6860_s19, %s8219_s20 }
 0x17e   :  { %p6865_p10 = scmp.lt.s32.totalorder %s6863_s7, %s6861_s4 }
 0x17f   :  { %s348_s18 = sshll.u32 %s8220_s24, 4  ;;  %s7633_s18 = int_to_ptr.hbm [resolvable:$true] %s348_s18 }
 0x180   :  { %p6866_p11 = por %p6865_p10, %p6864_p9 }
 0x182   :  { %p6867_p12 = pnand %p6866_p11, %p6862_p8 }
 0x184   :  { %6870 = shalt.err (!%p6867_p12)
}
 0x185   :  { %s8221_s25 = sld [smem:[#allocation87_spill]]  ;;  %s7208_s6 = smov [#allocation31]  }
 0x186   :  { %326 = dma.hbm_to_vmem [thread:$0]  %s7623_s12, 3072, %s321_s2, [#allocation27], %s7178_s28, %s7178_s28, %s7179_s1  }
 0x187   :  { %s350_s15 = sshll.u32 %s7208_s6, 4  ;;  %s6883_s11 = sshra.s32 %s7633_s18, 4  ;;  %s351_s15 = int_to_ptr.vmem [resolvable:$true] %s350_s15  ;;  %s6884_s11 = int_to_ptr.hbm [resolvable:$true] %s6883_s11 }
 0x188   :  { %s6885_s8 = scalar_lea.hbm %s6884_s11, 192  ;;  %s6887_s27 = scalar_lea.hbm %s8220_s24, 192 }
 0x189   :  { %p6886_p13 = scmp.ne.s32.totalorder %s6884_s11, %s6885_s8  ;;  %p6888_p0 = scmp.lt.s32.totalorder %s6884_s11, %s8220_s24 }
 0x18a   :  { %p6889_p1 = scmp.lt.s32.totalorder %s6887_s27, %s6885_s8 }
 0x18b   :  { %s374_s9 = sshll.u32 %s8221_s25, 4  ;;  %s7643_s9 = int_to_ptr.hbm [resolvable:$true] %s374_s9 }
 0x18c   :  { %p6890_p2 = por %p6889_p1, %p6888_p0 }
 0x18e   :  { %p6891_p3 = pnand %p6890_p2, %p6886_p13 }
 0x190   :  { %6894 = shalt.err (!%p6891_p3)
}
 0x191   :  { %s8222_s10 = sld [smem:[#allocation88_spill]]  ;;  %s7209_s23 = smov [#allocation34]  }
 0x192   :  { %356 = dma.hbm_to_vmem [thread:$0]  %s7633_s18, 3072, %s351_s15, [#allocation30], %s7178_s28, %s7178_s28, %s7179_s1  }
 0x193   :  { %s376_s20 = sshll.u32 %s7209_s23, 4  ;;  %s6907_s0 = sshra.s32 %s7643_s9, 4  ;;  %s377_s20 = int_to_ptr.vmem [resolvable:$true] %s376_s20  ;;  %s6908_s0 = int_to_ptr.hbm [resolvable:$true] %s6907_s0 }
 0x194   :  { %s6909_s5 = scalar_lea.hbm %s6908_s0, 192  ;;  %s6911_s12 = scalar_lea.hbm %s8221_s25, 192 }
 0x195   :  { %p6910_p4 = scmp.ne.s32.totalorder %s6908_s0, %s6909_s5  ;;  %p6912_p5 = scmp.lt.s32.totalorder %s6908_s0, %s8221_s25 }
 0x196   :  { %p6913_p6 = scmp.lt.s32.totalorder %s6911_s12, %s6909_s5 }
 0x197   :  { %s400_s22 = sshll.u32 %s8222_s10, 4  ;;  %s7653_s22 = int_to_ptr.hbm [resolvable:$true] %s400_s22 }
 0x198   :  { %p6914_p7 = por %p6913_p6, %p6912_p5 }
 0x19a   :  { %p6915_p8 = pnand %p6914_p7, %p6910_p4 }
 0x19c   :  { %6918 = shalt.err (!%p6915_p8)
}
 0x19d   :  { %s8223_s17 = sld [smem:[#allocation89_spill]]  ;;  %s7210_s30 = smov [#allocation37]  }
 0x19e   :  { %382 = dma.hbm_to_vmem [thread:$0]  %s7643_s9, 3072, %s377_s20, [#allocation33], %s7178_s28, %s7178_s28, %s7179_s1  }
 0x19f   :  { %s402_s26 = sshll.u32 %s7210_s30, 4  ;;  %s6931_s18 = sshra.s32 %s7653_s22, 4  ;;  %s403_s26 = int_to_ptr.vmem [resolvable:$true] %s402_s26  ;;  %s6932_s18 = int_to_ptr.hbm [resolvable:$true] %s6931_s18 }
 0x1a0   :  { %s6933_s14 = scalar_lea.hbm %s6932_s18, 16  ;;  %s6935_s2 = scalar_lea.hbm %s8222_s10, 16 }
 0x1a1   :  { %p6934_p9 = scmp.ne.s32.totalorder %s6932_s18, %s6933_s14  ;;  %p6936_p10 = scmp.lt.s32.totalorder %s6932_s18, %s8222_s10 }
 0x1a2   :  { %p6937_p11 = scmp.lt.s32.totalorder %s6935_s2, %s6933_s14 }
 0x1a3   :  { %s426_s24 = sshll.u32 %s8223_s17, 4  ;;  %s7663_s24 = int_to_ptr.hbm [resolvable:$true] %s426_s24 }
 0x1a4   :  { %p6938_p12 = por %p6937_p11, %p6936_p10 }
 0x1a6   :  { %p6939_p13 = pnand %p6938_p12, %p6934_p9 }
 0x1a8   :  { %6942 = shalt.err (!%p6939_p13)
}
 0x1a9   :  { %s8224_s19 = sld [smem:[#allocation93_spill]]  ;;  %s7211_s7 = smov [#allocation40]  }
 0x1aa   :  { %408 = dma.hbm_to_vmem [thread:$0]  %s7653_s22, 256, %s403_s26, [#allocation36], %s7186_s16, %s7186_s16, %s7187_s3  }
 0x1ab   :  { %s428_s25 = sshll.u32 %s7211_s7, 4  ;;  %s6955_s6 = sshra.s32 %s7663_s24, 4  ;;  %s429_s25 = int_to_ptr.vmem [resolvable:$true] %s428_s25  ;;  %s6956_s6 = int_to_ptr.hbm [resolvable:$true] %s6955_s6 }
 0x1ac   :  { %s6957_s15 = scalar_lea.hbm %s6956_s6, 208  ;;  %s6959_s9 = scalar_lea.hbm %s8223_s17, 208 }
 0x1ad   :  { %p6958_p0 = scmp.ne.s32.totalorder %s6956_s6, %s6957_s15  ;;  %p6960_p1 = scmp.lt.s32.totalorder %s6956_s6, %s8223_s17 }
 0x1ae   :  { %p6961_p2 = scmp.lt.s32.totalorder %s6959_s9, %s6957_s15 }
 0x1af   :  { %s458_s4 = sshll.u32 %s8224_s19, 4  ;;  %s7673_s4 = int_to_ptr.hbm [resolvable:$true] %s458_s4 }
 0x1b0   :  { %p6962_p3 = por %p6961_p2, %p6960_p1 }
 0x1b2   :  { %p6963_p4 = pnand %p6962_p3, %p6958_p0 }
 0x1b4   :  { %6966 = shalt.err (!%p6963_p4)
}
 0x1b5   :  { %s8225_s11 = sld [smem:[#allocation94_spill]]  ;;  %s7212_s8 = smov [#allocation43]  }
 0x1b6   :  { %434 = dma.hbm_to_vmem [thread:$0]  %s7663_s24, 3328, %s429_s25, [#allocation39], %s7178_s28, %s7178_s28, %s7179_s1  }
 0x1b7   :  { %s460_s27 = sshll.u32 %s7212_s8, 4  ;;  %s6979_s22 = sshra.s32 %s7673_s4, 4  ;;  %s461_s27 = int_to_ptr.vmem [resolvable:$true] %s460_s27  ;;  %s6980_s22 = int_to_ptr.hbm [resolvable:$true] %s6979_s22 }
 0x1b8   :  { %s6981_s23 = scalar_lea.hbm %s6980_s22, 104  ;;  %s6983_s20 = scalar_lea.hbm %s8224_s19, 104 }
 0x1b9   :  { %p6982_p5 = scmp.ne.s32.totalorder %s6980_s22, %s6981_s23  ;;  %p6984_p6 = scmp.lt.s32.totalorder %s6980_s22, %s8224_s19 }
 0x1ba   :  { %p6985_p7 = scmp.lt.s32.totalorder %s6983_s20, %s6981_s23 }
 0x1bb   :  { %s484_s10 = sshll.u32 %s8225_s11, 4  ;;  %s7683_s10 = int_to_ptr.hbm [resolvable:$true] %s484_s10 }
 0x1bc   :  { %p6986_p8 = por %p6985_p7, %p6984_p6 }
 0x1be   :  { %p6987_p9 = pnand %p6986_p8, %p6982_p5 }
 0x1c0   :  { %6990 = shalt.err (!%p6987_p9)
}
 0x1c1   :  { %s8226_s0 = sld [smem:[#allocation96_spill]]  ;;  %s7213_s12 = smov [#allocation46]  }
 0x1c2   :  { %466 = dma.hbm_to_vmem [thread:$0]  %s7673_s4, 1664, %s461_s27, [#allocation42], %s7186_s16, %s7186_s16, %s7187_s3  }
 0x1c3   :  { %s486_s17 = sshll.u32 %s7213_s12, 4  ;;  %s7003_s30 = sshra.s32 %s7683_s10, 4  ;;  %s487_s17 = int_to_ptr.vmem [resolvable:$true] %s486_s17  ;;  %s7004_s30 = int_to_ptr.hbm [resolvable:$true] %s7003_s30 }
 0x1c4   :  { %s7005_s26 = scalar_lea.hbm %s7004_s30, 104  ;;  %s7007_s24 = scalar_lea.hbm %s8225_s11, 104 }
 0x1c5   :  { %p7006_p10 = scmp.ne.s32.totalorder %s7004_s30, %s7005_s26  ;;  %p7008_p11 = scmp.lt.s32.totalorder %s7004_s30, %s8225_s11 }
 0x1c6   :  { %p7009_p12 = scmp.lt.s32.totalorder %s7007_s24, %s7005_s26 }
 0x1c7   :  { %s510_s5 = sshll.u32 %s8226_s0, 4  ;;  %s7693_s5 = int_to_ptr.hbm [resolvable:$true] %s510_s5 }
 0x1c8   :  { %p7010_p13 = por %p7009_p12, %p7008_p11 }
 0x1ca   :  { %p7011_p0 = pnand %p7010_p13, %p7006_p10 }
 0x1cc   :  { %7014 = shalt.err (!%p7011_p0)
}
 0x1cd   :  { %492 = dma.hbm_to_vmem [thread:$0]  %s7683_s10, 1664, %s487_s17, [#allocation45], %s7186_s16, %s7186_s16, %s7187_s3  }
 0x1ce   :  { %s7214_s18 = smov [#allocation49]   ;;  %s536_s2 = sshll.u32 %s7425_s21, 4  ;;  %s537_s2 = int_to_ptr.hbm [resolvable:$true] %s536_s2 }
 0x1cf   :  { %s512_s14 = sshll.u32 %s7214_s18, 4  ;;  %s7027_s19 = sshra.s32 %s7693_s5, 4  ;;  %s513_s14 = int_to_ptr.vmem [resolvable:$true] %s512_s14  ;;  %s7028_s19 = int_to_ptr.hbm [resolvable:$true] %s7027_s19 }
 0x1d0   :  { %s7029_s4 = scalar_lea.hbm %s7028_s19, 28  ;;  %s7031_s7 = scalar_lea.hbm %s8226_s0, 28 }
 0x1d1   :  { %p7030_p1 = scmp.ne.s32.totalorder %s7028_s19, %s7029_s4  ;;  %p7032_p2 = scmp.lt.s32.totalorder %s7028_s19, %s8226_s0 }
 0x1d2   :  { %p7033_p3 = scmp.lt.s32.totalorder %s7031_s7, %s7029_s4 }
 0x1d4   :  { %p7034_p4 = por %p7033_p3, %p7032_p2 }
 0x1d6   :  { %p7035_p5 = pnand %p7034_p4, %p7030_p1 }
 0x1d8   :  { %7038 = shalt.err (!%p7035_p5)
}
 0x1d9   :  { %518 = dma.hbm_to_vmem [thread:$0]  %s7693_s5, 448, %s513_s14, [#allocation48], %s7186_s16, %s7186_s16, %s7187_s3  }
 0x1da   :  { %s7215_s25 = smov [#allocation52]   ;;  %s7051_s15 = sshra.s32 %s537_s2, 4  ;;  %s7052_s15 = int_to_ptr.hbm [resolvable:$true] %s7051_s15 }
 0x1db   :  { %s538_s6 = sshll.u32 %s7215_s25, 4  ;;  %s7053_s9 = scalar_lea.hbm %s7052_s15, 28  ;;  %s539_s6 = int_to_ptr.vmem [resolvable:$true] %s538_s6 }
 0x1dc   :  { %p7054_p6 = scmp.ne.s32.totalorder %s7052_s15, %s7053_s9  ;;  %s7055_s11 = scalar_lea.hbm %s7425_s21, 28 }
 0x1dd   :  { %p7056_p7 = scmp.lt.s32.totalorder %s7052_s15, %s7425_s21  ;;  %p7057_p8 = scmp.lt.s32.totalorder %s7055_s11, %s7053_s9 }
 0x1df   :  { %p7058_p9 = por %p7057_p8, %p7056_p7 }
 0x1e1   :  { %p7059_p10 = pnand %p7058_p9, %p7054_p6 }
 0x1e3   :  { %7062 = shalt.err (!%p7059_p10)
}
 0x1e4   :  { %544 = dma.hbm_to_vmem [thread:$0]  %s537_s2, 448, %s539_s6, [#allocation51], %s7186_s16, %s7186_s16, %s7187_s3  }
 0x1e5   :  { %7099 = dma.done.wait [#allocation3], 32  }
 0x1e6   :  { %7100 = vsyncadd [#allocation3], 4294967264 }
 0x1e7   :  { %7101 = dma.done.wait [#allocation6], 512  }
 0x1e8   :  { %7102 = vsyncadd [#allocation6], 4294966784 }
 0x1e9   :  { %7103 = dma.done.wait [#allocation9], 320  }
 0x1ea   :  { %7104 = vsyncadd [#allocation9], 4294966976 }
 0x1eb   :  { %7105 = dma.done.wait [#allocation12], 128  }
 0x1ec   :  { %7106 = vsyncadd [#allocation12], 4294967168 }
 0x1ed   :  { %7107 = dma.done.wait [#allocation15], 5120  }
 0x1ee   :  { %7108 = vsyncadd [#allocation15], 4294962176 }
 0x1ef   :  { %7109 = dma.done.wait [#allocation18], 6144  }
 0x1f0   :  { %7110 = vsyncadd [#allocation18], 4294961152 }
 0x1f1   :  { %7111 = dma.done.wait [#allocation21], 6144  }
 0x1f2   :  { %7112 = vsyncadd [#allocation21], 4294961152 }
 0x1f3   :  { %7113 = dma.done.wait [#allocation24], 256  }
 0x1f4   :  { %7114 = vsyncadd [#allocation24], 4294967040 }
 0x1f5   :  { %7115 = dma.done.wait [#allocation27], 3200  }
 0x1f6   :  { %7116 = vsyncadd [#allocation27], 4294964096 }
 0x1f7   :  { %7117 = dma.done.wait [#allocation30], 4096  }
 0x1f8   :  { %7118 = vsyncadd [#allocation30], 4294963200 }
 0x1f9   :  { %7119 = dma.done.wait [#allocation33], 6144  }
 0x1fa   :  { %7120 = vsyncadd [#allocation33], 4294961152 }
 0x1fb   :  { %7121 = dma.done.wait [#allocation36], 512  }
 0x1fc   :  { %7122 = vsyncadd [#allocation36], 4294966784 }
 0x1fd   :  { %7123 = dma.done.wait [#allocation39], 3584  }
 0x1fe   :  { %7124 = vsyncadd [#allocation39], 4294963712 }
 0x1ff   :  { %7125 = dma.done.wait [#allocation42], 3328  }
 0x200   :  { %7126 = vsyncadd [#allocation42], 4294963968 }
 0x201   :  { %7127 = dma.done.wait [#allocation45], 3328  }
 0x202   :  { %7128 = vsyncadd [#allocation45], 4294963968 }
 0x203   :  { %7129 = dma.done.wait [#allocation48], 896  }
 0x204   :  { %7130 = vsyncadd [#allocation48], 4294966400 }
 0x205   :  { %7131 = dma.done.wait [#allocation51], 896  }
 0x206   :  { %7132 = vsyncadd [#allocation51], 4294966400  ;;  %v680_v0 = vld [vmem:[#allocation2] sm:$0x3]  ;;  %vm689_vm0 = vcmask 1040384   ;;  %vm685_vm1 = vcmask 15360  }
 0x207   :  { %v681_v1 = vpack.c.bf16 %v680_v0, %v680_v0  ;;  %v709_v3 = vld [vmem:[#allocation11] sm:$0x7]  ;;  %v684_v4 = vld [vmem:[#allocation10] sm:$0x7]  ;;  %v5935_v6 = vld [vmem:[#allocation7 + $0x4] sm:$0xf0] }
 0x208   :  { %v4829_v5 = vld [vmem:[#allocation7] sm:$0xf]  ;;  %v5934_v7 = vld [vmem:[#allocation7 + $0x4] sm:$0xf]  ;;  %v4831_v9 = vld [vmem:[#allocation7 + $0x8] sm:$0xf0] }
 0x209   :  { %v691_v2 = vsel %vm689_vm0, %v681_v1, 0  ;;  %v4830_v8 = vor.u32 %v5935_v6, %v4829_v5  ;;  %v4834_v10 = vor.u32 %v5934_v7, %v4831_v9  ;;  %v4839_v11 = vld [vmem:[#allocation5] sm:$0xf]  ;;  %v5933_v12 = vld [vmem:[#allocation5 + $0x4] sm:$0xf0]  ;;  %vm737_vm2 = vcmask 130048  }
 0x20a   :  { %720 = vmatpush.bf16.msra.mxu1 %v691_v2  ;;  %700 = vmatpush.bf16.msra.mxu0 %v691_v2  ;;  %v5932_v13 = vld [vmem:[#allocation5 + $0x4] sm:$0xf]  ;;  %v4840_v14 = vor.u32 %v5933_v12, %v4839_v11  ;;  %v4841_v15 = vld [vmem:[#allocation5 + $0x8] sm:$0xf0]  ;;  %v808_v23 = vld [vmem:[#allocation13] sm:$0x7] }
 0x20b   :  { %748 = vmatpush.bf16.msra.mxu2 %v4830_v8  ;;  %761 = vmatpush.bf16.msra.mxu3 %v4834_v10  ;;  %v4844_v16 = vor.u32 %v5932_v13, %v4841_v15  ;;  %v4850_v24 = vld [vmem:[#allocation8] sm:$0xf]  ;;  %v5937_v25 = vld [vmem:[#allocation8 + $0x4] sm:$0xf0]  ;;  %v5936_v26 = vld [vmem:[#allocation8 + $0x4] sm:$0xf] }
 0x20c   :  { %v4851_v27 = vor.u32 %v5937_v25, %v4850_v24  ;;  %v4852_v28 = vld [vmem:[#allocation8 + $0x8] sm:$0xf0]  ;;  %v882_v30 = vld [vmem:[#allocation14 + $0x78] sm:$0xff]  ;;  %v880_v32 = vld [vmem:[#allocation14 + $0x68] sm:$0xff]  ;;  %vm917_vm3 = vcmask 521216   ;;  %vm909_vm4 = vcmask 1045504  }
 0x20d   :  { %4826 = vmatmul.msk.bf16.vlgmr.msra.gmra.mxu1 %vm685_vm1, %v709_v3  ;;  %4825 = vmatmul.msk.bf16.vlgmr.msra.gmra.mxu0 %vm685_vm1, %v684_v4  ;;  %v4855_v29 = vor.u32 %v5936_v26, %v4852_v28  ;;  %v881_v31 = vld [vmem:[#allocation14 + $0x70] sm:$0xff]  ;;  %v879_v35 = vld [vmem:[#allocation14 + $0x60] sm:$0xff]  ;;  %v878_v36 = vld [vmem:[#allocation14 + $0x58] sm:$0xff]  ;;  %vm941_vm5 = vcmask 523264   ;;  %s8227_s21 = sld [smem:[#allocation77_spill]]  ;;  %vm1180_vm9 = vcmask 1042432  }
 0x20e   :  { %787 = vmatpush.bf16.msrb.mxu0 %v4840_v14  ;;  %800 = vmatpush.bf16.msrb.mxu1 %v4844_v16  ;;  %v877_v46 = vld [vmem:[#allocation14 + $0x50] sm:$0xff]  ;;  %v890_v47 = vld [vmem:[#allocation14 + $0xb8] sm:$0xff]  ;;  %v876_v48 = vld [vmem:[#allocation14 + $0x48] sm:$0xff]  ;;  %s8228_s16 = sld [smem:[#allocation78_spill]]  ;;  %vm1176_vm10 = vcmask 48128   ;;  %vm2167_vm11 = vcmask 1043456  }
 0x20f   :  { %819 = vmatpush.bf16.msrb.mxu2 %v691_v2  ;;  %846 = vmatpush.bf16.msrb.mxu3 %v4851_v27  ;;  %v889_v49 = vld [vmem:[#allocation14 + $0xb0] sm:$0xff]  ;;  %v875_v50 = vld [vmem:[#allocation14 + $0x40] sm:$0xff]  ;;  %v888_v51 = vld [vmem:[#allocation14 + $0xa8] sm:$0xff]  ;;  %s8229_s3 = sld [smem:[#allocation82_spill]]  ;;  %vm2177_vm12 = vcmask 519168   ;;  %vm2312_vm0 = vcmask 261120  }
 0x210   :  { %v874_v52 = vld [vmem:[#allocation14 + $0x38] sm:$0xff]  ;;  %v887_v53 = vld [vmem:[#allocation14 + $0xa0] sm:$0xff]  ;;  %v873_v54 = vld [vmem:[#allocation14 + $0x30] sm:$0xff]  ;;  %s8230_s8 = sld [smem:[#allocation84_spill]]  ;;  %s4754_s0 = sshll.u32 %s7435_s29, 4  ;;  %s4755_s0 = int_to_ptr.hbm [resolvable:$true] %s4754_s0 }
 0x211   :  { %v886_v55 = vld [vmem:[#allocation14 + $0x98] sm:$0xff]  ;;  %v872_v56 = vld [vmem:[#allocation14 + $0x28] sm:$0xff]  ;;  %v885_v57 = vld [vmem:[#allocation14 + $0x90] sm:$0xff]  ;;  %s8231_s27 = sld [smem:[#allocation85_spill]]  ;;  %s7087_s5 = sshra.s32 %s4755_s0, 4  ;;  %s7088_s5 = int_to_ptr.hbm [resolvable:$true] %s7087_s5 }
 0x212   :  { %859 = vmatpush.bf16.msra.mxu0 %v4855_v29  ;;  %945 = vmatpush.msra.mxu1 %v882_v30  ;;  %v871_v58 = vld [vmem:[#allocation14 + $0x20] sm:$0xff]  ;;  %v884_v59 = vld [vmem:[#allocation14 + $0x88] sm:$0xff]  ;;  %v870_v60 = vld [vmem:[#allocation14 + $0x18] sm:$0xff]  ;;  %s8232_s10 = sld [smem:[#allocation90_spill]]  ;;  %s7089_s12 = scalar_lea.hbm %s7088_s5, 56 }
 0x213   :  { %v883_v61 = vld [vmem:[#allocation14 + $0x80] sm:$0xff]  ;;  %v869_v62 = vld [vmem:[#allocation14 + $0x10] sm:$0xff]  ;;  %v868_v63 = vld [vmem:[#allocation14 + $0x8] sm:$0xff]  ;;  %s8233_s22 = sld [smem:[#allocation91_spill]]  ;;  %p7090_p11 = scmp.ne.s32.totalorder %s7088_s5, %s7089_s12 }
 0x214   :  { %946 = vmatpush.msra.mxu1 %v881_v31  ;;  %v867_v0 = vld [vmem:[#allocation14] sm:$0xff]  ;;  %s8234_s23 = sld [smem:[#allocation92_spill]]  ;;  %s7091_s17 = scalar_lea.hbm %s7435_s29, 56 }
 0x215   :  { %p7092_p12 = scmp.lt.s32.totalorder %s7088_s5, %s7435_s29  ;;  %p7093_p13 = scmp.lt.s32.totalorder %s7091_s17, %s7089_s12 }
 0x216   :  { %947 = vmatpush.msra.mxu1 %v880_v32 }
 0x217   :  { %p7094_p0 = por %p7093_p13, %p7092_p12 }
 0x218   :  { %948 = vmatpush.msra.mxu1 %v879_v35 }
 0x219   :  { %p7095_p1 = pnand %p7094_p0, %p7090_p11 }
 0x21a   :  { %949 = vmatpush.msra.mxu1 %v878_v36 }
 0x21c   :  { %950 = vmatpush.msra.mxu1 %v877_v46 }
 0x21e   :  { %951 = vmatpush.msra.mxu1 %v876_v48 }
 0x220   :  { %952 = vmatpush.msra.mxu1 %v875_v50 }
 0x222   :  { %953 = vmatpush.msra.mxu1 %v874_v52 }
 0x224   :  { %954 = vmatpush.msra.mxu1 %v873_v54 }
 0x226   :  { %955 = vmatpush.msra.mxu1 %v872_v56 }
 0x228   :  { %956 = vmatpush.msra.mxu1 %v871_v58 }
 0x22a   :  { %957 = vmatpush.msra.mxu1 %v870_v60 }
 0x22c   :  { %958 = vmatpush.msra.mxu1 %v869_v62 }
 0x22e   :  { %959 = vmatpush.msra.mxu1 %v868_v63 }
 0x230   :  { %960 = vmatpush.msra.mxu1 %v867_v0 }
 0x28a   :  { %v722_v17 = vpop.f32.mrf.mxu1  ;;  %v702_v18 = vpop.f32.mrf.mxu0 }
 0x28b   :  { %v726_v19 = vpack.c.bf16 %v722_v17, %v722_v17  ;;  %v706_v20 = vpack.c.bf16 %v702_v18, %v702_v18 }
 0x28d   :  { %4835 = vmatmul.msk.bf16.vlgmr.msra.gmra.mxu2 %vm737_vm2, %v726_v19  ;;  %4836 = vmatmul.msk.bf16.vlgmr.msra.gmra.mxu3 %vm737_vm2, %v726_v19 }
 0x28e   :  { %4845 = vmatmul.msk.bf16.vlgmr.msrb.gmra.mxu0 %vm737_vm2, %v706_v20  ;;  %4846 = vmatmul.msk.bf16.vlgmr.msrb.gmra.mxu1 %vm737_vm2, %v706_v20 }
 0x28f   :  { %989 = vmatpush.msra.mxu3 %v882_v30  ;;  %973 = vmatpush.msra.mxu2 %v890_v47 }
 0x290   :  { %1017 = vmatpush.msrb.mxu0 %v890_v47  ;;  %v902_v47 = vld [vmem:[#allocation16 + $0x58] sm:$0xff] }
 0x291   :  { %990 = vmatpush.msra.mxu3 %v881_v31  ;;  %974 = vmatpush.msra.mxu2 %v889_v49 }
 0x292   :  { %v724_v21 = vpop.f32.mrf.mxu1  ;;  %v704_v22 = vpop.f32.mrf.mxu0  ;;  %1018 = vmatpush.msrb.mxu0 %v889_v49  ;;  %v900_v49 = vld [vmem:[#allocation16 + $0x48] sm:$0xff] }
 0x293   :  { %991 = vmatpush.msra.mxu3 %v880_v32  ;;  %975 = vmatpush.msra.mxu2 %v888_v51 }
 0x294   :  { %1019 = vmatpush.msrb.mxu0 %v888_v51  ;;  %v898_v51 = vld [vmem:[#allocation16 + $0x38] sm:$0xff] }
 0x295   :  { %992 = vmatpush.msra.mxu3 %v879_v35  ;;  %976 = vmatpush.msra.mxu2 %v887_v53 }
 0x296   :  { %1020 = vmatpush.msrb.mxu0 %v887_v53 }
 0x297   :  { %993 = vmatpush.msra.mxu3 %v878_v36  ;;  %977 = vmatpush.msra.mxu2 %v886_v55 }
 0x298   :  { %1021 = vmatpush.msrb.mxu0 %v886_v55  ;;  %v894_v55 = vld [vmem:[#allocation16 + $0x18] sm:$0xff] }
 0x299   :  { %994 = vmatpush.msra.mxu3 %v877_v46  ;;  %978 = vmatpush.msra.mxu2 %v885_v57  ;;  %v895_v46 = vld [vmem:[#allocation16 + $0x20] sm:$0xff] }
 0x29a   :  { %1022 = vmatpush.msrb.mxu0 %v885_v57  ;;  %v892_v57 = vld [vmem:[#allocation16 + $0x8] sm:$0xff] }
 0x29b   :  { %995 = vmatpush.msra.mxu3 %v876_v48  ;;  %979 = vmatpush.msra.mxu2 %v884_v59  ;;  %v893_v48 = vld [vmem:[#allocation16 + $0x10] sm:$0xff] }
 0x29c   :  { %1023 = vmatpush.msrb.mxu0 %v884_v59 }
 0x29d   :  { %4847 = vmatmul.msk.bf16.vlgmr.msrb.gmra.mxu2 %vm685_vm1, %v808_v23  ;;  %996 = vmatpush.msra.mxu3 %v875_v50  ;;  %v891_v50 = vld [vmem:[#allocation16] sm:$0xff]  ;;  %vm2455_vm1 = vcmask 97280  }
 0x29e   :  { %980 = vmatpush.msra.mxu2 %v883_v61  ;;  %1024 = vmatpush.msrb.mxu0 %v883_v61 }
 0x29f   :  { %997 = vmatpush.msra.mxu3 %v874_v52 }
 0x2a1   :  { %998 = vmatpush.msra.mxu3 %v873_v54  ;;  %v896_v54 = vld [vmem:[#allocation16 + $0x28] sm:$0xff] }
 0x2a3   :  { %999 = vmatpush.msra.mxu3 %v872_v56 }
 0x2a5   :  { %1000 = vmatpush.msra.mxu3 %v871_v58 }
 0x2a7   :  { %1001 = vmatpush.msra.mxu3 %v870_v60 }
 0x2a9   :  { %1002 = vmatpush.msra.mxu3 %v869_v62 }
 0x2ab   :  { %1003 = vmatpush.msra.mxu3 %v868_v63 }
 0x2ad   :  { %1004 = vmatpush.msra.mxu3 %v867_v0 }
 0x30b   :  { %v7722_v33 = vpop.f32.mrf.mxu0  ;;  %v7724_v34 = vpop.f32.mrf.mxu1 }
 0x310   :  { %v7726_v37 = vpop.f32.mrf.mxu2  ;;  %v7728_v38 = vpop.f32.mrf.mxu3 }
 0x311   :  { %v803_v1 = vadd.f32 %v7724_v34, %v7728_v38  ;;  %v790_v7 = vadd.f32 %v7722_v33, %v7726_v37 }
 0x313   :  { %v791_v39 = vpop.f32.mrf.mxu0  ;;  %v804_v40 = vpop.f32.mrf.mxu1 }
 0x314   :  { %v905_v39 = vld [vmem:[#allocation16 + $0x70] sm:$0xff]  ;;  %v903_v40 = vld [vmem:[#allocation16 + $0x60] sm:$0xff] }
 0x315   :  { %1058 = vmatpush.msrb.mxu2 %v905_v39  ;;  %1101 = vmatpush.msrb.mxu1 %v905_v39  ;;  %v4926_v39 = vld [vmem:[#allocation19 + $0x60] sm:$0xf] }
 0x317   :  { %1059 = vmatpush.msrb.mxu2 %v903_v40  ;;  %1102 = vmatpush.msrb.mxu1 %v903_v40 }
 0x318   :  { %v752_v41 = vpop.f32.mrf.mxu2  ;;  %v765_v42 = vpop.f32.mrf.mxu3 }
 0x319   :  { %v901_v41 = vld [vmem:[#allocation16 + $0x50] sm:$0xff]  ;;  %v899_v42 = vld [vmem:[#allocation16 + $0x40] sm:$0xff] }
 0x31a   :  { %1060 = vmatpush.msrb.mxu2 %v901_v41  ;;  %1103 = vmatpush.msrb.mxu1 %v901_v41  ;;  %v5976_v41 = vld [vmem:[#allocation19 + $0x64] sm:$0xf0] }
 0x31c   :  { %1061 = vmatpush.msrb.mxu2 %v899_v42  ;;  %1104 = vmatpush.msrb.mxu1 %v899_v42  ;;  %v5975_v42 = vld [vmem:[#allocation19 + $0x64] sm:$0xf] }
 0x320   :  { %v821_v43 = vpop.f32.mrf.mxu2 }
 0x321   :  { %v825_v44 = vpack.c.bf16 %v821_v43, %v821_v43  ;;  %v906_v43 = vld [vmem:[#allocation16 + $0x78] sm:$0xff] }
 0x323   :  { %4856 = vmatmul.msk.bf16.vlgmr.msrb.gmra.mxu3 %vm737_vm2, %v825_v44  ;;  %4857 = vmatmul.msk.bf16.vlgmr.msra.gmra.mxu0 %vm737_vm2, %v825_v44  ;;  %v897_v44 = vld [vmem:[#allocation16 + $0x30] sm:$0xff] }
 0x324   :  { %1078 = vmatpush.msra.mxu0 %v906_v43  ;;  %1062 = vmatpush.msrb.mxu2 %v897_v44 }
 0x325   :  { %1105 = vmatpush.msrb.mxu1 %v897_v44 }
 0x326   :  { %1063 = vmatpush.msrb.mxu2 %v895_v46 }
 0x327   :  { %1106 = vmatpush.msrb.mxu1 %v895_v46 }
 0x328   :  { %v823_v45 = vpop.f32.mrf.mxu2  ;;  %1064 = vmatpush.msrb.mxu2 %v893_v48 }
 0x329   :  { %v904_v45 = vld [vmem:[#allocation16 + $0x68] sm:$0xff]  ;;  %1107 = vmatpush.msrb.mxu1 %v893_v48  ;;  %v5985_v48 = vld [vmem:[#allocation19 + $0xb4] sm:$0xf] }
 0x32a   :  { %1079 = vmatpush.msra.mxu0 %v904_v45  ;;  %1065 = vmatpush.msrb.mxu2 %v891_v50 }
 0x32b   :  { %1108 = vmatpush.msrb.mxu1 %v891_v50 }
 0x32c   :  { %1080 = vmatpush.msra.mxu0 %v902_v47 }
 0x32e   :  { %1081 = vmatpush.msra.mxu0 %v900_v49 }
 0x330   :  { %1082 = vmatpush.msra.mxu0 %v898_v51 }
 0x332   :  { %1083 = vmatpush.msra.mxu0 %v896_v54 }
 0x334   :  { %1084 = vmatpush.msra.mxu0 %v894_v55 }
 0x336   :  { %1085 = vmatpush.msra.mxu0 %v892_v57 }
 0x3a0   :  { %v861_v2 = vpop.f32.mrf.mxu0 }
 0x3a1   :  { %v7734_v3 = vadd.f32 %v861_v2, %v803_v1 }
 0x3a3   :  { %v918_v4 = vsel %vm917_vm3, %v7734_v3, 0.0  ;;  %v926_v5 = vmul.f32 %v7734_v3, %v7734_v3 }
 0x3a4   :  { %v919_v6 = vrot.slane %v918_v4, 4 }
 0x3a5   :  { %v934_v8 = vsel %vm917_vm3, %v926_v5, 0.0  ;;  %vm3330_vm3 = vcmask 1041408  }
 0x3a6   :  { %v920_v9 = vadd.f32 %v919_v6, %v918_v4  ;;  %v935_v10 = vrot.slane %v934_v8, 4  ;;  %v848_v11 = vpop.f32.mrf.mxu3 }
 0x3a7   :  { %v7741_v12 = vadd.f32 %v848_v11, %v790_v7 }
 0x3a8   :  { %v921_v13 = vrot.slane %v920_v9, 2  ;;  %v936_v14 = vadd.f32 %v935_v10, %v934_v8  ;;  %v863_v15 = vpop.f32.mrf.mxu0  ;;  %v907_v10 = vld [vmem:[%s8227_s21] sm:$0x1] }
 0x3a9   :  { %v910_v16 = vsel %vm909_vm4, %v7741_v12, 0.0  ;;  %v925_v17 = vmul.f32 %v7741_v12, %v7741_v12 }
 0x3aa   :  { %v922_v18 = vadd.f32 %v921_v13, %v920_v9  ;;  %v937_v19 = vrot.slane %v936_v14, 2  ;;  %v911_v20 = vrot.slane %v910_v16, 4 }
 0x3ab   :  { %v927_v21 = vsel %vm909_vm4, %v925_v17, 0.0 }
 0x3ac   :  { %v923_v22 = vrot.slane %v922_v18, 1  ;;  %v938_v23 = vadd.f32 %v937_v19, %v936_v14  ;;  %v912_v24 = vadd.f32 %v911_v20, %v910_v16  ;;  %v928_v25 = vrot.slane %v927_v21, 4  ;;  %v908_v14 = vld [vmem:[%s8228_s16] sm:$0x1] }
 0x3ae   :  { %v924_v26 = vadd.f32 %v923_v22, %v922_v18  ;;  %v939_v27 = vrot.slane %v938_v23, 1  ;;  %v913_v28 = vrot.slane %v912_v24, 2  ;;  %v929_v29 = vadd.f32 %v928_v25, %v927_v21  ;;  %v850_v30 = vpop.f32.mrf.mxu3  ;;  %v4934_v25 = vld [vmem:[#allocation19 + $0x70] sm:$0xf] }
 0x3af   :  { %v4872_v30 = vld [vmem:[#allocation25] sm:$0xf] }
 0x3b0   :  { %v914_v31 = vadd.f32 %v913_v28, %v912_v24  ;;  %v930_v32 = vrot.slane %v929_v29, 2  ;;  %4858 = vmatmul.msk.f32.vlgmr.msra.gmra.mxu2 %vm941_vm5, %v924_v26  ;;  %v940_v33 = vadd.f32 %v939_v27, %v938_v23  ;;  %v5978_v26 = vld [vmem:[#allocation19 + $0x74] sm:$0xf0]  ;;  %v5977_v27 = vld [vmem:[#allocation19 + $0x74] sm:$0xf] }
 0x3b1   :  { %1121 = vmatpush.msra.mxu2 %v906_v43  ;;  %v4936_v28 = vld [vmem:[#allocation19 + $0x78] sm:$0xf0]  ;;  %v4928_v43 = vld [vmem:[#allocation19 + $0x68] sm:$0xf0] }
 0x3b2   :  { %4859 = vmatmul.msk.f32.vlgmr.msrb.gmra.mxu0 %vm941_vm5, %v940_v33  ;;  %v915_v34 = vrot.slane %v914_v31, 1  ;;  %v931_v35 = vadd.f32 %v930_v32, %v929_v29  ;;  %v4866_v33 = vld [vmem:[#allocation23] sm:$0xf] }
 0x3b3   :  { %1122 = vmatpush.msra.mxu2 %v904_v45 }
 0x3b4   :  { %v916_v36 = vadd.f32 %v915_v34, %v914_v31  ;;  %v932_v37 = vrot.slane %v931_v35, 1  ;;  %v5987_v31 = vld [vmem:[#allocation25] sm:$0x30]  ;;  %v5962_v34 = vld [vmem:[#allocation23] sm:$0x30] }
 0x3b5   :  { %1123 = vmatpush.msra.mxu2 %v902_v47  ;;  %v4873_v40 = vor.u32 %v5987_v31, %v4872_v30  ;;  %v4867_v46 = vor.u32 %v5962_v34, %v4866_v33  ;;  %v4966_v47 = vld [vmem:[#allocation19 + $0xb0] sm:$0xf]  ;;  %v5952_v30 = vld [vmem:[#allocation17 + $0x74] sm:$0xf]  ;;  %v5034_v31 = vld [vmem:[#allocation17 + $0x78] sm:$0xf0] }
 0x3b6   :  { %961 = vmatmul.f32.vlgmr.msra.gmra.mxu1 %v916_v36  ;;  %v933_v38 = vadd.f32 %v932_v37, %v931_v35  ;;  %v4935_v35 = vor.u32 %v5978_v26, %v4934_v25  ;;  %v5966_v25 = vld [vmem:[#allocation19 + $0x14] sm:$0xf0]  ;;  %v5037_v33 = vor.u32 %v5952_v30, %v5034_v31  ;;  %v5971_v34 = vld [vmem:[#allocation19 + $0x44] sm:$0xf]  ;;  %v5048_v31 = vld [vmem:[#allocation17 + $0x90] sm:$0xf] }
 0x3b7   :  { %1124 = vmatpush.msra.mxu2 %v900_v49  ;;  %v4968_v49 = vld [vmem:[#allocation19 + $0xb8] sm:$0xf0]  ;;  %v5941_v30 = vld [vmem:[#allocation17 + $0x14] sm:$0xf0] }
 0x3b8   :  { %1005 = vmatmul.f32.vlgmr.msra.gmra.mxu3 %v933_v38 }
 0x3b9   :  { %1125 = vmatpush.msra.mxu2 %v898_v51  ;;  %v4927_v51 = vor.u32 %v5976_v41, %v4926_v39  ;;  %v5983_v39 = vld [vmem:[#allocation19 + $0xa4] sm:$0xf] }
 0x3bb   :  { %1126 = vmatpush.msra.mxu2 %v896_v54 }
 0x3bd   :  { %1127 = vmatpush.msra.mxu2 %v894_v55  ;;  %v5974_v55 = vld [vmem:[#allocation19 + $0x54] sm:$0xf0] }
 0x3bf   :  { %1128 = vmatpush.msra.mxu2 %v892_v57  ;;  %v5973_v57 = vld [vmem:[#allocation19 + $0x54] sm:$0xf] }
 0x42f   :  { %v1026_v59 = vpop.f32.mrf.mxu0 }
 0x433   :  { %v962_v52 = vpop.f32.mrf.mxu1  ;;  %v982_v53 = vpop.f32.mrf.mxu2 }
 0x434   :  { %v983_v56 = vadd.f32 %v982_v53, %v962_v52  ;;  %v4931_v52 = vor.u32 %v5975_v42, %v4928_v43  ;;  %v4918_v53 = vld [vmem:[#allocation19 + $0x50] sm:$0xf]  ;;  %v5949_v43 = vld [vmem:[#allocation17 + $0x54] sm:$0xf0] }
 0x435   :  { %v5016_v42 = vld [vmem:[#allocation17 + $0x50] sm:$0xf] }
 0x436   :  { %v985_v58 = vmul.f32 0.055555556, %v983_v56 }
 0x438   :  { %v1030_v62 = vmul.f32 %v985_v58, %v985_v58 }
 0x43b   :  { %v1006_v60 = vpop.f32.mrf.mxu3 }
 0x43c   :  { %v1027_v61 = vadd.f32 %v1026_v59, %v1006_v60  ;;  %v4971_v59 = vor.u32 %v5985_v48, %v4968_v49  ;;  %v4958_v60 = vld [vmem:[#allocation19 + $0xa0] sm:$0xf]  ;;  %v5018_v49 = vld [vmem:[#allocation17 + $0x58] sm:$0xf0] }
 0x43e   :  { %v1029_v63 = vmul.f32 0.055555556, %v1027_v61  ;;  %v5984_v61 = vld [vmem:[#allocation19 + $0xa4] sm:$0xf0] }
 0x440   :  { %v1031_v0 = vsub.f32 %v1029_v63, %v1030_v62  ;;  %v4919_v63 = vor.u32 %v5974_v55, %v4918_v53  ;;  %v5947_v55 = vld [vmem:[#allocation17 + $0x44] sm:$0xf0] }
 0x442   :  { %v1032_v1 = vmax.f32 %v1031_v0, 0.0 }
 0x444   :  { %v1033_v2 = vadd.f32 1e-05, %v1032_v1  ;;  %v4910_v1 = vld [vmem:[#allocation19 + $0x40] sm:$0xf] }
 0x446   :  { %6263 = vrsqrt.f32 %v1033_v2  ;;  %vm1040_vm7 = vweird.f32 %v1033_v2 }
 0x44c   :  { %v6264_v4 = vpop.eup %6263 }
 0x44d   :  { %v1035_v5 = vmul.f32 %v6264_v4, %v1033_v2  ;;  %vm1041_vm6 = vweird.f32 %v6264_v4  ;;  %v5972_v2 = vld [vmem:[#allocation19 + $0x44] sm:$0xf0] }
 0x44e   :  { %vm1042_vm8 = vmor %vm1040_vm7, %vm1041_vm6 }
 0x44f   :  { %v1036_v6 = vmul.f32 %v6264_v4, %v1035_v5  ;;  %v4950_v5 = vld [vmem:[#allocation19 + $0x90] sm:$0xf] }
 0x451   :  { %v1037_v7 = vmul.f32 0.5, %v1036_v6  ;;  %v5982_v6 = vld [vmem:[#allocation19 + $0x94] sm:$0xf0] }
 0x453   :  { %v1038_v8 = vsub.f32 1.5, %v1037_v7  ;;  %v4911_v7 = vor.u32 %v5972_v2, %v4910_v1 }
 0x455   :  { %v1039_v9 = vmul.f32 %v6264_v4, %v1038_v8  ;;  %v4902_v8 = vld [vmem:[#allocation19 + $0x30] sm:$0xf] }
 0x457   :  { %v1043_v11 = vsel %vm1042_vm8, %v6264_v4, %v1039_v9  ;;  %v4959_v4 = vor.u32 %v5984_v61, %v4958_v60  ;;  %v5970_v9 = vld [vmem:[#allocation19 + $0x34] sm:$0xf0]  ;;  %v5010_v61 = vld [vmem:[#allocation17 + $0x48] sm:$0xf0] }
 0x458   :  { %v1044_v13 = vmul.f32 %v1043_v11, %v907_v10  ;;  %v4951_v10 = vor.u32 %v5982_v6, %v4950_v5  ;;  %v4942_v11 = vld [vmem:[#allocation19 + $0x80] sm:$0xf]  ;;  %v5945_v5 = vld [vmem:[#allocation17 + $0x34] sm:$0xf0]  ;;  %v5064_v6 = vld [vmem:[#allocation17 + $0xb0] sm:$0xf] }
 0x45a   :  { %4860 = vmatmul.msk.f32.vlgmr.msrb.gmra.mxu2 %vm941_vm5, %v1044_v13  ;;  %4861 = vmatmul.msk.f32.vlgmr.msra.gmra.mxu0 %vm941_vm5, %v1044_v13  ;;  %v1045_v15 = vmul.f32 %v1044_v13, %v985_v58  ;;  %v4920_v58 = vld [vmem:[#allocation19 + $0x58] sm:$0xf0]  ;;  %v5980_v13 = vld [vmem:[#allocation19 + $0x84] sm:$0xf0] }
 0x45b   :  { %v4923_v0 = vor.u32 %v5973_v57, %v4920_v58  ;;  %v5967_v57 = vld [vmem:[#allocation19 + $0x24] sm:$0xf]  ;;  %v4896_v58 = vld [vmem:[#allocation19 + $0x28] sm:$0xf0] }
 0x45c   :  { %v1046_v16 = vsub.f32 %v908_v14, %v1045_v15  ;;  %v5032_v14 = vld [vmem:[#allocation17 + $0x70] sm:$0xf]  ;;  %v5953_v15 = vld [vmem:[#allocation17 + $0x74] sm:$0xf0]  ;;  %v4899_v60 = vor.u32 %v5967_v57, %v4896_v58 }
 0x45e   :  { %4862 = vmatmul.msk.f32.vlgmr.msrb.gmra.mxu1 %vm941_vm5, %v1046_v16 }
 0x462   :  { %4863 = vmatmul.msk.f32.vlgmr.msra.gmra.mxu2 %vm941_vm5, %v1046_v16  ;;  %v4903_v16 = vor.u32 %v5970_v9, %v4902_v8  ;;  %v5961_v8 = vld [vmem:[#allocation17 + $0xb4] sm:$0xf0] }
 0x463   :  { %v5065_v9 = vor.u32 %v5961_v8, %v5064_v6  ;;  %v5168_v8 = vld [vmem:[#allocation20 + $0xb0] sm:$0xf] }
 0x4d7   :  { %v1087_v20 = vpop.f32.mrf.mxu0 }
 0x4d8   :  { %v1134_v23 = vperm.slane %v1087_v20, 0  ;;  %v5033_v20 = vor.u32 %v5953_v15, %v5032_v14  ;;  %v5002_v15 = vld [vmem:[#allocation17 + $0x38] sm:$0xf0] }
 0x4da   :  { %v1136_v36 = vmul.f32 %v1134_v23, %v7734_v3  ;;  %v5986_v3 = vld [vmem:[#allocation19 + $0xb4] sm:$0xf0] }
 0x4db   :  { %v1110_v17 = vpop.f32.mrf.mxu1  ;;  %v4967_v56 = vor.u32 %v5986_v3, %v4966_v47  ;;  %v4904_v47 = vld [vmem:[#allocation19 + $0x38] sm:$0xf0]  ;;  %v5948_v3 = vld [vmem:[#allocation17 + $0x54] sm:$0xf] }
 0x4dc   :  { %v1137_v21 = vperm.slane %v1110_v17, 0  ;;  %v4894_v17 = vld [vmem:[#allocation19 + $0x20] sm:$0xf] }
 0x4dd   :  { %v1067_v18 = vpop.f32.mrf.mxu2 }
 0x4de   :  { %v1133_v19 = vperm.slane %v1067_v18, 0  ;;  %v5968_v18 = vld [vmem:[#allocation19 + $0x24] sm:$0xf0] }
 0x4df   :  { %v4895_v23 = vor.u32 %v5968_v18, %v4894_v17  ;;  %v4992_v17 = vld [vmem:[#allocation17 + $0x20] sm:$0xf]  ;;  %v5943_v18 = vld [vmem:[#allocation17 + $0x24] sm:$0xf0] }
 0x4e0   :  { %v1135_v22 = vmul.f32 %v1133_v19, %v7741_v12  ;;  %v4939_v12 = vor.u32 %v5977_v27, %v4936_v28  ;;  %v4943_v19 = vor.u32 %v5980_v13, %v4942_v11  ;;  %v4878_v28 = vld [vmem:[#allocation19] sm:$0xf]  ;;  %v4888_v11 = vld [vmem:[#allocation19 + $0x18] sm:$0xf0]  ;;  %v5944_v13 = vld [vmem:[#allocation17 + $0x34] sm:$0xf] }
 0x4e2   :  { %v1139_v24 = vadd.f32 %v1137_v21, %v1135_v22  ;;  %v5024_v21 = vld [vmem:[#allocation17 + $0x60] sm:$0xf]  ;;  %v5951_v22 = vld [vmem:[#allocation17 + $0x64] sm:$0xf0] }
 0x4e3   :  { %v5025_v26 = vor.u32 %v5951_v22, %v5024_v21  ;;  %v5959_v21 = vld [vmem:[#allocation17 + $0xa4] sm:$0xf0]  ;;  %v5963_v22 = vld [vmem:[#allocation19 + $0x4] sm:$0xf] }
 0x4e4   :  { %v1141_v29 = vmax.f32 %v1139_v24, 0.0  ;;  %v4886_v24 = vld [vmem:[#allocation19 + $0x10] sm:$0xf] }
 0x4e5   :  { %v1130_v32 = vpop.f32.mrf.mxu2  ;;  %v4887_v27 = vor.u32 %v5966_v25, %v4886_v24 }
 0x4e6   :  { %v1138_v37 = vperm.slane %v1130_v32, 0  ;;  %v1143_v38 = vpack.c.bf16 %v1141_v29, %v1141_v29  ;;  %v5964_v29 = vld [vmem:[#allocation19 + $0x4] sm:$0xf0] }
 0x4e7   :  { %v4879_v32 = vor.u32 %v5964_v29, %v4878_v28  ;;  %v4984_v28 = vld [vmem:[#allocation17 + $0x10] sm:$0xf] }
 0x4e8   :  { %v1140_v44 = vadd.f32 %v1138_v37, %v1136_v36  ;;  %v7759_v45 = vsel %vm1180_vm9, %v1143_v38, 0  ;;  %v5950_v36 = vld [vmem:[#allocation17 + $0x64] sm:$0xf]  ;;  %v5026_v38 = vld [vmem:[#allocation17 + $0x68] sm:$0xf0] }
 0x4e9   :  { %1194 = vmatpush.bf16.msrb.mxu3 %v7759_v45  ;;  %1258 = vmatpush.bf16.msra.mxu1 %v7759_v45 }
 0x4ea   :  { %v1142_v50 = vmax.f32 %v1140_v44, 0.0  ;;  %v5017_v44 = vor.u32 %v5949_v43, %v5016_v42  ;;  %v5040_v42 = vld [vmem:[#allocation17 + $0x80] sm:$0xf] }
 0x4ec   :  { %v1144_v54 = vpack.c.bf16 %v1142_v50, %v1142_v50  ;;  %4874 = vmatmul.msk.bf16.vlgmr.msra.gmra.mxu1 %vm1176_vm10, %v4873_v40  ;;  %4868 = vmatmul.msk.bf16.vlgmr.msrb.gmra.mxu3 %vm1176_vm10, %v4867_v46  ;;  %v5981_v50 = vld [vmem:[#allocation19 + $0x94] sm:$0xf] }
 0x4ed   :  { %1404 = vmatpush.bf16.msra.mxu3 %v4935_v35  ;;  %1432 = vmatpush.bf16.msrb.mxu1 %v4939_v12  ;;  %v4912_v35 = vld [vmem:[#allocation19 + $0x48] sm:$0xf0] }
 0x4ee   :  { %v7766_v62 = vsel %vm1180_vm9, %v1144_v54, 0  ;;  %v4915_v37 = vor.u32 %v5971_v34, %v4912_v35  ;;  %v4960_v12 = vld [vmem:[#allocation19 + $0xa8] sm:$0xf0]  ;;  %v5008_v54 = vld [vmem:[#allocation17 + $0x40] sm:$0xf]  ;;  %vm3659_vm9 = vcmask 211968  }
 0x4ef   :  { %1208 = vmatpush.bf16.msrb.mxu0 %v7766_v62  ;;  %1272 = vmatpush.bf16.msrb.mxu2 %v7766_v62  ;;  %v4963_v41 = vor.u32 %v5983_v39, %v4960_v12  ;;  %v5940_v35 = vld [vmem:[#allocation17 + $0x14] sm:$0xf]  ;;  %v5066_v39 = vld [vmem:[#allocation17 + $0xb8] sm:$0xf0] }
 0x4f1   :  { %1405 = vmatpush.bf16.msra.mxu3 %v4927_v51  ;;  %1433 = vmatpush.bf16.msrb.mxu1 %v4931_v52  ;;  %v4952_v51 = vld [vmem:[#allocation19 + $0x98] sm:$0xf0]  ;;  %v5021_v52 = vor.u32 %v5948_v3, %v5018_v49  ;;  %v4978_v3 = vld [vmem:[#allocation17 + $0x8] sm:$0xf0] }
 0x4f2   :  { %4875 = vmatmul.msk.bf16.vlgmr.msrb.gmra.mxu2 %vm1176_vm10, %v4873_v40  ;;  %4869 = vmatmul.msk.bf16.vlgmr.msrb.gmra.mxu0 %vm1176_vm10, %v4867_v46  ;;  %v5029_v40 = vor.u32 %v5950_v36, %v5026_v38  ;;  %v5969_v46 = vld [vmem:[#allocation19 + $0x34] sm:$0xf]  ;;  %v4955_v53 = vor.u32 %v5981_v50, %v4952_v51  ;;  %v4986_v36 = vld [vmem:[#allocation17 + $0x18] sm:$0xf0]  ;;  %v5058_v50 = vld [vmem:[#allocation17 + $0xa8] sm:$0xf0] }
 0x4f3   :  { %1422 = vmatpush.bf16.msra.mxu0 %v4967_v56  ;;  %1450 = vmatpush.bf16.msra.mxu2 %v4971_v59  ;;  %v4907_v48 = vor.u32 %v5969_v46, %v4904_v47  ;;  %v5009_v56 = vor.u32 %v5947_v55, %v5008_v54  ;;  %v5946_v59 = vld [vmem:[#allocation17 + $0x44] sm:$0xf]  ;;  %v4989_v38 = vor.u32 %v5940_v35, %v4986_v36  ;;  %v5136_v36 = vld [vmem:[#allocation20 + $0x70] sm:$0xf] }
 0x4f4   :  { %v5013_v1 = vor.u32 %v5946_v59, %v5010_v61  ;;  %v5938_v47 = vld [vmem:[#allocation17 + $0x4] sm:$0xf] }
 0x4f5   :  { %1406 = vmatpush.bf16.msra.mxu3 %v4919_v63  ;;  %1434 = vmatpush.bf16.msrb.mxu1 %v4923_v0  ;;  %v5979_v63 = vld [vmem:[#allocation19 + $0x84] sm:$0xf]  ;;  %v4944_v0 = vld [vmem:[#allocation19 + $0x88] sm:$0xf0]  ;;  %v4981_v49 = vor.u32 %v5938_v47, %v4978_v3  ;;  %v5120_v3 = vld [vmem:[#allocation20 + $0x50] sm:$0xf] }
 0x4f6   :  { %v4947_v2 = vor.u32 %v5979_v63, %v4944_v0  ;;  %v5954_v55 = vld [vmem:[#allocation17 + $0x84] sm:$0xf] }
 0x4f7   :  { %1423 = vmatpush.bf16.msra.mxu0 %v4959_v4  ;;  %1451 = vmatpush.bf16.msra.mxu2 %v4963_v41  ;;  %v5000_v4 = vld [vmem:[#allocation17 + $0x30] sm:$0xf]  ;;  %v5939_v41 = vld [vmem:[#allocation17 + $0x4] sm:$0xf0] }
 0x4f9   :  { %1407 = vmatpush.bf16.msra.mxu3 %v4911_v7  ;;  %1435 = vmatpush.bf16.msrb.mxu1 %v4915_v37  ;;  %v5001_v7 = vor.u32 %v5945_v5, %v5000_v4  ;;  %v5960_v37 = vld [vmem:[#allocation17 + $0xb4] sm:$0xf] }
 0x4fa   :  { %v5069_v12 = vor.u32 %v5960_v37, %v5066_v39  ;;  %v6003_v37 = vld [vmem:[#allocation20 + $0x74] sm:$0xf0] }
 0x4fb   :  { %1424 = vmatpush.bf16.msra.mxu0 %v4951_v10  ;;  %1452 = vmatpush.bf16.msra.mxu2 %v4955_v53  ;;  %v5965_v10 = vld [vmem:[#allocation19 + $0x14] sm:$0xf]  ;;  %v5050_v53 = vld [vmem:[#allocation17 + $0x98] sm:$0xf0]  ;;  %v5137_v39 = vor.u32 %v6003_v37, %v5136_v36 }
 0x4fc   :  { %v4891_v14 = vor.u32 %v5965_v10, %v4888_v11  ;;  %v6010_v10 = vld [vmem:[#allocation20 + $0xb4] sm:$0xf]  ;;  %v5170_v11 = vld [vmem:[#allocation20 + $0xb8] sm:$0xf0] }
 0x4fd   :  { %1408 = vmatpush.bf16.msra.mxu3 %v4903_v16  ;;  %1436 = vmatpush.bf16.msrb.mxu1 %v4907_v48  ;;  %v5005_v16 = vor.u32 %v5944_v13, %v5002_v15  ;;  %v5958_v48 = vld [vmem:[#allocation17 + $0xa4] sm:$0xf]  ;;  %v5160_v15 = vld [vmem:[#allocation20 + $0xa0] sm:$0xf] }
 0x4fe   :  { %v5061_v51 = vor.u32 %v5958_v48, %v5058_v50  ;;  %v5998_v48 = vld [vmem:[#allocation20 + $0x54] sm:$0xf] }
 0x4ff   :  { %1425 = vmatpush.bf16.msra.mxu0 %v4943_v19  ;;  %1453 = vmatpush.bf16.msra.mxu2 %v4947_v2  ;;  %v5056_v19 = vld [vmem:[#allocation17 + $0xa0] sm:$0xf] }
 0x500   :  { %v5057_v24 = vor.u32 %v5959_v21, %v5056_v19  ;;  %v5152_v21 = vld [vmem:[#allocation20 + $0x90] sm:$0xf] }
 0x501   :  { %1409 = vmatpush.bf16.msra.mxu3 %v4895_v23  ;;  %1437 = vmatpush.bf16.msrb.mxu1 %v4899_v60  ;;  %v4880_v23 = vld [vmem:[#allocation19 + $0x8] sm:$0xf0] }
 0x502   :  { %v4883_v25 = vor.u32 %v5963_v22, %v4880_v23  ;;  %v6007_v22 = vld [vmem:[#allocation20 + $0x94] sm:$0xf0]  ;;  %v6006_v23 = vld [vmem:[#allocation20 + $0x94] sm:$0xf] }
 0x503   :  { %1583 = vmatpush.bf16.msrb.mxu0 %v5033_v20  ;;  %1601 = vmatpush.bf16.msrb.mxu2 %v5065_v9  ;;  %v4993_v20 = vor.u32 %v5943_v18, %v4992_v17  ;;  %v6011_v9 = vld [vmem:[#allocation20 + $0xb4] sm:$0xf0]  ;;  %v6008_v17 = vld [vmem:[#allocation20 + $0xa4] sm:$0xf]  ;;  %v5162_v18 = vld [vmem:[#allocation20 + $0xa8] sm:$0xf0] }
 0x504   :  { %v5169_v13 = vor.u32 %v6011_v9, %v5168_v8 }
 0x505   :  { %1410 = vmatpush.bf16.msra.mxu3 %v4887_v27  ;;  %1438 = vmatpush.bf16.msrb.mxu1 %v4891_v14  ;;  %v4994_v27 = vld [vmem:[#allocation17 + $0x28] sm:$0xf0]  ;;  %v5173_v14 = vor.u32 %v6010_v10, %v5170_v11  ;;  %v5088_v10 = vld [vmem:[#allocation20 + $0x10] sm:$0xf]  ;;  %v5991_v11 = vld [vmem:[#allocation20 + $0x14] sm:$0xf0] }
 0x507   :  { %1584 = vmatpush.bf16.msrb.mxu0 %v5025_v26  ;;  %v5942_v26 = vld [vmem:[#allocation17 + $0x24] sm:$0xf]  ;;  %1602 = vmatpush.bf16.msrb.mxu2 %v5057_v24  ;;  %v5154_v24 = vld [vmem:[#allocation20 + $0x98] sm:$0xf0] }
 0x508   :  { %v4997_v29 = vor.u32 %v5942_v26, %v4994_v27  ;;  %v5157_v26 = vor.u32 %v6006_v23, %v5154_v24  ;;  %v5144_v27 = vld [vmem:[#allocation20 + $0x80] sm:$0xf] }
 0x509   :  { %1411 = vmatpush.bf16.msra.mxu3 %v4879_v32  ;;  %v5957_v32 = vld [vmem:[#allocation17 + $0x94] sm:$0xf0]  ;;  %1439 = vmatpush.bf16.msrb.mxu1 %v4883_v25  ;;  %v5153_v25 = vor.u32 %v6007_v22, %v5152_v21  ;;  %v5082_v22 = vld [vmem:[#allocation20 + $0x8] sm:$0xf0] }
 0x50a   :  { %v5049_v34 = vor.u32 %v5957_v32, %v5048_v31 }
 0x50b   :  { %1585 = vmatpush.bf16.msrb.mxu0 %v5017_v44  ;;  %v5955_v44 = vld [vmem:[#allocation17 + $0x84] sm:$0xf0] }
 0x50c   :  { %1603 = vmatpush.bf16.msrb.mxu2 %v5049_v34  ;;  %v5041_v46 = vor.u32 %v5955_v44, %v5040_v42  ;;  %v6012_v34 = vld [vmem:[#allocation26] sm:$0x30]  ;;  %v6001_v42 = vld [vmem:[#allocation20 + $0x64] sm:$0xf0] }
 0x50d   :  { %1611 = vmatpush.bf16.msrb.mxu3 %v5037_v33  ;;  %v4985_v33 = vor.u32 %v5941_v30, %v4984_v28  ;;  %1629 = vmatpush.bf16.msra.mxu1 %v5069_v12  ;;  %v6005_v28 = vld [vmem:[#allocation20 + $0x84] sm:$0xf0]  ;;  %v5146_v30 = vld [vmem:[#allocation20 + $0x88] sm:$0xf0]  ;;  %v5138_v12 = vld [vmem:[#allocation20 + $0x78] sm:$0xf0] }
 0x50e   :  { %v5145_v31 = vor.u32 %v6005_v28, %v5144_v27 }
 0x50f   :  { %1586 = vmatpush.bf16.msrb.mxu0 %v5009_v56  ;;  %v5042_v56 = vld [vmem:[#allocation17 + $0x88] sm:$0xf0] }
 0x510   :  { %1604 = vmatpush.bf16.msrb.mxu2 %v5041_v46  ;;  %v5045_v57 = vor.u32 %v5954_v55, %v5042_v56  ;;  %v5130_v46 = vld [vmem:[#allocation20 + $0x68] sm:$0xf0] }
 0x511   :  { %1612 = vmatpush.bf16.msrb.mxu3 %v5029_v40  ;;  %v4976_v40 = vld [vmem:[#allocation17] sm:$0xf]  ;;  %1630 = vmatpush.bf16.msra.mxu1 %v5061_v51  ;;  %v5114_v55 = vld [vmem:[#allocation20 + $0x48] sm:$0xf0] }
 0x512   :  { %v4977_v43 = vor.u32 %v5939_v41, %v4976_v40  ;;  %v5128_v41 = vld [vmem:[#allocation20 + $0x60] sm:$0xf] }
 0x513   :  { %1587 = vmatpush.bf16.msrb.mxu0 %v5001_v7  ;;  %v5129_v44 = vor.u32 %v6001_v42, %v5128_v41  ;;  %v5112_v51 = vld [vmem:[#allocation20 + $0x40] sm:$0xf]  ;;  %v5240_v41 = vld [vmem:[#allocation22 + $0x70] sm:$0xf]  ;;  %v6028_v42 = vld [vmem:[#allocation22 + $0x74] sm:$0xf0] }
 0x515   :  { %1613 = vmatpush.bf16.msrb.mxu3 %v5021_v52  ;;  %v5956_v52 = vld [vmem:[#allocation17 + $0x94] sm:$0xf] }
 0x516   :  { %v5053_v54 = vor.u32 %v5956_v52, %v5050_v53  ;;  %v5997_v52 = vld [vmem:[#allocation20 + $0x44] sm:$0xf0]  ;;  %v5996_v53 = vld [vmem:[#allocation20 + $0x44] sm:$0xf] }
 0x517   :  { %1588 = vmatpush.bf16.msrb.mxu0 %v4993_v20  ;;  %v5165_v20 = vor.u32 %v6008_v17, %v5162_v18  ;;  %v5117_v56 = vor.u32 %v5996_v53, %v5114_v55  ;;  %v5080_v18 = vld [vmem:[#allocation20] sm:$0xf]  ;;  %v6023_v53 = vld [vmem:[#allocation22 + $0x54] sm:$0xf]  ;;  %v5226_v55 = vld [vmem:[#allocation22 + $0x58] sm:$0xf0] }
 0x518   :  { %1631 = vmatpush.bf16.msra.mxu1 %v5053_v54  ;;  %v5113_v54 = vor.u32 %v5997_v52, %v5112_v51  ;;  %v5224_v51 = vld [vmem:[#allocation22 + $0x50] sm:$0xf]  ;;  %v6024_v52 = vld [vmem:[#allocation22 + $0x54] sm:$0xf0] }
 0x519   :  { %1614 = vmatpush.bf16.msrb.mxu3 %v5013_v1 }
 0x51b   :  { %1589 = vmatpush.bf16.msrb.mxu0 %v4985_v33  ;;  %v5074_v33 = vld [vmem:[#allocation26] sm:$0xf] }
 0x51c   :  { %1632 = vmatpush.bf16.msra.mxu1 %v5045_v57  ;;  %v5075_v35 = vor.u32 %v6012_v34, %v5074_v33 }
 0x51d   :  { %1615 = vmatpush.bf16.msrb.mxu3 %v5005_v16  ;;  %v6009_v16 = vld [vmem:[#allocation20 + $0xa4] sm:$0xf0] }
 0x51e   :  { %v5161_v19 = vor.u32 %v6009_v16, %v5160_v15  ;;  %v5090_v15 = vld [vmem:[#allocation20 + $0x18] sm:$0xf0] }
 0x51f   :  { %1590 = vmatpush.bf16.msrb.mxu0 %v4977_v43  ;;  %v6000_v43 = vld [vmem:[#allocation20 + $0x64] sm:$0xf] }
 0x520   :  { %v5133_v47 = vor.u32 %v6000_v43, %v5130_v46  ;;  %v6027_v43 = vld [vmem:[#allocation22 + $0x74] sm:$0xf]  ;;  %v5242_v46 = vld [vmem:[#allocation22 + $0x78] sm:$0xf0] }
 0x521   :  { %1616 = vmatpush.bf16.msrb.mxu3 %v4997_v29  ;;  %v6004_v29 = vld [vmem:[#allocation20 + $0x84] sm:$0xf] }
 0x522   :  { %v5149_v32 = vor.u32 %v6004_v29, %v5146_v30 }
 0x525   :  { %1617 = vmatpush.bf16.msrb.mxu3 %v4989_v38  ;;  %v6002_v38 = vld [vmem:[#allocation20 + $0x74] sm:$0xf] }
 0x526   :  { %v5141_v40 = vor.u32 %v6002_v38, %v5138_v12  ;;  %v5178_v38 = vld [vmem:[%s8229_s3] sm:$0xf] }
 0x529   :  { %1618 = vmatpush.bf16.msrb.mxu3 %v4981_v49  ;;  %v5122_v49 = vld [vmem:[#allocation20 + $0x58] sm:$0xf0] }
 0x52a   :  { %v5125_v50 = vor.u32 %v5998_v48, %v5122_v49  ;;  %v6025_v48 = vld [vmem:[#allocation22 + $0x64] sm:$0xf]  ;;  %v5234_v49 = vld [vmem:[#allocation22 + $0x68] sm:$0xf0] }
 0x569   :  { %v1260_v58 = vpop.f32.mrf.mxu1 }
 0x56f   :  { %v1196_v61 = vpop.f32.mrf.mxu3  ;;  %v1210_v63 = vpop.f32.mrf.mxu0 }
 0x571   :  { %v1262_v59 = vpop.f32.mrf.mxu1 }
 0x572   :  { %v1279_v60 = vpack.c.bf16 %v1262_v59, %v1260_v58  ;;  %v5104_v58 = vld [vmem:[#allocation20 + $0x30] sm:$0xf]  ;;  %v5995_v59 = vld [vmem:[#allocation20 + $0x34] sm:$0xf0] }
 0x574   :  { %1412 = vmatmul.bf16.vlgmr.msra.gmra.mxu3 %v1279_v60  ;;  %1440 = vmatmul.bf16.vlgmr.msrb.gmra.mxu1 %v1279_v60  ;;  %v5994_v60 = vld [vmem:[#allocation20 + $0x34] sm:$0xf] }
 0x575   :  { %v1274_v0 = vpop.f32.mrf.mxu2  ;;  %1826 = vmatpush.bf16.msrb.mxu1 %v5137_v39  ;;  %1854 = vmatpush.bf16.msra.mxu3 %v5141_v40  ;;  %v6037_v39 = vld [vmem:[%s8229_s3] sm:$0x30] }
 0x576   :  { %v5179_v12 = vor.u32 %v6037_v39, %v5178_v38  ;;  %v6017_v38 = vld [vmem:[#allocation22 + $0x24] sm:$0xf] }
 0x577   :  { %v1198_v1 = vpop.f32.mrf.mxu3  ;;  %v1212_v4 = vpop.f32.mrf.mxu0 }
 0x578   :  { %v1215_v6 = vpack.c.bf16 %v1198_v1, %v1196_v61  ;;  %v1216_v7 = vpack.c.bf16 %v1212_v4, %v1210_v63  ;;  %v5105_v61 = vor.u32 %v5995_v59, %v5104_v58  ;;  %v5106_v63 = vld [vmem:[#allocation20 + $0x38] sm:$0xf0]  ;;  %v5096_v1 = vld [vmem:[#allocation20 + $0x20] sm:$0xf]  ;;  %v5992_v4 = vld [vmem:[#allocation20 + $0x24] sm:$0xf]  ;;  %v5229_v58 = vor.u32 %v6023_v53, %v5226_v55 }
 0x579   :  { %1827 = vmatpush.bf16.msrb.mxu1 %v5129_v44  ;;  %1855 = vmatpush.bf16.msra.mxu3 %v5133_v47  ;;  %v5241_v44 = vor.u32 %v6028_v42, %v5240_v41  ;;  %v5245_v47 = vor.u32 %v6027_v43, %v5242_v46  ;;  %v5272_v59 = vld [vmem:[#allocation22 + $0xb0] sm:$0xf]  ;;  %v5248_v42 = vld [vmem:[#allocation22 + $0x80] sm:$0xf]  ;;  %v6030_v43 = vld [vmem:[#allocation22 + $0x84] sm:$0xf0] }
 0x57a   :  { %v5249_v46 = vor.u32 %v6030_v43, %v5248_v42  ;;  %v6014_v53 = vld [vmem:[#allocation22 + $0x4] sm:$0xf0]  ;;  %v2153_v42 = vld [vmem:[#allocation28 + $0xa0] sm:$0xff] }
 0x57b   :  { %v2133_v43 = vld [vmem:[#allocation28] sm:$0xff] }
 0x57d   :  { %v1276_v2 = vpop.f32.mrf.mxu2  ;;  %1856 = vmatpush.bf16.msra.mxu3 %v5125_v50  ;;  %v5237_v50 = vor.u32 %v6025_v48, %v5234_v49  ;;  %v6016_v48 = vld [vmem:[#allocation22 + $0x14] sm:$0xf0] }
 0x57e   :  { %v1280_v5 = vpack.c.bf16 %v1276_v2, %v1274_v0  ;;  %v5109_v0 = vor.u32 %v5994_v60, %v5106_v63  ;;  %v5993_v2 = vld [vmem:[#allocation20 + $0x24] sm:$0xf0]  ;;  %v6036_v60 = vld [vmem:[#allocation22 + $0xb4] sm:$0xf0] }
 0x57f   :  { %v5273_v63 = vor.u32 %v6036_v60, %v5272_v59 }
 0x580   :  { %4972 = vmatmul.msk.bf16.vlgmr.msra.gmra.mxu0 %vm941_vm5, %v1280_v5  ;;  %4973 = vmatmul.msk.bf16.vlgmr.msra.gmra.mxu2 %vm941_vm5, %v1280_v5  ;;  %v5097_v5 = vor.u32 %v5993_v2, %v5096_v1  ;;  %v5216_v2 = vld [vmem:[#allocation22 + $0x40] sm:$0xf] }
 0x581   :  { %1680 = vmatpush.bf16.msra.mxu2 %v7759_v45  ;;  %1694 = vmatpush.bf16.msra.mxu0 %v7766_v62 }
 0x582   :  { %1857 = vmatpush.bf16.msra.mxu3 %v5117_v56 }
 0x584   :  { %1619 = vmatmul.bf16.vlgmr.msrb.gmra.mxu3 %v1215_v6  ;;  %5071 = vmatmul.msk.bf16.vlgmr.msra.gmra.mxu1 %vm941_vm5, %v1216_v7 }
 0x586   :  { %1858 = vmatpush.bf16.msra.mxu3 %v5109_v0  ;;  %v5274_v0 = vld [vmem:[#allocation22 + $0xb8] sm:$0xf0] }
 0x590   :  { %1591 = vmatmul.bf16.vlgmr.msrb.gmra.mxu0 %v1215_v6  ;;  %5070 = vmatmul.msk.bf16.vlgmr.msrb.gmra.mxu2 %vm941_vm5, %v1216_v7  ;;  %v5098_v6 = vld [vmem:[#allocation20 + $0x28] sm:$0xf0] }
 0x591   :  { %1844 = vmatpush.bf16.msrb.mxu2 %v5169_v13  ;;  %1872 = vmatpush.bf16.msrb.mxu0 %v5173_v14  ;;  %v5101_v8 = vor.u32 %v5992_v4, %v5098_v6  ;;  %v5990_v13 = vld [vmem:[#allocation20 + $0x14] sm:$0xf]  ;;  %v5089_v14 = vor.u32 %v5991_v11, %v5088_v10  ;;  %v6022_v4 = vld [vmem:[#allocation22 + $0x44] sm:$0xf0]  ;;  %v5264_v10 = vld [vmem:[#allocation22 + $0xa0] sm:$0xf] }
 0x592   :  { %v5093_v16 = vor.u32 %v5990_v13, %v5090_v15  ;;  %v5217_v6 = vor.u32 %v6022_v4, %v5216_v2  ;;  %v6034_v11 = vld [vmem:[#allocation22 + $0xa4] sm:$0xf0]  ;;  %v6033_v13 = vld [vmem:[#allocation22 + $0xa4] sm:$0xf]  ;;  %v5266_v15 = vld [vmem:[#allocation22 + $0xa8] sm:$0xf0] }
 0x593   :  { %1859 = vmatpush.bf16.msra.mxu3 %v5101_v8  ;;  %v5218_v8 = vld [vmem:[#allocation22 + $0x48] sm:$0xf0] }
 0x595   :  { %1845 = vmatpush.bf16.msrb.mxu2 %v5161_v19  ;;  %1873 = vmatpush.bf16.msrb.mxu0 %v5165_v20  ;;  %v5989_v19 = vld [vmem:[#allocation20 + $0x4] sm:$0xf0]  ;;  %v5988_v20 = vld [vmem:[#allocation20 + $0x4] sm:$0xf] }
 0x596   :  { %v5081_v21 = vor.u32 %v5989_v19, %v5080_v18  ;;  %v5085_v24 = vor.u32 %v5988_v20, %v5082_v22  ;;  %v5208_v18 = vld [vmem:[#allocation22 + $0x30] sm:$0xf]  ;;  %v6020_v19 = vld [vmem:[#allocation22 + $0x34] sm:$0xf0]  ;;  %v6019_v20 = vld [vmem:[#allocation22 + $0x34] sm:$0xf] }
 0x597   :  { %1860 = vmatpush.bf16.msra.mxu3 %v5093_v16  ;;  %v5269_v16 = vor.u32 %v6033_v13, %v5266_v15  ;;  %v5210_v22 = vld [vmem:[#allocation22 + $0x38] sm:$0xf0]  ;;  %v2146_v15 = vld [vmem:[#allocation28 + $0x68] sm:$0xff] }
 0x599   :  { %1846 = vmatpush.bf16.msrb.mxu2 %v5153_v25  ;;  %1874 = vmatpush.bf16.msrb.mxu0 %v5157_v26 }
 0x59b   :  { %1861 = vmatpush.bf16.msra.mxu3 %v5085_v24  ;;  %v5213_v24 = vor.u32 %v6019_v20, %v5210_v22  ;;  %v2143_v20 = vld [vmem:[#allocation28 + $0x50] sm:$0xff]  ;;  %v2141_v22 = vld [vmem:[#allocation28 + $0x40] sm:$0xff] }
 0x59d   :  { %1847 = vmatpush.bf16.msrb.mxu2 %v5145_v31  ;;  %1875 = vmatpush.bf16.msrb.mxu0 %v5149_v32 }
 0x59f   :  { %2101 = vmatpush.bf16.msrb.mxu3 %v5245_v47  ;;  %v5250_v47 = vld [vmem:[#allocation22 + $0x88] sm:$0xf0] }
 0x5a0   :  { %5076 = vmatmul.msk.bf16.vlgmr.msra.gmra.mxu2 %vm1176_vm10, %v5075_v35  ;;  %5077 = vmatmul.msk.bf16.vlgmr.msra.gmra.mxu0 %vm1176_vm10, %v5075_v35 }
 0x5a1   :  { %1927 = vmatpush.bf16.msra.mxu2 %v7759_v45  ;;  %1941 = vmatpush.bf16.msra.mxu0 %v7766_v62  ;;  %v5999_v45 = vld [vmem:[#allocation20 + $0x54] sm:$0xf0] }
 0x5a2   :  { %v5121_v62 = vor.u32 %v5999_v45, %v5120_v3  ;;  %v5232_v3 = vld [vmem:[#allocation22 + $0x60] sm:$0xf]  ;;  %v6026_v45 = vld [vmem:[#allocation22 + $0x64] sm:$0xf0] }
 0x5a3   :  { %2102 = vmatpush.bf16.msrb.mxu3 %v5237_v50  ;;  %v5194_v50 = vld [vmem:[#allocation22 + $0x18] sm:$0xf0] }
 0x5a4   :  { %1828 = vmatpush.bf16.msrb.mxu1 %v5121_v62  ;;  %v5233_v62 = vor.u32 %v6026_v45, %v5232_v3  ;;  %v5192_v45 = vld [vmem:[#allocation22 + $0x10] sm:$0xf] }
 0x5a5   :  { %v5193_v49 = vor.u32 %v6016_v48, %v5192_v45  ;;  %v2149_v45 = vld [vmem:[#allocation28 + $0x80] sm:$0xff] }
 0x5a7   :  { %2103 = vmatpush.bf16.msrb.mxu3 %v5229_v58  ;;  %v5186_v58 = vld [vmem:[#allocation22 + $0x8] sm:$0xf0] }
 0x5a8   :  { %1829 = vmatpush.bf16.msrb.mxu1 %v5113_v54  ;;  %v5225_v54 = vor.u32 %v6024_v52, %v5224_v51  ;;  %v5184_v52 = vld [vmem:[#allocation22] sm:$0xf] }
 0x5a9   :  { %v5185_v55 = vor.u32 %v6014_v53, %v5184_v52 }
 0x5ac   :  { %1830 = vmatpush.bf16.msrb.mxu1 %v5105_v61  ;;  %v6035_v61 = vld [vmem:[#allocation22 + $0xb4] sm:$0xf] }
 0x5ad   :  { %v5277_v1 = vor.u32 %v6035_v61, %v5274_v0 }
 0x5b0   :  { %1831 = vmatpush.bf16.msrb.mxu1 %v5097_v5  ;;  %v6021_v5 = vld [vmem:[#allocation22 + $0x44] sm:$0xf] }
 0x5b4   :  { %1832 = vmatpush.bf16.msrb.mxu1 %v5089_v14  ;;  %v5265_v14 = vor.u32 %v6034_v11, %v5264_v10 }
 0x5b8   :  { %1833 = vmatpush.bf16.msrb.mxu1 %v5081_v21  ;;  %v5209_v21 = vor.u32 %v6020_v19, %v5208_v18  ;;  %v2145_v18 = vld [vmem:[#allocation28 + $0x60] sm:$0xff]  ;;  %v2144_v19 = vld [vmem:[#allocation28 + $0x58] sm:$0xff] }
 0x5bc   :  { %2073 = vmatpush.bf16.msra.mxu1 %v5241_v44  ;;  %v6029_v44 = vld [vmem:[#allocation22 + $0x84] sm:$0xf] }
 0x5bd   :  { %v5253_v3 = vor.u32 %v6029_v44, %v5250_v47  ;;  %v2152_v44 = vld [vmem:[#allocation28 + $0x98] sm:$0xff] }
 0x5c0   :  { %2074 = vmatpush.bf16.msra.mxu1 %v5233_v62  ;;  %v6015_v62 = vld [vmem:[#allocation22 + $0x14] sm:$0xf] }
 0x5c1   :  { %v5197_v51 = vor.u32 %v6015_v62, %v5194_v50 }
 0x5c4   :  { %2075 = vmatpush.bf16.msra.mxu1 %v5225_v54  ;;  %v6013_v54 = vld [vmem:[#allocation22 + $0x4] sm:$0xf] }
 0x5c5   :  { %v5189_v60 = vor.u32 %v6013_v54, %v5186_v58 }
 0x5c8   :  { %2076 = vmatpush.bf16.msra.mxu1 %v5217_v6 }
 0x5cc   :  { %2077 = vmatpush.bf16.msra.mxu1 %v5209_v21  ;;  %v2142_v21 = vld [vmem:[#allocation28 + $0x48] sm:$0xff] }
 0x5f1   :  { %v7804_v40 = vpop.f32.mrf.mxu1 }
 0x5f7   :  { %v7786_v17 = vpop.f32.mrf.mxu3 }
 0x5f9   :  { %v7806_v56 = vpop.f32.mrf.mxu1 }
 0x5fd   :  { %v7782_v57 = vpop.f32.mrf.mxu0 }
 0x5ff   :  { %v1415_v26 = vpop.f32.mrf.mxu3 }
 0x603   :  { %v7784_v7 = vpop.f32.mrf.mxu2 }
 0x605   :  { %v1429_v9 = vpop.f32.mrf.mxu0 }
 0x606   :  { %v1430_v28 = vadd.f32 %v1429_v9, %v1415_v26  ;;  %v5221_v9 = vor.u32 %v6021_v5, %v5218_v8  ;;  %v5256_v26 = vld [vmem:[#allocation22 + $0x90] sm:$0xf] }
 0x608   :  { %2104 = vmatpush.bf16.msrb.mxu3 %v5221_v9 }
 0x60b   :  { %v7788_v23 = vpop.f32.mrf.mxu2 }
 0x60c   :  { %2105 = vmatpush.bf16.msrb.mxu3 %v5213_v24 }
 0x60d   :  { %v7790_v25 = vpop.f32.mrf.mxu0 }
 0x613   :  { %v7792_v27 = vpop.f32.mrf.mxu2 }
 0x615   :  { %v1594_v29 = vpop.f32.mrf.mxu0 }
 0x616   :  { %v7794_v30 = vadd.f32 %v1594_v29, %v1430_v28  ;;  %v6032_v28 = vld [vmem:[#allocation22 + $0x94] sm:$0xf0]  ;;  %v6031_v29 = vld [vmem:[#allocation22 + $0x94] sm:$0xf] }
 0x61b   :  { %v7796_v31 = vpop.f32.mrf.mxu2 }
 0x61c   :  { %v1609_v58 = vadd.f32 %v7796_v31, %v7794_v30 }
 0x61d   :  { %v1696_v32 = vpop.f32.mrf.mxu0 }
 0x623   :  { %v1682_v33 = vpop.f32.mrf.mxu2 }
 0x625   :  { %v1698_v34 = vpop.f32.mrf.mxu0 }
 0x626   :  { %v1702_v35 = vpack.c.bf16 %v1698_v34, %v1696_v32  ;;  %v5257_v32 = vor.u32 %v6032_v28, %v5256_v26  ;;  %v7808_v34 = vpop.f32.mrf.mxu1  ;;  %v2140_v26 = vld [vmem:[#allocation28 + $0x38] sm:$0xff]  ;;  %v2139_v28 = vld [vmem:[#allocation28 + $0x30] sm:$0xff] }
 0x628   :  { %5174 = vmatmul.msk.bf16.vlgmr.msrb.gmra.mxu2 %vm941_vm5, %v1702_v35  ;;  %5175 = vmatmul.msk.bf16.vlgmr.msrb.gmra.mxu0 %vm941_vm5, %v1702_v35 }
 0x629   :  { %2091 = vmatpush.bf16.msrb.mxu2 %v5273_v63  ;;  %2119 = vmatpush.bf16.msrb.mxu0 %v5277_v1  ;;  %v1428_v63 = vadd.f32 %v7782_v57, %v7786_v17 }
 0x62b   :  { %v1684_v36 = vpop.f32.mrf.mxu2  ;;  %v1593_v0 = vadd.f32 %v7790_v25, %v1428_v63  ;;  %v2148_v25 = vld [vmem:[#allocation28 + $0x78] sm:$0xff] }
 0x62c   :  { %v1701_v37 = vpack.c.bf16 %v1684_v36, %v1682_v33  ;;  %v5258_v33 = vld [vmem:[#allocation22 + $0x98] sm:$0xf0]  ;;  %v5200_v36 = vld [vmem:[#allocation22 + $0x20] sm:$0xf] }
 0x62d   :  { %2092 = vmatpush.bf16.msrb.mxu2 %v5265_v14  ;;  %2120 = vmatpush.bf16.msrb.mxu0 %v5269_v16  ;;  %v5261_v35 = vor.u32 %v6031_v29, %v5258_v33  ;;  %v1607_v4 = vadd.f32 %v7792_v27, %v1593_v0  ;;  %v2147_v27 = vld [vmem:[#allocation28 + $0x70] sm:$0xff]  ;;  %v7826_v16 = vpop.f32.mrf.mxu3  ;;  %v2138_v29 = vld [vmem:[#allocation28 + $0x28] sm:$0xff]  ;;  %v2156_v33 = vld [vmem:[#allocation28 + $0xb8] sm:$0xff] }
 0x62e   :  { %1834 = vmatmul.bf16.vlgmr.msrb.gmra.mxu1 %v1701_v37  ;;  %1862 = vmatmul.bf16.vlgmr.msra.gmra.mxu3 %v1701_v37  ;;  %v6018_v37 = vld [vmem:[#allocation22 + $0x24] sm:$0xf0]  ;;  %v7810_v59 = vpop.f32.mrf.mxu1 }
 0x62f   :  { %v5201_v39 = vor.u32 %v6018_v37, %v5200_v36  ;;  %v2136_v36 = vld [vmem:[#allocation28 + $0x18] sm:$0xff]  ;;  %v2155_v37 = vld [vmem:[#allocation28 + $0xb0] sm:$0xff] }
 0x631   :  { %2093 = vmatpush.bf16.msrb.mxu2 %v5257_v32  ;;  %2121 = vmatpush.bf16.msrb.mxu0 %v5261_v35  ;;  %v2137_v32 = vld [vmem:[#allocation28 + $0x20] sm:$0xff] }
 0x632   :  { %2078 = vmatpush.bf16.msra.mxu1 %v5201_v39  ;;  %v2154_v39 = vld [vmem:[#allocation28 + $0xa8] sm:$0xff] }
 0x635   :  { %2094 = vmatpush.bf16.msrb.mxu2 %v5249_v46  ;;  %2122 = vmatpush.bf16.msrb.mxu0 %v5253_v3  ;;  %v7828_v24 = vpop.f32.mrf.mxu3  ;;  %v2151_v46 = vld [vmem:[#allocation28 + $0x90] sm:$0xff]  ;;  %v2150_v3 = vld [vmem:[#allocation28 + $0x88] sm:$0xff] }
 0x636   :  { %2079 = vmatpush.bf16.msra.mxu1 %v5193_v49  ;;  %v1456_v49 = vadd.f32 %v7784_v7, %v7804_v40 }
 0x638   :  { %5180 = vmatmul.msk.bf16.vlgmr.msra.gmra.mxu2 %vm1176_vm10, %v5179_v12  ;;  %5181 = vmatmul.msk.bf16.vlgmr.msra.gmra.mxu0 %vm1176_vm10, %v5179_v12  ;;  %v5202_v12 = vld [vmem:[#allocation22 + $0x28] sm:$0xf0]  ;;  %v1621_v50 = vadd.f32 %v7826_v16, %v1456_v49  ;;  %vm4740_vm10 = vcmask 228352  }
 0x639   :  { %v5205_v41 = vor.u32 %v6017_v38, %v5202_v12  ;;  %2210 = vmatpush.msra.mxu2 %v2148_v25  ;;  %2238 = vmatpush.msra.mxu0 %v2156_v33  ;;  %v2135_v38 = vld [vmem:[#allocation28 + $0x10] sm:$0xff] }
 0x63a   :  { %2080 = vmatpush.bf16.msra.mxu1 %v5185_v55  ;;  %v1458_v55 = vadd.f32 %v7788_v23, %v7806_v56  ;;  %v1635_v63 = vadd.f32 %v7808_v34, %v1621_v50 }
 0x63b   :  { %2106 = vmatpush.bf16.msrb.mxu3 %v5205_v41  ;;  %2211 = vmatpush.msra.mxu2 %v2147_v27  ;;  %v2134_v41 = vld [vmem:[#allocation28 + $0x8] sm:$0xff] }
 0x63c   :  { %2239 = vmatpush.msra.mxu0 %v2155_v37  ;;  %v1623_v0 = vadd.f32 %v7828_v24, %v1458_v55  ;;  %v2162_v55 = vld [vmem:[#allocation29 + $0x28] sm:$0xff] }
 0x63d   :  { %2212 = vmatpush.msra.mxu2 %v2146_v15 }
 0x63e   :  { %2254 = vmatpush.msrb.mxu1 %v2148_v25  ;;  %2240 = vmatpush.msra.mxu0 %v2154_v39  ;;  %v1637_v30 = vadd.f32 %v7810_v59, %v1623_v0 }
 0x63f   :  { %2107 = vmatpush.bf16.msrb.mxu3 %v5197_v51  ;;  %2213 = vmatpush.msra.mxu2 %v2145_v18 }
 0x640   :  { %2255 = vmatpush.msrb.mxu1 %v2147_v27  ;;  %2241 = vmatpush.msra.mxu0 %v2153_v42 }
 0x641   :  { %2214 = vmatpush.msra.mxu2 %v2144_v19 }
 0x642   :  { %2256 = vmatpush.msrb.mxu1 %v2146_v15  ;;  %2242 = vmatpush.msra.mxu0 %v2152_v44 }
 0x643   :  { %2108 = vmatpush.bf16.msrb.mxu3 %v5189_v60  ;;  %2215 = vmatpush.msra.mxu2 %v2143_v20 }
 0x644   :  { %2257 = vmatpush.msrb.mxu1 %v2145_v18  ;;  %2243 = vmatpush.msra.mxu0 %v2151_v46 }
 0x645   :  { %2216 = vmatpush.msra.mxu2 %v2142_v21 }
 0x646   :  { %2258 = vmatpush.msrb.mxu1 %v2144_v19  ;;  %2244 = vmatpush.msra.mxu0 %v2150_v3 }
 0x647   :  { %2217 = vmatpush.msra.mxu2 %v2141_v22  ;;  %2282 = vmatpush.msra.mxu3 %v2156_v33 }
 0x648   :  { %2259 = vmatpush.msrb.mxu1 %v2143_v20  ;;  %2245 = vmatpush.msra.mxu0 %v2149_v45 }
 0x649   :  { %2218 = vmatpush.msra.mxu2 %v2140_v26  ;;  %2283 = vmatpush.msra.mxu3 %v2155_v37 }
 0x64a   :  { %2260 = vmatpush.msrb.mxu1 %v2142_v21 }
 0x64b   :  { %2219 = vmatpush.msra.mxu2 %v2139_v28  ;;  %2284 = vmatpush.msra.mxu3 %v2154_v39 }
 0x64c   :  { %2261 = vmatpush.msrb.mxu1 %v2141_v22 }
 0x64d   :  { %2220 = vmatpush.msra.mxu2 %v2138_v29  ;;  %2285 = vmatpush.msra.mxu3 %v2153_v42 }
 0x64e   :  { %2262 = vmatpush.msrb.mxu1 %v2140_v26 }
 0x64f   :  { %2221 = vmatpush.msra.mxu2 %v2137_v32  ;;  %2286 = vmatpush.msra.mxu3 %v2152_v44 }
 0x650   :  { %2263 = vmatpush.msrb.mxu1 %v2139_v28 }
 0x651   :  { %2222 = vmatpush.msra.mxu2 %v2136_v36  ;;  %2287 = vmatpush.msra.mxu3 %v2151_v46 }
 0x652   :  { %2264 = vmatpush.msrb.mxu1 %v2138_v29 }
 0x653   :  { %2223 = vmatpush.msra.mxu2 %v2135_v38  ;;  %2288 = vmatpush.msra.mxu3 %v2150_v3 }
 0x654   :  { %2265 = vmatpush.msrb.mxu1 %v2137_v32 }
 0x655   :  { %2224 = vmatpush.msra.mxu2 %v2134_v41  ;;  %2289 = vmatpush.msra.mxu3 %v2149_v45 }
 0x656   :  { %2266 = vmatpush.msrb.mxu1 %v2136_v36 }
 0x657   :  { %2225 = vmatpush.msra.mxu2 %v2133_v43 }
 0x658   :  { %2267 = vmatpush.msrb.mxu1 %v2135_v38 }
 0x65a   :  { %2268 = vmatpush.msrb.mxu1 %v2134_v41 }
 0x65c   :  { %2269 = vmatpush.msrb.mxu1 %v2133_v43 }
 0x6a5   :  { %v7812_v61 = vpop.f32.mrf.mxu0 }
 0x6ab   :  { %v1835_v1 = vpop.f32.mrf.mxu1  ;;  %v1849_v2 = vpop.f32.mrf.mxu2 }
 0x6ac   :  { %v1850_v5 = vadd.f32 %v1849_v2, %v1835_v1 }
 0x6ad   :  { %v7818_v6 = vpop.f32.mrf.mxu0 }
 0x6ae   :  { %v7820_v8 = vadd.f32 %v1850_v5, %v1607_v4 }
 0x6b1   :  { %v1863_v35 = vpop.f32.mrf.mxu3 }
 0x6b2   :  { %v1878_v60 = vadd.f32 %v7812_v61, %v1863_v35 }
 0x6b3   :  { %v7822_v9 = vpop.f32.mrf.mxu2  ;;  %v1837_v12 = vpop.f32.mrf.mxu1 }
 0x6b4   :  { %v1852_v52 = vadd.f32 %v7822_v9, %v1837_v12  ;;  %v1883_v9 = vadd.f32 %v1878_v60, %v1635_v63  ;;  %v2160_v63 = vld [vmem:[#allocation29 + $0x18] sm:$0xff] }
 0x6b5   :  { %v1943_v10 = vpop.f32.mrf.mxu0 }
 0x6b6   :  { %v1884_v1 = vadd.f32 %v1852_v52, %v1609_v58  ;;  %v2163_v52 = vld [vmem:[#allocation29 + $0x30] sm:$0xff] }
 0x6b7   :  { %v2159_v58 = vld [vmem:[#allocation29 + $0x10] sm:$0xff] }
 0x6b9   :  { %v1865_v47 = vpop.f32.mrf.mxu3 }
 0x6ba   :  { %v1880_v23 = vadd.f32 %v7818_v6, %v1865_v47 }
 0x6bb   :  { %v1929_v11 = vpop.f32.mrf.mxu2 }
 0x6bd   :  { %v1945_v13 = vpop.f32.mrf.mxu0 }
 0x6be   :  { %v1949_v14 = vpack.c.bf16 %v1945_v13, %v1943_v10 }
 0x6c0   :  { %5278 = vmatmul.msk.bf16.vlgmr.msrb.gmra.mxu2 %vm941_vm5, %v1949_v14  ;;  %5279 = vmatmul.msk.bf16.vlgmr.msrb.gmra.mxu0 %vm941_vm5, %v1949_v14  ;;  %v1885_v14 = vadd.f32 %v1880_v23, %v1637_v30 }
 0x6c1   :  { %2328 = vmatpush.msrb.mxu0 %v2163_v52 }
 0x6c3   :  { %v1931_v57 = vpop.f32.mrf.mxu2 }
 0x6c4   :  { %v1948_v17 = vpack.c.bf16 %v1931_v57, %v1929_v11 }
 0x6c6   :  { %2081 = vmatmul.bf16.vlgmr.msra.gmra.mxu1 %v1948_v17  ;;  %2109 = vmatmul.bf16.vlgmr.msrb.gmra.mxu3 %v1948_v17 }
 0x6c7   :  { %2371 = vmatpush.msrb.mxu3 %v2163_v52  ;;  %v5400_v52 = vld [vmem:[#allocation32 + $0xb0] sm:$0xf] }
 0x73d   :  { %v2124_v51 = vpop.f32.mrf.mxu0 }
 0x743   :  { %v2082_v48 = vpop.f32.mrf.mxu1  ;;  %v2096_v62 = vpop.f32.mrf.mxu2 }
 0x744   :  { %v2097_v53 = vadd.f32 %v2096_v62, %v2082_v48 }
 0x746   :  { %v7842_v5 = vadd.f32 %v2097_v53, %v7820_v8  ;;  %v2126_v8 = vpop.f32.mrf.mxu0  ;;  %v2164_v53 = vld [vmem:[#allocation29 + $0x38] sm:$0xff] }
 0x747   :  { %2348 = vmatpush.msrb.mxu2 %v2164_v53 }
 0x748   :  { %v2186_v10 = vmul.f32 %v7842_v5, %v7842_v5 }
 0x749   :  { %v2110_v54 = vpop.f32.mrf.mxu3  ;;  %2349 = vmatpush.msrb.mxu2 %v2162_v55 }
 0x74a   :  { %v2125_v2 = vadd.f32 %v2124_v51, %v2110_v54  ;;  %v2161_v54 = vld [vmem:[#allocation29 + $0x20] sm:$0xff] }
 0x74b   :  { %v2084_v7 = vpop.f32.mrf.mxu1  ;;  %v2098_v40 = vpop.f32.mrf.mxu2  ;;  %2329 = vmatpush.msrb.mxu0 %v2161_v54  ;;  %2372 = vmatpush.msrb.mxu3 %v2161_v54 }
 0x74c   :  { %v2099_v4 = vadd.f32 %v2098_v40, %v2084_v7  ;;  %v7848_v31 = vadd.f32 %v2125_v2, %v1883_v9  ;;  %v2157_v7 = vld [vmem:[#allocation29] sm:$0xff]  ;;  %v2158_v40 = vld [vmem:[#allocation29 + $0x8] sm:$0xff]  ;;  %2350 = vmatpush.msrb.mxu2 %v2160_v63 }
 0x74d   :  { %2330 = vmatpush.msrb.mxu0 %v2159_v58  ;;  %2373 = vmatpush.msrb.mxu3 %v2159_v58  ;;  %v5362_v58 = vld [vmem:[#allocation32 + $0x68] sm:$0xf0] }
 0x74e   :  { %v7845_v56 = vadd.f32 %v2099_v4, %v1884_v1  ;;  %v2187_v59 = vmul.f32 %v7848_v31, %v7848_v31  ;;  %v2176_v18 = vsel %vm941_vm5, %v7848_v31, 0.0  ;;  %2351 = vmatpush.msrb.mxu2 %v2158_v40 }
 0x74f   :  { %2331 = vmatpush.msrb.mxu0 %v2157_v7  ;;  %2374 = vmatpush.msrb.mxu3 %v2157_v7  ;;  %v6075_v7 = vld [vmem:[#allocation32 + $0x54] sm:$0xf0] }
 0x750   :  { %v2168_v34 = vsel %vm2167_vm11, %v7845_v56, 0.0  ;;  %v2188_v61 = vmul.f32 %v7845_v56, %v7845_v56  ;;  %v2198_v26 = vsel %vm941_vm5, %v2187_v59, 0.0  ;;  %v2166_v59 = vld [vmem:[%s8231_s27] sm:$0x1] }
 0x751   :  { %v2169_v11 = vadd.f32 %v2168_v34, %v7842_v5  ;;  %v2112_v13 = vpop.f32.mrf.mxu3 }
 0x752   :  { %v2190_v6 = vsel %vm2167_vm11, %v2188_v61, 0.0  ;;  %v2127_v57 = vadd.f32 %v2126_v8, %v2112_v13 }
 0x753   :  { %v2170_v17 = vrot.slane %v2169_v11, 4  ;;  %v2191_v25 = vadd.f32 %v2190_v6, %v2186_v10 }
 0x754   :  { %v7858_v27 = vadd.f32 %v2127_v57, %v1885_v14  ;;  %v2165_v57 = vld [vmem:[%s8230_s8] sm:$0x1] }
 0x755   :  { %v2171_v15 = vadd.f32 %v2170_v17, %v2169_v11  ;;  %v2192_v16 = vrot.slane %v2191_v25, 4 }
 0x756   :  { %v2178_v19 = vsel %vm2177_vm12, %v7858_v27, 0.0  ;;  %v2189_v20 = vmul.f32 %v7858_v27, %v7858_v27 }
 0x757   :  { %v2179_v21 = vadd.f32 %v2178_v19, %v2176_v18  ;;  %v2172_v22 = vrot.slane %v2171_v15, 2  ;;  %v2193_v24 = vadd.f32 %v2192_v16, %v2191_v25 }
 0x758   :  { %v2199_v28 = vsel %vm2177_vm12, %v2189_v20, 0.0 }
 0x759   :  { %v2180_v29 = vrot.slane %v2179_v21, 4  ;;  %v2200_v32 = vadd.f32 %v2199_v28, %v2198_v26  ;;  %v2173_v33 = vadd.f32 %v2172_v22, %v2171_v15  ;;  %v2194_v35 = vrot.slane %v2193_v24, 2 }
 0x75b   :  { %v2181_v36 = vadd.f32 %v2180_v29, %v2179_v21  ;;  %v2201_v37 = vrot.slane %v2200_v32, 4  ;;  %v2174_v38 = vrot.slane %v2173_v33, 1  ;;  %v2195_v39 = vadd.f32 %v2194_v35, %v2193_v24 }
 0x75d   :  { %v2182_v12 = vrot.slane %v2181_v36, 2  ;;  %v2202_v41 = vadd.f32 %v2201_v37, %v2200_v32  ;;  %v2175_v42 = vadd.f32 %v2174_v38, %v2173_v33  ;;  %v2196_v43 = vrot.slane %v2195_v39, 1 }
 0x75f   :  { %v2183_v44 = vadd.f32 %v2182_v12, %v2181_v36  ;;  %v2203_v46 = vrot.slane %v2202_v41, 2  ;;  %2226 = vmatmul.f32.vlgmr.msra.gmra.mxu2 %v2175_v42  ;;  %v2197_v47 = vadd.f32 %v2196_v43, %v2195_v39  ;;  %v5368_v42 = vld [vmem:[#allocation32 + $0x70] sm:$0xf]  ;;  %v6079_v43 = vld [vmem:[#allocation32 + $0x74] sm:$0xf0] }
 0x761   :  { %2270 = vmatmul.f32.vlgmr.msrb.gmra.mxu1 %v2197_v47  ;;  %v2184_v3 = vrot.slane %v2183_v44, 1  ;;  %v2204_v45 = vadd.f32 %v2203_v46, %v2202_v41  ;;  %v6078_v47 = vld [vmem:[#allocation32 + $0x74] sm:$0xf] }
 0x763   :  { %v2185_v48 = vadd.f32 %v2184_v3, %v2183_v44  ;;  %v2205_v62 = vrot.slane %v2204_v45, 1 }
 0x765   :  { %5280 = vmatmul.msk.f32.vlgmr.msra.gmra.mxu0 %vm941_vm5, %v2185_v48  ;;  %v2206_v49 = vadd.f32 %v2205_v62, %v2204_v45  ;;  %v6088_v45 = vld [vmem:[#allocation37] sm:$0xff]  ;;  %v5369_v48 = vor.u32 %v6079_v43, %v5368_v42  ;;  %v5360_v62 = vld [vmem:[#allocation32 + $0x60] sm:$0xf] }
 0x766   :  { %2391 = vmatpush.msra.mxu0 %v2164_v53  ;;  %v6087_v53 = vld [vmem:[#allocation32 + $0xb4] sm:$0xf0]  ;;  %v5320_v43 = vld [vmem:[#allocation32 + $0x10] sm:$0xf] }
 0x767   :  { %5281 = vmatmul.msk.f32.vlgmr.msra.gmra.mxu3 %vm941_vm5, %v2206_v49  ;;  %v6077_v49 = vld [vmem:[#allocation32 + $0x64] sm:$0xf0]  ;;  %v5401_v54 = vor.u32 %v6087_v53, %v5400_v52  ;;  %v6049_v52 = vld [vmem:[#allocation31 + $0x54] sm:$0xf0] }
 0x768   :  { %2392 = vmatpush.msra.mxu0 %v2162_v55  ;;  %v6076_v55 = vld [vmem:[#allocation32 + $0x64] sm:$0xf] }
 0x76a   :  { %2393 = vmatpush.msra.mxu0 %v2160_v63  ;;  %v5352_v63 = vld [vmem:[#allocation32 + $0x50] sm:$0xf] }
 0x76c   :  { %2394 = vmatpush.msra.mxu0 %v2158_v40  ;;  %v5365_v40 = vor.u32 %v6076_v55, %v5362_v58  ;;  %v6047_v55 = vld [vmem:[#allocation31 + $0x44] sm:$0xf0] }
 0x7de   :  { %v2271_v1 = vpop.f32.mrf.mxu1 }
 0x7e2   :  { %v2227_v50 = vpop.f32.mrf.mxu2  ;;  %v2247_v51 = vpop.f32.mrf.mxu0 }
 0x7e3   :  { %v2248_v60 = vadd.f32 %v2247_v51, %v2227_v50 }
 0x7e5   :  { %v2250_v0 = vmul.f32 0.013888889, %v2248_v60  ;;  %v5361_v60 = vor.u32 %v6077_v49, %v5360_v62  ;;  %v6051_v62 = vld [vmem:[#allocation31 + $0x64] sm:$0xf0] }
 0x7e7   :  { %v2295_v9 = vmul.f32 %v2250_v0, %v2250_v0 }
 0x7ea   :  { %v2291_v2 = vpop.f32.mrf.mxu3 }
 0x7eb   :  { %v2292_v4 = vadd.f32 %v2291_v2, %v2271_v1  ;;  %v6085_v1 = vld [vmem:[#allocation32 + $0xa4] sm:$0xf0]  ;;  %v6074_v2 = vld [vmem:[#allocation32 + $0x54] sm:$0xf] }
 0x7ed   :  { %v2294_v23 = vmul.f32 0.013888889, %v2292_v4 }
 0x7ef   :  { %v2296_v30 = vsub.f32 %v2294_v23, %v2295_v9  ;;  %v5354_v9 = vld [vmem:[#allocation32 + $0x58] sm:$0xf0]  ;;  %v5353_v23 = vor.u32 %v6075_v7, %v5352_v63  ;;  %v5394_v63 = vld [vmem:[#allocation32 + $0xa8] sm:$0xf0]  ;;  %v5436_v7 = vld [vmem:[#allocation31 + $0x30] sm:$0xf] }
 0x7f1   :  { %v2297_v34 = vmax.f32 %v2296_v30, 0.0  ;;  %v5344_v30 = vld [vmem:[#allocation32 + $0x40] sm:$0xf] }
 0x7f3   :  { %v2298_v61 = vadd.f32 1e-05, %v2297_v34  ;;  %v6073_v34 = vld [vmem:[#allocation32 + $0x44] sm:$0xf0] }
 0x7f5   :  { %6265 = vrsqrt.f32 %v2298_v61  ;;  %vm2305_vm14 = vweird.f32 %v2298_v61 }
 0x7fb   :  { %v6266_v10 = vpop.eup %6265 }
 0x7fc   :  { %v2300_v8 = vmul.f32 %v6266_v10, %v2298_v61  ;;  %vm2306_vm13 = vweird.f32 %v6266_v10  ;;  %v5357_v61 = vor.u32 %v6074_v2, %v5354_v9  ;;  %v6068_v2 = vld [vmem:[#allocation32 + $0x24] sm:$0xf]  ;;  %v5492_v9 = vld [vmem:[#allocation31 + $0xa0] sm:$0xf] }
 0x7fd   :  { %vm2307_vm15 = vmor %vm2305_vm14, %vm2306_vm13 }
 0x7fe   :  { %v2301_v11 = vmul.f32 %v6266_v10, %v2300_v8  ;;  %v6083_v8 = vld [vmem:[#allocation32 + $0x94] sm:$0xf0] }
 0x800   :  { %v2302_v13 = vmul.f32 0.5, %v2301_v11  ;;  %v6072_v11 = vld [vmem:[#allocation32 + $0x44] sm:$0xf] }
 0x802   :  { %v2303_v14 = vsub.f32 1.5, %v2302_v13 }
 0x804   :  { %v2304_v6 = vmul.f32 %v6266_v10, %v2303_v14  ;;  %v5346_v14 = vld [vmem:[#allocation32 + $0x48] sm:$0xf0] }
 0x806   :  { %v2308_v17 = vsel %vm2307_vm15, %v6266_v10, %v2304_v6  ;;  %v5384_v10 = vld [vmem:[#allocation32 + $0x90] sm:$0xf]  ;;  %v6086_v6 = vld [vmem:[#allocation32 + $0xb4] sm:$0xf] }
 0x807   :  { %v2309_v25 = vmul.f32 %v2308_v17, %v2165_v57  ;;  %v5385_v13 = vor.u32 %v6083_v8, %v5384_v10  ;;  %v5402_v57 = vld [vmem:[#allocation32 + $0xb8] sm:$0xf0]  ;;  %v5304_v17 = vld [vmem:[#allocation37 + $0x8] sm:$0xf]  ;;  %v5428_v8 = vld [vmem:[#allocation31 + $0x20] sm:$0xf] }
 0x808   :  { %v5386_v10 = vld [vmem:[#allocation32 + $0x98] sm:$0xf0] }
 0x809   :  { %5282 = vmatmul.msk.f32.vlgmr.msrb.gmra.mxu0 %vm2312_vm0, %v2309_v25  ;;  %5283 = vmatmul.msk.f32.vlgmr.msrb.gmra.mxu2 %vm2312_vm0, %v2309_v25  ;;  %v2310_v15 = vmul.f32 %v2309_v25, %v2250_v0  ;;  %v5392_v0 = vld [vmem:[#allocation32 + $0xa0] sm:$0xf]  ;;  %v6089_v25 = vld [vmem:[#allocation37 + $0x8] sm:$0x10] }
 0x80a   :  { %v5393_v4 = vor.u32 %v6085_v1, %v5392_v0  ;;  %v6045_v0 = vld [vmem:[#allocation31 + $0x34] sm:$0xf0] }
 0x80b   :  { %v2311_v16 = vsub.f32 %v2166_v59, %v2310_v15  ;;  %v5292_v59 = vld [vmem:[#allocation35 + $0x8] sm:$0xf]  ;;  %v5405_v15 = vor.u32 %v6086_v6, %v5402_v57  ;;  %v5437_v1 = vor.u32 %v6045_v0, %v5436_v7  ;;  %v5322_v6 = vld [vmem:[#allocation32 + $0x18] sm:$0xf0]  ;;  %v6040_v0 = vld [vmem:[#allocation31 + $0x14] sm:$0xf] }
 0x80d   :  { %5284 = vmatmul.msk.f32.vlgmr.msrb.gmra.mxu3 %vm2312_vm0, %v2311_v16 }
 0x811   :  { %5285 = vmatmul.msk.f32.vlgmr.msra.gmra.mxu0 %vm2312_vm0, %v2311_v16  ;;  %v6063_v16 = vld [vmem:[#allocation35 + $0x8] sm:$0x10] }
 0x886   :  { %v2333_v18 = vpop.f32.mrf.mxu0 }
 0x887   :  { %v2399_v19 = vperm.slane %v2333_v18, 0  ;;  %v5345_v18 = vor.u32 %v6073_v34, %v5344_v30  ;;  %v6059_v30 = vld [vmem:[#allocation31 + $0xa4] sm:$0xf0] }
 0x888   :  { %v5493_v34 = vor.u32 %v6059_v30, %v5492_v9  ;;  %v6054_v9 = vld [vmem:[#allocation31 + $0x84] sm:$0xf] }
 0x889   :  { %v2401_v29 = vmul.f32 %v2399_v19, %v7842_v5  ;;  %v2403_v33 = vmul.f32 %v2399_v19, %v7845_v56  ;;  %v6062_v56 = vld [vmem:[#allocation35] sm:$0xff]  ;;  %v5336_v19 = vld [vmem:[#allocation32 + $0x30] sm:$0xf] }
 0x88c   :  { %v2353_v20 = vpop.f32.mrf.mxu2 }
 0x88d   :  { %v2400_v21 = vperm.slane %v2353_v20, 0  ;;  %v6071_v20 = vld [vmem:[#allocation32 + $0x34] sm:$0xf0] }
 0x88e   :  { %v2396_v22 = vpop.f32.mrf.mxu0 }
 0x88f   :  { %v2402_v24 = vmul.f32 %v2400_v21, %v7848_v31  ;;  %v2404_v26 = vmul.f32 %v2400_v21, %v7858_v27  ;;  %v2406_v28 = vperm.slane %v2396_v22, 0  ;;  %v5370_v27 = vld [vmem:[#allocation32 + $0x78] sm:$0xf0]  ;;  %v5349_v21 = vor.u32 %v6072_v11, %v5346_v14  ;;  %v5376_v22 = vld [vmem:[#allocation32 + $0x80] sm:$0xf] }
 0x890   :  { %v2376_v32 = vpop.f32.mrf.mxu3  ;;  %v5373_v50 = vor.u32 %v6078_v47, %v5370_v27  ;;  %v6065_v47 = vld [vmem:[#allocation32 + $0x4] sm:$0xf0]  ;;  %v5468_v27 = vld [vmem:[#allocation31 + $0x70] sm:$0xf]  ;;  %v6066_v14 = vld [vmem:[#allocation32 + $0x14] sm:$0xf] }
 0x891   :  { %v2408_v35 = vadd.f32 %v2406_v28, %v2402_v24  ;;  %v2410_v36 = vadd.f32 %v2406_v28, %v2404_v26  ;;  %v2405_v37 = vperm.slane %v2376_v32, 0  ;;  %v6081_v24 = vld [vmem:[#allocation32 + $0x84] sm:$0xf0]  ;;  %v6070_v26 = vld [vmem:[#allocation32 + $0x34] sm:$0xf]  ;;  %v5305_v32 = vor.u32 %v6089_v25, %v5304_v17 }
 0x892   :  { %v5377_v28 = vor.u32 %v6081_v24, %v5376_v22  ;;  %v5325_v17 = vor.u32 %v6066_v14, %v5322_v6  ;;  %v5484_v25 = vld [vmem:[#allocation31 + $0x90] sm:$0xf]  ;;  %v6064_v24 = vld [vmem:[#allocation32 + $0x4] sm:$0xf] }
 0x893   :  { %v2412_v38 = vmax.f32 %v2408_v35, 0.0  ;;  %v2414_v39 = vmax.f32 %v2410_v36, 0.0  ;;  %v2407_v12 = vadd.f32 %v2405_v37, %v2401_v29  ;;  %v2409_v41 = vadd.f32 %v2405_v37, %v2403_v33  ;;  %v5338_v29 = vld [vmem:[#allocation32 + $0x38] sm:$0xf0]  ;;  %v5500_v35 = vld [vmem:[#allocation31 + $0xb0] sm:$0xf] }
 0x894   :  { %v5293_v33 = vor.u32 %v6063_v16, %v5292_v59  ;;  %v6061_v36 = vld [vmem:[#allocation31 + $0xb4] sm:$0xf0]  ;;  %v5337_v37 = vor.u32 %v6071_v20, %v5336_v19  ;;  %v6080_v16 = vld [vmem:[#allocation32 + $0x84] sm:$0xf]  ;;  %v5420_v19 = vld [vmem:[#allocation31 + $0x10] sm:$0xf] }
 0x895   :  { %v2411_v44 = vmax.f32 %v2407_v12, 0.0  ;;  %v2413_v46 = vmax.f32 %v2409_v41, 0.0  ;;  %v2416_v31 = vpack.c.bf16 %v2414_v39, %v2412_v38  ;;  %v5341_v38 = vor.u32 %v6070_v26, %v5338_v29  ;;  %v5328_v39 = vld [vmem:[#allocation32 + $0x20] sm:$0xf]  ;;  %v6069_v12 = vld [vmem:[#allocation32 + $0x24] sm:$0xf0] }
 0x896   :  { %v5501_v41 = vor.u32 %v6061_v36, %v5500_v35  ;;  %v5329_v42 = vor.u32 %v6069_v12, %v5328_v39  ;;  %v6057_v59 = vld [vmem:[#allocation31 + $0x94] sm:$0xf0]  ;;  %v5314_v26 = vld [vmem:[#allocation32 + $0x8] sm:$0xf0]  ;;  %v5412_v35 = vld [vmem:[#allocation31] sm:$0xf] }
 0x897   :  { %v2415_v3 = vpack.c.bf16 %v2413_v46, %v2411_v44  ;;  %v7875_v5 = vsel %vm909_vm4, %v2416_v31, 0  ;;  %v6067_v44 = vld [vmem:[#allocation32 + $0x14] sm:$0xf0]  ;;  %v5312_v31 = vld [vmem:[#allocation32] sm:$0xf]  ;;  %v5317_v29 = vor.u32 %v6064_v24, %v5314_v26 }
 0x898   :  { %2494 = vmatpush.bf16.msra.mxu3 %v7875_v5  ;;  %2580 = vmatpush.bf16.msra.mxu1 %v7875_v5  ;;  %v5321_v46 = vor.u32 %v6067_v44, %v5320_v43  ;;  %v6039_v36 = vld [vmem:[#allocation31 + $0x4] sm:$0xf0]  ;;  %v5470_v39 = vld [vmem:[#allocation31 + $0x78] sm:$0xf0]  ;;  %v6048_v44 = vld [vmem:[#allocation31 + $0x54] sm:$0xf] }
 0x899   :  { %v7880_v51 = vsel %vm909_vm4, %v2415_v3, 0  ;;  %v6053_v3 = vld [vmem:[#allocation31 + $0x74] sm:$0xf0]  ;;  %vm3339_vm4 = vcmask 654336  }
 0x89a   :  { %2475 = vmatpush.bf16.msra.mxu2 %v7880_v51  ;;  %2561 = vmatpush.bf16.msrb.mxu0 %v7880_v51 }
 0x89b   :  { %5308 = vmatmul.msk.bf16.vlgmr.msra.gmra.mxu1 %vm2455_vm1, %v6088_v45  ;;  %5296 = vmatmul.msk.bf16.vlgmr.msra.gmra.mxu3 %vm2455_vm1, %v6062_v56 }
 0x89c   :  { %2745 = vmatpush.bf16.msrb.mxu3 %v5401_v54  ;;  %2783 = vmatpush.bf16.msrb.mxu1 %v5405_v15  ;;  %v5444_v54 = vld [vmem:[#allocation31 + $0x40] sm:$0xf]  ;;  %v5485_v15 = vor.u32 %v6057_v59, %v5484_v25 }
 0x89d   :  { %5306 = vmatmul.msk.bf16.vlgmr.msrb.gmra.mxu0 %vm2455_vm1, %v6088_v45  ;;  %5294 = vmatmul.msk.bf16.vlgmr.msra.gmra.mxu2 %vm2455_vm1, %v6062_v56  ;;  %v5313_v45 = vor.u32 %v6065_v47, %v5312_v31  ;;  %v5469_v56 = vor.u32 %v6053_v3, %v5468_v27  ;;  %v5445_v58 = vor.u32 %v6047_v55, %v5444_v54  ;;  %v6046_v47 = vld [vmem:[#allocation31 + $0x44] sm:$0xf]  ;;  %v5446_v27 = vld [vmem:[#allocation31 + $0x48] sm:$0xf0] }
 0x89e   :  { %2722 = vmatpush.bf16.msrb.mxu2 %v5369_v48  ;;  %2760 = vmatpush.bf16.msra.mxu0 %v5373_v50  ;;  %v5460_v48 = vld [vmem:[#allocation31 + $0x60] sm:$0xf]  ;;  %v5452_v50 = vld [vmem:[#allocation31 + $0x50] sm:$0xf]  ;;  %v5449_v3 = vor.u32 %v6046_v47, %v5446_v27  ;;  %v6042_v54 = vld [vmem:[#allocation31 + $0x24] sm:$0xf] }
 0x89f   :  { %v5461_v49 = vor.u32 %v6051_v62, %v5460_v48  ;;  %v5453_v53 = vor.u32 %v6049_v52, %v5452_v50  ;;  %v6044_v62 = vld [vmem:[#allocation31 + $0x34] sm:$0xf]  ;;  %v6058_v52 = vld [vmem:[#allocation31 + $0xa4] sm:$0xf] }
 0x8a0   :  { %2746 = vmatpush.bf16.msrb.mxu3 %v5393_v4  ;;  %v5330_v4 = vld [vmem:[#allocation32 + $0x28] sm:$0xf0] }
 0x8a2   :  { %2723 = vmatpush.bf16.msrb.mxu2 %v5361_v60  ;;  %2761 = vmatpush.bf16.msra.mxu0 %v5365_v40  ;;  %v6084_v60 = vld [vmem:[#allocation32 + $0xa4] sm:$0xf] }
 0x8a3   :  { %v5397_v40 = vor.u32 %v6084_v60, %v5394_v63  ;;  %v6056_v60 = vld [vmem:[#allocation31 + $0x94] sm:$0xf]  ;;  %v5486_v63 = vld [vmem:[#allocation31 + $0x98] sm:$0xf0] }
 0x8a4   :  { %2747 = vmatpush.bf16.msrb.mxu3 %v5385_v13  ;;  %v6043_v13 = vld [vmem:[#allocation31 + $0x24] sm:$0xf0] }
 0x8a5   :  { %2784 = vmatpush.bf16.msrb.mxu1 %v5397_v40  ;;  %v5429_v57 = vor.u32 %v6043_v13, %v5428_v8 }
 0x8a6   :  { %2724 = vmatpush.bf16.msrb.mxu2 %v5353_v23  ;;  %2762 = vmatpush.bf16.msra.mxu0 %v5357_v61  ;;  %v5333_v23 = vor.u32 %v6068_v2, %v5330_v4  ;;  %v6082_v61 = vld [vmem:[#allocation32 + $0x94] sm:$0xf]  ;;  %v5489_v2 = vor.u32 %v6056_v60, %v5486_v63  ;;  %v5574_v63 = vld [vmem:[#allocation34 + $0x68] sm:$0xf0] }
 0x8a7   :  { %v5389_v11 = vor.u32 %v6082_v61, %v5386_v10  ;;  %v6038_v61 = vld [vmem:[#allocation31 + $0x4] sm:$0xf]  ;;  %v5414_v10 = vld [vmem:[#allocation31 + $0x8] sm:$0xf0] }
 0x8a8   :  { %2748 = vmatpush.bf16.msrb.mxu3 %v5377_v28  ;;  %v5476_v28 = vld [vmem:[#allocation31 + $0x80] sm:$0xf] }
 0x8a9   :  { %2785 = vmatpush.bf16.msrb.mxu1 %v5389_v11  ;;  %v5417_v11 = vor.u32 %v6038_v61, %v5414_v10  ;;  %v5614_v61 = vld [vmem:[#allocation34 + $0xb8] sm:$0xf0] }
 0x8aa   :  { %2725 = vmatpush.bf16.msrb.mxu2 %v5345_v18  ;;  %2763 = vmatpush.bf16.msra.mxu0 %v5349_v21  ;;  %v5378_v18 = vld [vmem:[#allocation32 + $0x88] sm:$0xf0]  ;;  %v6041_v21 = vld [vmem:[#allocation31 + $0x14] sm:$0xf0]  ;;  %v5566_v10 = vld [vmem:[#allocation34 + $0x58] sm:$0xf0] }
 0x8ab   :  { %5309 = vmatmul.msk.bf16.gmra.mxu1 %vm2455_vm1, %v5305_v32  ;;  %5297 = vmatmul.msk.bf16.gmra.mxu3 %vm2455_vm1, %v5293_v33  ;;  %v5381_v20 = vor.u32 %v6080_v16, %v5378_v18  ;;  %v5421_v22 = vor.u32 %v6041_v21, %v5420_v19 }
 0x8ac   :  { %2947 = vmatpush.bf16.msra.mxu3 %v5501_v41  ;;  %v6050_v41 = vld [vmem:[#allocation31 + $0x64] sm:$0xf] }
 0x8ad   :  { %5307 = vmatmul.msk.bf16.gmra.mxu0 %vm2455_vm1, %v5305_v32  ;;  %5295 = vmatmul.msk.bf16.gmra.mxu2 %vm2455_vm1, %v5293_v33  ;;  %v6055_v32 = vld [vmem:[#allocation31 + $0x84] sm:$0xf0] }
 0x8ae   :  { %2726 = vmatpush.bf16.msrb.mxu2 %v5337_v37  ;;  %2764 = vmatpush.bf16.msra.mxu0 %v5341_v38  ;;  %v5477_v33 = vor.u32 %v6055_v32, %v5476_v28  ;;  %v5413_v37 = vor.u32 %v6039_v36, %v5412_v35  ;;  %v6052_v38 = vld [vmem:[#allocation31 + $0x74] sm:$0xf]  ;;  %v5516_v35 = vld [vmem:[#allocation38 + $0x8] sm:$0xf]  ;;  %v6115_v36 = vld [vmem:[#allocation38 + $0x8] sm:$0x10] }
 0x8af   :  { %2786 = vmatpush.bf16.msrb.mxu1 %v5381_v20  ;;  %v5473_v12 = vor.u32 %v6052_v38, %v5470_v39 }
 0x8b0   :  { %2948 = vmatpush.bf16.msra.mxu3 %v5493_v34 }
 0x8b2   :  { %2727 = vmatpush.bf16.msrb.mxu2 %v5329_v42  ;;  %2765 = vmatpush.bf16.msra.mxu0 %v5333_v23  ;;  %v5462_v42 = vld [vmem:[#allocation31 + $0x68] sm:$0xf0] }
 0x8b3   :  { %v5465_v43 = vor.u32 %v6050_v41, %v5462_v42  ;;  %v5478_v23 = vld [vmem:[#allocation31 + $0x88] sm:$0xf0] }
 0x8b4   :  { %2949 = vmatpush.bf16.msra.mxu3 %v5485_v15  ;;  %v5481_v34 = vor.u32 %v6054_v9, %v5478_v23  ;;  %v6113_v9 = vld [vmem:[#allocation34 + $0xb4] sm:$0xf0]  ;;  %v6112_v23 = vld [vmem:[#allocation34 + $0xb4] sm:$0xf] }
 0x8b6   :  { %2728 = vmatpush.bf16.msrb.mxu2 %v5321_v46  ;;  %2766 = vmatpush.bf16.msra.mxu0 %v5325_v17  ;;  %v5454_v46 = vld [vmem:[#allocation31 + $0x58] sm:$0xf0] }
 0x8b7   :  { %v5457_v31 = vor.u32 %v6048_v44, %v5454_v46 }
 0x8b8   :  { %2950 = vmatpush.bf16.msra.mxu3 %v5477_v33  ;;  %v6114_v33 = vld [vmem:[#allocation38] sm:$0xff] }
 0x8ba   :  { %2729 = vmatpush.bf16.msrb.mxu2 %v5313_v45  ;;  %2767 = vmatpush.bf16.msra.mxu0 %v5317_v29  ;;  %v6060_v45 = vld [vmem:[#allocation31 + $0xb4] sm:$0xf] }
 0x8be   :  { %2924 = vmatpush.bf16.msra.mxu2 %v5469_v56  ;;  %2962 = vmatpush.bf16.msrb.mxu0 %v5473_v12  ;;  %v5502_v56 = vld [vmem:[#allocation31 + $0xb8] sm:$0xf0] }
 0x8bf   :  { %v5505_v48 = vor.u32 %v6060_v45, %v5502_v56  ;;  %v5580_v45 = vld [vmem:[#allocation34 + $0x70] sm:$0xf]  ;;  %v6105_v56 = vld [vmem:[#allocation34 + $0x74] sm:$0xf0] }
 0x8c1   :  { %2985 = vmatpush.bf16.msra.mxu1 %v5505_v48  ;;  %v6104_v48 = vld [vmem:[#allocation34 + $0x74] sm:$0xf] }
 0x8c2   :  { %2925 = vmatpush.bf16.msra.mxu2 %v5461_v49  ;;  %2963 = vmatpush.bf16.msrb.mxu0 %v5465_v43  ;;  %v5438_v49 = vld [vmem:[#allocation31 + $0x38] sm:$0xf0] }
 0x8c3   :  { %v5441_v50 = vor.u32 %v6044_v62, %v5438_v49  ;;  %v5581_v49 = vor.u32 %v6105_v56, %v5580_v45  ;;  %v6108_v45 = vld [vmem:[#allocation34 + $0x94] sm:$0xf] }
 0x8c6   :  { %2926 = vmatpush.bf16.msra.mxu2 %v5453_v53  ;;  %2964 = vmatpush.bf16.msrb.mxu0 %v5457_v31  ;;  %v5494_v53 = vld [vmem:[#allocation31 + $0xa8] sm:$0xf0] }
 0x8c7   :  { %v5497_v55 = vor.u32 %v6058_v52, %v5494_v53 }
 0x8c9   :  { %2986 = vmatpush.bf16.msra.mxu1 %v5497_v55  ;;  %v6103_v55 = vld [vmem:[#allocation34 + $0x64] sm:$0xf0] }
 0x8ca   :  { %2927 = vmatpush.bf16.msra.mxu2 %v5445_v58  ;;  %2965 = vmatpush.bf16.msrb.mxu0 %v5449_v3  ;;  %v5430_v58 = vld [vmem:[#allocation31 + $0x28] sm:$0xf0] }
 0x8cb   :  { %v5433_v7 = vor.u32 %v6042_v54, %v5430_v58  ;;  %v5572_v54 = vld [vmem:[#allocation34 + $0x60] sm:$0xf]  ;;  %v6102_v58 = vld [vmem:[#allocation34 + $0x64] sm:$0xf] }
 0x8cc   :  { %v5573_v60 = vor.u32 %v6103_v55, %v5572_v54  ;;  %v6092_v55 = vld [vmem:[#allocation34 + $0x14] sm:$0xf] }
 0x8cd   :  { %2987 = vmatpush.bf16.msra.mxu1 %v5489_v2  ;;  %v6100_v2 = vld [vmem:[#allocation34 + $0x54] sm:$0xf] }
 0x8ce   :  { %2928 = vmatpush.bf16.msra.mxu2 %v5437_v1  ;;  %2966 = vmatpush.bf16.msrb.mxu0 %v5441_v50  ;;  %v5422_v1 = vld [vmem:[#allocation31 + $0x18] sm:$0xf0] }
 0x8cf   :  { %v5425_v30 = vor.u32 %v6040_v0, %v5422_v1  ;;  %v5582_v50 = vld [vmem:[#allocation34 + $0x78] sm:$0xf0]  ;;  %v5564_v0 = vld [vmem:[#allocation34 + $0x50] sm:$0xf]  ;;  %v6101_v1 = vld [vmem:[#allocation34 + $0x54] sm:$0xf0] }
 0x8d0   :  { %v5585_v52 = vor.u32 %v6104_v48, %v5582_v50  ;;  %v5598_v48 = vld [vmem:[#allocation34 + $0x98] sm:$0xf0]  ;;  %v6093_v50 = vld [vmem:[#allocation34 + $0x14] sm:$0xf0] }
 0x8d1   :  { %2988 = vmatpush.bf16.msra.mxu1 %v5481_v34 }
 0x8d2   :  { %2929 = vmatpush.bf16.msra.mxu2 %v5429_v57  ;;  %2967 = vmatpush.bf16.msrb.mxu0 %v5433_v7 }
 0x8d6   :  { %2930 = vmatpush.bf16.msra.mxu2 %v5421_v22  ;;  %2968 = vmatpush.bf16.msrb.mxu0 %v5425_v30  ;;  %v5565_v30 = vor.u32 %v6101_v1, %v5564_v0  ;;  %v6106_v0 = vld [vmem:[#allocation34 + $0x84] sm:$0xf] }
 0x8da   :  { %2931 = vmatpush.bf16.msra.mxu2 %v5413_v37  ;;  %2969 = vmatpush.bf16.msrb.mxu0 %v5417_v11  ;;  %v5517_v37 = vor.u32 %v6115_v36, %v5516_v35  ;;  %v5569_v11 = vor.u32 %v6100_v2, %v5566_v10  ;;  %v5540_v35 = vld [vmem:[#allocation34 + $0x20] sm:$0xf]  ;;  %v6095_v36 = vld [vmem:[#allocation34 + $0x24] sm:$0xf0]  ;;  %v5590_v2 = vld [vmem:[#allocation34 + $0x88] sm:$0xf0] }
 0x8db   :  { %v5526_v10 = vld [vmem:[#allocation34 + $0x8] sm:$0xf0] }
 0x918   :  { %v2582_v40 = vpop.f32.mrf.mxu1 }
 0x91a   :  { %v2563_v4 = vpop.f32.mrf.mxu0 }
 0x91e   :  { %v2496_v59 = vpop.f32.mrf.mxu3 }
 0x920   :  { %v2584_v8 = vpop.f32.mrf.mxu1  ;;  %v2477_v18 = vpop.f32.mrf.mxu2 }
 0x921   :  { %v2593_v13 = vpack.c.bf16 %v2584_v8, %v2582_v40  ;;  %v5577_v40 = vor.u32 %v6102_v58, %v5574_v63  ;;  %v5617_v8 = vor.u32 %v6112_v23, %v5614_v61  ;;  %v5534_v58 = vld [vmem:[#allocation34 + $0x18] sm:$0xf0]  ;;  %v5588_v63 = vld [vmem:[#allocation34 + $0x80] sm:$0xf] }
 0x922   :  { %v2565_v14 = vpop.f32.mrf.mxu0  ;;  %v5524_v23 = vld [vmem:[#allocation34] sm:$0xf] }
 0x923   :  { %v2592_v6 = vpack.c.bf16 %v2565_v14, %v2563_v4  ;;  %5406 = vmatmul.msk.bf16.vlgmr.msrb.gmra.mxu3 %vm941_vm5, %v2593_v13  ;;  %5408 = vmatmul.msk.bf16.vlgmr.msrb.gmra.mxu1 %vm941_vm5, %v2593_v13  ;;  %v5612_v4 = vld [vmem:[#allocation34 + $0xb0] sm:$0xf]  ;;  %v5556_v14 = vld [vmem:[#allocation34 + $0x40] sm:$0xf] }
 0x924   :  { %3070 = vmatpush.bf16.msrb.mxu3 %v7875_v5  ;;  %v5613_v34 = vor.u32 %v6113_v9, %v5612_v4  ;;  %v5593_v9 = vor.u32 %v6106_v0, %v5590_v2  ;;  %v3299_v0 = vld [vmem:[#allocation40 + $0x18] sm:$0xff] }
 0x925   :  { %2730 = vmatmul.bf16.vlgmr.msrb.gmra.mxu2 %v2592_v6  ;;  %2768 = vmatmul.bf16.vlgmr.msra.gmra.mxu0 %v2592_v6  ;;  %v6099_v6 = vld [vmem:[#allocation34 + $0x44] sm:$0xf0] }
 0x926   :  { %3051 = vmatpush.bf16.msrb.mxu2 %v7880_v51  ;;  %v2498_v5 = vpop.f32.mrf.mxu3  ;;  %3212 = vmatpush.bf16.msra.mxu0 %v5581_v49  ;;  %v5532_v49 = vld [vmem:[#allocation34 + $0x10] sm:$0xf] }
 0x927   :  { %v2507_v21 = vpack.c.bf16 %v2498_v5, %v2496_v59  ;;  %3235 = vmatpush.bf16.msrb.mxu1 %v5613_v34  ;;  %v6096_v5 = vld [vmem:[#allocation34 + $0x34] sm:$0xf]  ;;  %v5533_v54 = vor.u32 %v6093_v50, %v5532_v49  ;;  %v6090_v34 = vld [vmem:[#allocation34 + $0x4] sm:$0xf]  ;;  %v3305_v50 = vld [vmem:[#allocation40 + $0x48] sm:$0xff] }
 0x928   :  { %v2587_v57 = vpop.f32.mrf.mxu1  ;;  %v2479_v20 = vpop.f32.mrf.mxu2 }
 0x929   :  { %v2506_v22 = vpack.c.bf16 %v2479_v20, %v2477_v18  ;;  %v5548_v18 = vld [vmem:[#allocation34 + $0x30] sm:$0xf]  ;;  %v5604_v20 = vld [vmem:[#allocation34 + $0xa0] sm:$0xf] }
 0x92a   :  { %v2568_v17 = vpop.f32.mrf.mxu0  ;;  %3213 = vmatpush.bf16.msra.mxu0 %v5573_v60  ;;  %v5537_v60 = vor.u32 %v6092_v55, %v5534_v58  ;;  %v3302_v55 = vld [vmem:[#allocation40 + $0x30] sm:$0xff] }
 0x92e   :  { %v2501_v51 = vpop.f32.mrf.mxu3  ;;  %3214 = vmatpush.bf16.msra.mxu0 %v5565_v30  ;;  %v6091_v30 = vld [vmem:[#allocation34 + $0x4] sm:$0xf0] }
 0x92f   :  { %v5525_v61 = vor.u32 %v6091_v30, %v5524_v23  ;;  %v3296_v30 = vld [vmem:[#allocation40] sm:$0xff] }
 0x930   :  { %v2589_v25 = vpop.f32.mrf.mxu1  ;;  %v2482_v24 = vpop.f32.mrf.mxu2 }
 0x931   :  { %v2595_v15 = vpack.c.bf16 %v2589_v25, %v2587_v57  ;;  %v6098_v57 = vld [vmem:[#allocation34 + $0x44] sm:$0xf]  ;;  %v5558_v25 = vld [vmem:[#allocation34 + $0x48] sm:$0xf0] }
 0x932   :  { %v2570_v16 = vpop.f32.mrf.mxu0 }
 0x933   :  { %v2594_v19 = vpack.c.bf16 %v2570_v16, %v2568_v17  ;;  %5407 = vmatmul.msk.bf16.gmra.mxu3 %vm941_vm5, %v2595_v15  ;;  %5409 = vmatmul.msk.bf16.gmra.mxu1 %vm941_vm5, %v2595_v15  ;;  %v5557_v17 = vor.u32 %v6099_v6, %v5556_v14  ;;  %v5561_v15 = vor.u32 %v6098_v57, %v5558_v25 }
 0x935   :  { %2735 = vmatmul.bf16.gmra.mxu2 %v2594_v19  ;;  %2773 = vmatmul.bf16.gmra.mxu0 %v2594_v19  ;;  %v6097_v19 = vld [vmem:[#allocation34 + $0x34] sm:$0xf0] }
 0x936   :  { %v2503_v26 = vpop.f32.mrf.mxu3  ;;  %3215 = vmatpush.bf16.msra.mxu0 %v5557_v17 }
 0x937   :  { %v2509_v29 = vpack.c.bf16 %v2503_v26, %v2501_v51  ;;  %v5549_v51 = vor.u32 %v6097_v19, %v5548_v18  ;;  %v5606_v26 = vld [vmem:[#allocation34 + $0xa8] sm:$0xf0] }
 0x938   :  { %v2484_v28 = vpop.f32.mrf.mxu2 }
 0x939   :  { %v2508_v32 = vpack.c.bf16 %v2484_v28, %v2482_v24  ;;  %v5550_v28 = vld [vmem:[#allocation34 + $0x38] sm:$0xf0] }
 0x93a   :  { %3216 = vmatpush.bf16.msra.mxu0 %v5549_v51 }
 0x943   :  { %5506 = vmatmul.msk.bf16.vlgmr.msra.gmra.mxu3 %vm941_vm5, %v2507_v21  ;;  %5508 = vmatmul.msk.bf16.vlgmr.msra.gmra.mxu1 %vm941_vm5, %v2507_v21  ;;  %v6111_v21 = vld [vmem:[#allocation34 + $0xa4] sm:$0xf0] }
 0x944   :  { %3273 = vmatpush.bf16.msra.mxu3 %v5617_v8  ;;  %v5605_v24 = vor.u32 %v6111_v21, %v5604_v20 }
 0x945   :  { %2932 = vmatmul.bf16.vlgmr.msra.gmra.mxu2 %v2506_v22  ;;  %2970 = vmatmul.bf16.vlgmr.msrb.gmra.mxu0 %v2506_v22  ;;  %v6110_v22 = vld [vmem:[#allocation34 + $0xa4] sm:$0xf] }
 0x946   :  { %3250 = vmatpush.bf16.msra.mxu2 %v5585_v52  ;;  %3236 = vmatpush.bf16.msrb.mxu1 %v5605_v24  ;;  %v5601_v52 = vor.u32 %v6108_v45, %v5598_v48  ;;  %v3307_v45 = vld [vmem:[#allocation40 + $0x58] sm:$0xff]  ;;  %v3306_v48 = vld [vmem:[#allocation40 + $0x50] sm:$0xff] }
 0x94a   :  { %3251 = vmatpush.bf16.msra.mxu2 %v5577_v40  ;;  %v6107_v40 = vld [vmem:[#allocation34 + $0x84] sm:$0xf0] }
 0x94b   :  { %v5589_v1 = vor.u32 %v6107_v40, %v5588_v63  ;;  %v3300_v40 = vld [vmem:[#allocation40 + $0x20] sm:$0xff] }
 0x94e   :  { %3252 = vmatpush.bf16.msra.mxu2 %v5569_v11  ;;  %v5529_v11 = vor.u32 %v6090_v34, %v5526_v10  ;;  %v3320_v34 = vld [vmem:[#allocation40 + $0xc0] sm:$0xff] }
 0x952   :  { %3253 = vmatpush.bf16.msra.mxu2 %v5561_v15 }
 0x953   :  { %5507 = vmatmul.msk.bf16.gmra.mxu3 %vm941_vm5, %v2509_v29  ;;  %5509 = vmatmul.msk.bf16.gmra.mxu1 %vm941_vm5, %v2509_v29  ;;  %v5609_v29 = vor.u32 %v6110_v22, %v5606_v26 }
 0x955   :  { %2937 = vmatmul.bf16.gmra.mxu2 %v2508_v32  ;;  %2975 = vmatmul.bf16.gmra.mxu0 %v2508_v32  ;;  %v5553_v32 = vor.u32 %v6096_v5, %v5550_v28 }
 0x956   :  { %3274 = vmatpush.bf16.msra.mxu3 %v5609_v29 }
 0x957   :  { %3254 = vmatpush.bf16.msra.mxu2 %v5553_v32 }
 0x95a   :  { %3275 = vmatpush.bf16.msra.mxu3 %v5601_v52  ;;  %v3304_v52 = vld [vmem:[#allocation40 + $0x40] sm:$0xff] }
 0x95e   :  { %3276 = vmatpush.bf16.msra.mxu3 %v5593_v9  ;;  %v3297_v9 = vld [vmem:[#allocation40 + $0x8] sm:$0xff] }
 0x963   :  { %5520 = vmatmul.msk.bf16.vlgmr.msrb.gmra.mxu3 %vm2455_vm1, %v6114_v33 }
 0x965   :  { %5518 = vmatmul.msk.bf16.vlgmr.msrb.gmra.mxu2 %vm2455_vm1, %v6114_v33 }
 0x973   :  { %5521 = vmatmul.msk.bf16.gmra.mxu3 %vm2455_vm1, %v5517_v37 }
 0x975   :  { %5519 = vmatmul.msk.bf16.gmra.mxu2 %vm2455_vm1, %v5517_v37  ;;  %v6094_v37 = vld [vmem:[#allocation34 + $0x24] sm:$0xf] }
 0x9a0   :  { %v2788_v38 = vpop.f32.mrf.mxu1 }
 0x9a2   :  { %v2769_v39 = vpop.f32.mrf.mxu0 }
 0x9a3   :  { %v7906_v12 = vadd.f32 %v2788_v38, %v2769_v39  ;;  %v5541_v38 = vor.u32 %v6095_v36, %v5540_v35  ;;  %v5542_v39 = vld [vmem:[#allocation34 + $0x28] sm:$0xf0] }
 0x9a5   :  { %3217 = vmatpush.bf16.msra.mxu0 %v5541_v38  ;;  %v3311_v38 = vld [vmem:[#allocation40 + $0x78] sm:$0xff] }
 0x9a6   :  { %v7908_v41 = vpop.f32.mrf.mxu3 }
 0x9a8   :  { %v7910_v42 = vpop.f32.mrf.mxu2  ;;  %v7912_v43 = vpop.f32.mrf.mxu1 }
 0x9a9   :  { %3218 = vmatpush.bf16.msra.mxu0 %v5533_v54  ;;  %v3303_v54 = vld [vmem:[#allocation40 + $0x38] sm:$0xff] }
 0x9aa   :  { %v7914_v44 = vpop.f32.mrf.mxu0 }
 0x9ad   :  { %3219 = vmatpush.bf16.msra.mxu0 %v5525_v61  ;;  %v3319_v61 = vld [vmem:[#allocation40 + $0xb8] sm:$0xff] }
 0x9ae   :  { %v2752_v46 = vpop.f32.mrf.mxu3 }
 0x9b0   :  { %v2733_v31 = vpop.f32.mrf.mxu2  ;;  %v2793_v27 = vpop.f32.mrf.mxu1 }
 0x9b1   :  { %v7916_v47 = vadd.f32 %v2752_v46, %v2733_v31  ;;  %v5596_v31 = vld [vmem:[#allocation34 + $0x90] sm:$0xf]  ;;  %3388 = vmatpush.msrb.mxu0 %v3311_v38 }
 0x9b2   :  { %v2774_v3 = vpop.f32.mrf.mxu0 }
 0x9b3   :  { %v7918_v62 = vadd.f32 %v2793_v27, %v2774_v3  ;;  %v6109_v27 = vld [vmem:[#allocation34 + $0x94] sm:$0xf0]  ;;  %v5545_v3 = vor.u32 %v6094_v37, %v5542_v39 }
 0x9b4   :  { %v5597_v56 = vor.u32 %v6109_v27, %v5596_v31  ;;  %v3310_v31 = vld [vmem:[#allocation40 + $0x70] sm:$0xff]  ;;  %v3309_v27 = vld [vmem:[#allocation40 + $0x68] sm:$0xff] }
 0x9b5   :  { %3255 = vmatpush.bf16.msra.mxu2 %v5545_v3  ;;  %3389 = vmatpush.msrb.mxu0 %v3310_v31  ;;  %v3308_v3 = vld [vmem:[#allocation40 + $0x60] sm:$0xff] }
 0x9b6   :  { %v7920_v53 = vpop.f32.mrf.mxu3  ;;  %3237 = vmatpush.bf16.msrb.mxu1 %v5597_v56 }
 0x9b7   :  { %3390 = vmatpush.msrb.mxu0 %v3309_v27 }
 0x9b8   :  { %v7922_v7 = vpop.f32.mrf.mxu2  ;;  %v7944_v29 = vpop.f32.mrf.mxu1 }
 0x9b9   :  { %3256 = vmatpush.bf16.msra.mxu2 %v5537_v60  ;;  %3391 = vmatpush.msrb.mxu0 %v3308_v3  ;;  %v3301_v60 = vld [vmem:[#allocation40 + $0x28] sm:$0xff] }
 0x9ba   :  { %3238 = vmatpush.bf16.msrb.mxu1 %v5589_v1  ;;  %v7946_v32 = vpop.f32.mrf.mxu0  ;;  %v3298_v1 = vld [vmem:[#allocation40 + $0x10] sm:$0xff] }
 0x9bb   :  { %3392 = vmatpush.msrb.mxu0 %v3307_v45 }
 0x9bd   :  { %3257 = vmatpush.bf16.msra.mxu2 %v5529_v11  ;;  %3393 = vmatpush.msrb.mxu0 %v3306_v48 }
 0x9be   :  { %v2757_v13 = vpop.f32.mrf.mxu3 }
 0x9bf   :  { %3394 = vmatpush.msrb.mxu0 %v3305_v50 }
 0x9c0   :  { %v2738_v59 = vpop.f32.mrf.mxu2  ;;  %v7948_v35 = vpop.f32.mrf.mxu1 }
 0x9c1   :  { %v7924_v16 = vadd.f32 %v2757_v13, %v2738_v59  ;;  %3432 = vmatpush.msrb.mxu2 %v3311_v38  ;;  %3395 = vmatpush.msrb.mxu0 %v3304_v52 }
 0x9c2   :  { %v7950_v36 = vpop.f32.mrf.mxu0 }
 0x9c3   :  { %3433 = vmatpush.msrb.mxu2 %v3310_v31  ;;  %3396 = vmatpush.msrb.mxu0 %v3303_v54 }
 0x9c5   :  { %3434 = vmatpush.msrb.mxu2 %v3309_v27  ;;  %3397 = vmatpush.msrb.mxu0 %v3302_v55 }
 0x9c6   :  { %v7926_v33 = vpop.f32.mrf.mxu3 }
 0x9c7   :  { %3435 = vmatpush.msrb.mxu2 %v3308_v3  ;;  %3398 = vmatpush.msrb.mxu0 %v3301_v60 }
 0x9c8   :  { %v7928_v46 = vpop.f32.mrf.mxu2  ;;  %v7952_v37 = vpop.f32.mrf.mxu1 }
 0x9c9   :  { %3436 = vmatpush.msrb.mxu2 %v3307_v45  ;;  %3399 = vmatpush.msrb.mxu0 %v3300_v40 }
 0x9ca   :  { %v7954_v39 = vpop.f32.mrf.mxu0 }
 0x9cb   :  { %3437 = vmatpush.msrb.mxu2 %v3306_v48  ;;  %3400 = vmatpush.msrb.mxu0 %v3299_v0 }
 0x9cd   :  { %3438 = vmatpush.msrb.mxu2 %v3305_v50  ;;  %3401 = vmatpush.msrb.mxu0 %v3298_v1 }
 0x9ce   :  { %v2954_v4 = vpop.f32.mrf.mxu3 }
 0x9cf   :  { %3439 = vmatpush.msrb.mxu2 %v3304_v52  ;;  %3402 = vmatpush.msrb.mxu0 %v3297_v9 }
 0x9d0   :  { %v2935_v8 = vpop.f32.mrf.mxu2  ;;  %v7956_v56 = vpop.f32.mrf.mxu1 }
 0x9d1   :  { %v2936_v13 = vadd.f32 %v2935_v8, %v7916_v47  ;;  %3440 = vmatpush.msrb.mxu2 %v3303_v54  ;;  %3403 = vmatpush.msrb.mxu0 %v3296_v30  ;;  %v3318_v8 = vld [vmem:[#allocation40 + $0xb0] sm:$0xff] }
 0x9d2   :  { %v7958_v49 = vpop.f32.mrf.mxu0 }
 0x9d3   :  { %v7931_v14 = vadd.f32 %v2954_v4, %v2936_v13  ;;  %3441 = vmatpush.msrb.mxu2 %v3302_v55  ;;  %v3321_v4 = vld [vmem:[#allocation40 + $0xc8] sm:$0xff] }
 0x9d4   :  { %3414 = vmatpush.msra.mxu1 %v3321_v4 }
 0x9d5   :  { %3442 = vmatpush.msrb.mxu2 %v3301_v60 }
 0x9d6   :  { %v7933_v6 = vpop.f32.mrf.mxu3  ;;  %3415 = vmatpush.msra.mxu1 %v3320_v34 }
 0x9d7   :  { %3443 = vmatpush.msrb.mxu2 %v3300_v40 }
 0x9d8   :  { %v7935_v57 = vpop.f32.mrf.mxu2  ;;  %v7960_v58 = vpop.f32.mrf.mxu1  ;;  %3416 = vmatpush.msra.mxu1 %v3319_v61 }
 0x9d9   :  { %3444 = vmatpush.msrb.mxu2 %v3299_v0 }
 0x9da   :  { %v7962_v63 = vpop.f32.mrf.mxu0  ;;  %3417 = vmatpush.msra.mxu1 %v3318_v8 }
 0x9db   :  { %3445 = vmatpush.msrb.mxu2 %v3298_v1 }
 0x9dd   :  { %3446 = vmatpush.msrb.mxu2 %v3297_v9 }
 0x9de   :  { %v2959_v17 = vpop.f32.mrf.mxu3 }
 0x9df   :  { %3447 = vmatpush.msrb.mxu2 %v3296_v30 }
 0x9e0   :  { %v2940_v25 = vpop.f32.mrf.mxu2 }
 0x9e1   :  { %v2941_v59 = vadd.f32 %v2940_v25, %v7924_v16 }
 0x9e3   :  { %v7938_v15 = vadd.f32 %v2959_v17, %v2941_v59  ;;  %v3317_v17 = vld [vmem:[#allocation40 + $0xa8] sm:$0xff]  ;;  %v3316_v59 = vld [vmem:[#allocation40 + $0xa0] sm:$0xff] }
 0x9e4   :  { %3418 = vmatpush.msra.mxu1 %v3317_v17 }
 0x9e6   :  { %v3072_v18 = vpop.f32.mrf.mxu3  ;;  %3419 = vmatpush.msra.mxu1 %v3316_v59 }
 0x9e8   :  { %v3053_v19 = vpop.f32.mrf.mxu2 }
 0x9ee   :  { %v3074_v5 = vpop.f32.mrf.mxu3 }
 0x9ef   :  { %v3083_v20 = vpack.c.bf16 %v3074_v5, %v3072_v18  ;;  %v3315_v18 = vld [vmem:[#allocation40 + $0x98] sm:$0xff]  ;;  %v3314_v5 = vld [vmem:[#allocation40 + $0x90] sm:$0xff] }
 0x9f0   :  { %v3055_v21 = vpop.f32.mrf.mxu2  ;;  %3420 = vmatpush.msra.mxu1 %v3315_v18 }
 0x9f1   :  { %v3082_v47 = vpack.c.bf16 %v3055_v21, %v3053_v19  ;;  %5618 = vmatmul.msk.bf16.vlgmr.msrb.gmra.mxu1 %vm941_vm5, %v3083_v20  ;;  %5620 = vmatmul.msk.bf16.vlgmr.msra.gmra.mxu3 %vm941_vm5, %v3083_v20  ;;  %v2751_v20 = vadd.f32 %v7908_v41, %v7910_v42  ;;  %v2756_v21 = vadd.f32 %v7920_v53, %v7922_v7  ;;  %v3312_v42 = vld [vmem:[#allocation40 + $0x80] sm:$0xff] }
 0x9f2   :  { %3421 = vmatpush.msra.mxu1 %v3314_v5  ;;  %v2972_v53 = vadd.f32 %v7950_v36, %v7906_v12 }
 0x9f3   :  { %3220 = vmatmul.bf16.vlgmr.msra.gmra.mxu0 %v3082_v47  ;;  %3258 = vmatmul.bf16.vlgmr.msra.gmra.mxu2 %v3082_v47 }
 0x9f4   :  { %3458 = vmatpush.msra.mxu0 %v3321_v4  ;;  %v2991_v36 = vadd.f32 %v7948_v35, %v2972_v53 }
 0x9f6   :  { %v3077_v22 = vpop.f32.mrf.mxu3  ;;  %3459 = vmatpush.msra.mxu0 %v3320_v34 }
 0x9f8   :  { %v3058_v51 = vpop.f32.mrf.mxu2  ;;  %3460 = vmatpush.msra.mxu0 %v3319_v61 }
 0x9fa   :  { %3461 = vmatpush.msra.mxu0 %v3318_v8 }
 0x9fc   :  { %3462 = vmatpush.msra.mxu0 %v3317_v17 }
 0x9fe   :  { %v3079_v24 = vpop.f32.mrf.mxu3  ;;  %3463 = vmatpush.msra.mxu0 %v3316_v59 }
 0x9ff   :  { %v3085_v26 = vpack.c.bf16 %v3079_v24, %v3077_v22  ;;  %v3313_v24 = vld [vmem:[#allocation40 + $0x88] sm:$0xff] }
 0xa00   :  { %v3060_v28 = vpop.f32.mrf.mxu2  ;;  %3464 = vmatpush.msra.mxu0 %v3315_v18  ;;  %3422 = vmatpush.msra.mxu1 %v3313_v24 }
 0xa01   :  { %v3084_v16 = vpack.c.bf16 %v3060_v28, %v3058_v51  ;;  %5619 = vmatmul.msk.bf16.gmra.mxu1 %vm941_vm5, %v3085_v26  ;;  %5621 = vmatmul.msk.bf16.gmra.mxu3 %vm941_vm5, %v3085_v26  ;;  %v2791_v51 = vadd.f32 %v7912_v43, %v7914_v44  ;;  %v2934_v26 = vadd.f32 %v7928_v46, %v2751_v20  ;;  %vm3345_vm5 = vcmask 648192  }
 0xa02   :  { %v2939_v28 = vadd.f32 %v7935_v57, %v2756_v21  ;;  %3465 = vmatpush.msra.mxu0 %v3314_v5  ;;  %3423 = vmatpush.msra.mxu1 %v3312_v42  ;;  %v2977_v43 = vadd.f32 %v7958_v49, %v7918_v62 }
 0xa03   :  { %3225 = vmatmul.bf16.gmra.mxu0 %v3084_v16  ;;  %3263 = vmatmul.bf16.gmra.mxu2 %v3084_v16  ;;  %v2974_v41 = vadd.f32 %v7954_v39, %v2791_v51  ;;  %v2953_v46 = vadd.f32 %v7926_v33, %v2934_v26  ;;  %v2796_v33 = vadd.f32 %v7944_v29, %v7946_v32 }
 0xa04   :  { %3466 = vmatpush.msra.mxu0 %v3313_v24  ;;  %v2958_v57 = vadd.f32 %v7933_v6, %v2939_v28  ;;  %v2996_v6 = vadd.f32 %v7956_v56, %v2977_v43 }
 0xa05   :  { %v2993_v12 = vadd.f32 %v7952_v37, %v2974_v41  ;;  %v2979_v54 = vadd.f32 %v7962_v63, %v2796_v33 }
 0xa06   :  { %3467 = vmatpush.msra.mxu0 %v3312_v42 }
 0xa6e   :  { %v3240_v2 = vpop.f32.mrf.mxu1 }
 0xa70   :  { %v3221_v23 = vpop.f32.mrf.mxu0 }
 0xa71   :  { %v3241_v7 = vadd.f32 %v3240_v2, %v3221_v23 }
 0xa73   :  { %v7984_v45 = vadd.f32 %v3241_v7, %v2953_v46 }
 0xa74   :  { %v3278_v10 = vpop.f32.mrf.mxu3 }
 0xa75   :  { %v3354_v29 = vmul.f32 %v7984_v45, %v7984_v45 }
 0xa76   :  { %v3242_v11 = vpop.f32.mrf.mxu1  ;;  %v3259_v13 = vpop.f32.mrf.mxu2 }
 0xa77   :  { %v3279_v27 = vadd.f32 %v3278_v10, %v3259_v13 }
 0xa78   :  { %v3223_v25 = vpop.f32.mrf.mxu0 }
 0xa79   :  { %v3243_v16 = vadd.f32 %v3242_v11, %v3223_v25  ;;  %v7993_v50 = vadd.f32 %v3279_v27, %v2991_v36 }
 0xa7b   :  { %v7980_v3 = vadd.f32 %v3243_v16, %v7931_v14  ;;  %v3355_v63 = vmul.f32 %v7993_v50, %v7993_v50  ;;  %v3340_v34 = vsel %vm3339_vm4, %v7993_v50, 0.0 }
 0xa7c   :  { %v3280_v19 = vpop.f32.mrf.mxu3 }
 0xa7d   :  { %v3356_v37 = vmul.f32 %v7980_v3, %v7980_v3  ;;  %v3328_v32 = vadd.f32 %v7980_v3, %v7984_v45 }
 0xa7e   :  { %v3245_v47 = vpop.f32.mrf.mxu1  ;;  %v3261_v22 = vpop.f32.mrf.mxu2 }
 0xa7f   :  { %v3281_v44 = vadd.f32 %v3280_v19, %v3261_v22  ;;  %v3362_v1 = vadd.f32 %v3356_v37, %v3354_v29 }
 0xa80   :  { %v3226_v38 = vpop.f32.mrf.mxu0 }
 0xa81   :  { %v3246_v31 = vadd.f32 %v3245_v47, %v3226_v38  ;;  %v7991_v49 = vadd.f32 %v3281_v44, %v2993_v12 }
 0xa83   :  { %v7986_v48 = vadd.f32 %v3246_v31, %v2958_v57  ;;  %v3357_v40 = vmul.f32 %v7991_v49, %v7991_v49  ;;  %v3341_v4 = vsel %vm3339_vm4, %v7991_v49, 0.0 }
 0xa84   :  { %v3283_v39 = vpop.f32.mrf.mxu3  ;;  %v3342_v18 = vadd.f32 %v3341_v4, %v3340_v34  ;;  %v3323_v4 = vld [vmem:[%s8232_s10 + $0x8] sm:$0xff] }
 0xa85   :  { %v3358_v56 = vmul.f32 %v7986_v48, %v7986_v48  ;;  %v3329_v2 = vadd.f32 %v3328_v32, %v7986_v48  ;;  %v3373_v13 = vsel %vm3339_vm4, %v3357_v40, 0.0 }
 0xa86   :  { %v3264_v62 = vpop.f32.mrf.mxu2  ;;  %v3247_v52 = vpop.f32.mrf.mxu1 }
 0xa87   :  { %v3284_v14 = vadd.f32 %v3283_v39, %v3264_v62  ;;  %v3363_v61 = vadd.f32 %v3362_v1, %v3358_v56  ;;  %v3324_v56 = vld [vmem:[%s8232_s10 + $0x10] sm:$0xff] }
 0xa88   :  { %v3228_v35 = vpop.f32.mrf.mxu0  ;;  %3507 = vmatpush.msrb.mxu1 %v3324_v56 }
 0xa89   :  { %v7998_v55 = vadd.f32 %v3284_v14, %v2996_v6  ;;  %v3248_v60 = vadd.f32 %v3247_v52, %v3228_v35 }
 0xa8b   :  { %v8009_v0 = vadd.f32 %v3248_v60, %v7938_v15  ;;  %v3359_v9 = vmul.f32 %v7998_v55, %v7998_v55  ;;  %v2998_v15 = vadd.f32 %v7960_v58, %v2979_v54  ;;  %v3343_v17 = vsel %vm3339_vm4, %v7998_v55, 0.0 }
 0xa8c   :  { %v3285_v8 = vpop.f32.mrf.mxu3  ;;  %v3372_v58 = vsel %vm3339_vm4, %v3355_v63, 0.0  ;;  %v3344_v22 = vadd.f32 %v3343_v17, %v3342_v18  ;;  %v3322_v63 = vld [vmem:[%s8232_s10] sm:$0xff] }
 0xa8d   :  { %v3331_v23 = vsel %vm3330_vm3, %v8009_v0, 0.0  ;;  %v3360_v30 = vmul.f32 %v8009_v0, %v8009_v0  ;;  %v3375_v20 = vsel %vm3339_vm4, %v3359_v9, 0.0  ;;  %v3374_v47 = vadd.f32 %v3373_v13, %v3372_v58  ;;  %3508 = vmatpush.msrb.mxu1 %v3322_v63 }
 0xa8e   :  { %v3332_v10 = vadd.f32 %v3331_v23, %v3329_v2  ;;  %v3266_v11 = vpop.f32.mrf.mxu2  ;;  %v3325_v2 = vld [vmem:[%s8232_s10 + $0x18] sm:$0xff] }
 0xa8f   :  { %v3364_v25 = vsel %vm3330_vm3, %v3360_v30, 0.0  ;;  %v3286_v59 = vadd.f32 %v3285_v8, %v3266_v11  ;;  %v3376_v16 = vadd.f32 %v3375_v20, %v3374_v47  ;;  %3570 = vmatpush.msrb.mxu3 %v3325_v2  ;;  %v3327_v47 = vld [vmem:[%s8234_s23] sm:$0x1] }
 0xa90   :  { %v3333_v19 = vrot.slane %v3332_v10, 4  ;;  %v3365_v5 = vadd.f32 %v3364_v25, %v3363_v61 }
 0xa91   :  { %v8031_v21 = vadd.f32 %v3286_v59, %v2998_v15  ;;  %3571 = vmatpush.msrb.mxu3 %v3323_v4 }
 0xa92   :  { %v3334_v51 = vadd.f32 %v3333_v19, %v3332_v10  ;;  %v3366_v24 = vrot.slane %v3365_v5, 4  ;;  %v3326_v19 = vld [vmem:[%s8233_s22] sm:$0x1] }
 0xa93   :  { %v3346_v26 = vsel %vm3345_vm5, %v8031_v21, 0.0  ;;  %v3361_v28 = vmul.f32 %v8031_v21, %v8031_v21 }
 0xa94   :  { %v3335_v38 = vrot.slane %v3334_v51, 2  ;;  %v3367_v41 = vadd.f32 %v3366_v24, %v3365_v5  ;;  %v3347_v42 = vadd.f32 %v3346_v26, %v3344_v22 }
 0xa95   :  { %v3377_v53 = vsel %vm3345_vm5, %v3361_v28, 0.0 }
 0xa96   :  { %v3336_v7 = vadd.f32 %v3335_v38, %v3334_v51  ;;  %v3368_v31 = vrot.slane %v3367_v41, 2  ;;  %v3348_v43 = vrot.slane %v3347_v42, 4  ;;  %v3378_v44 = vadd.f32 %v3377_v53, %v3376_v16 }
 0xa98   :  { %v3349_v46 = vadd.f32 %v3348_v43, %v3347_v42  ;;  %v3379_v57 = vrot.slane %v3378_v44, 4  ;;  %v3337_v27 = vrot.slane %v3336_v7, 1  ;;  %v3369_v39 = vadd.f32 %v3368_v31, %v3367_v41 }
 0xa9a   :  { %v3350_v12 = vrot.slane %v3349_v46, 2  ;;  %v3380_v36 = vadd.f32 %v3379_v57, %v3378_v44  ;;  %v3338_v62 = vadd.f32 %v3337_v27, %v3336_v7  ;;  %v3370_v33 = vrot.slane %v3369_v39, 1 }
 0xa9c   :  { %v3351_v6 = vadd.f32 %v3350_v12, %v3349_v46  ;;  %v3381_v14 = vrot.slane %v3380_v36, 2  ;;  %3404 = vmatmul.f32.vlgmr.msrb.gmra.mxu0 %v3338_v62  ;;  %v3371_v37 = vadd.f32 %v3370_v33, %v3369_v39 }
 0xa9e   :  { %v3352_v52 = vrot.slane %v3351_v6, 1  ;;  %v3382_v35 = vadd.f32 %v3381_v14, %v3380_v36  ;;  %3448 = vmatmul.f32.vlgmr.msrb.gmra.mxu2 %v3371_v37 }
 0xaa0   :  { %v3353_v54 = vadd.f32 %v3352_v52, %v3351_v6  ;;  %v3383_v60 = vrot.slane %v3382_v35, 1 }
 0xaa2   :  { %v3384_v29 = vadd.f32 %v3383_v60, %v3382_v35  ;;  %5622 = vmatmul.msk.f32.vlgmr.msra.gmra.mxu1 %vm3339_vm4, %v3353_v54  ;;  %v6144_v60 = vld [vmem:[#allocation43 + $0x60] sm:$0xff] }
 0xaa3   :  { %3527 = vmatpush.msra.mxu1 %v3325_v2  ;;  %v6139_v2 = vld [vmem:[#allocation43 + $0x38] sm:$0xff] }
 0xaa4   :  { %5623 = vmatmul.msk.f32.vlgmr.msra.gmra.mxu0 %vm3339_vm4, %v3384_v29  ;;  %v6145_v29 = vld [vmem:[#allocation49] sm:$0xff] }
 0xaa5   :  { %3528 = vmatpush.msra.mxu1 %v3323_v4 }
 0xb19   :  { %v3405_v32 = vpop.f32.mrf.mxu0 }
 0xb1f   :  { %v3425_v40 = vpop.f32.mrf.mxu1 }
 0xb20   :  { %v3426_v1 = vadd.f32 %v3425_v40, %v3405_v32 }
 0xb21   :  { %v3449_v9 = vpop.f32.mrf.mxu2  ;;  %v3469_v23 = vpop.f32.mrf.mxu0 }
 0xb22   :  { %v3428_v30 = vmul.f32 0.00295858, %v3426_v1  ;;  %v3470_v15 = vadd.f32 %v3469_v23, %v3449_v9  ;;  %v6129_v1 = vld [vmem:[#allocation47] sm:$0xff]  ;;  %v6142_v9 = vld [vmem:[#allocation43 + $0x50] sm:$0xff] }
 0xb23   :  { %v6138_v23 = vld [vmem:[#allocation43 + $0x30] sm:$0xff] }
 0xb24   :  { %v3473_v34 = vmul.f32 %v3428_v30, %v3428_v30  ;;  %v3472_v61 = vmul.f32 0.00295858, %v3470_v15  ;;  %v6137_v15 = vld [vmem:[#allocation43 + $0x28] sm:$0xff] }
 0xb26   :  { %v3474_v10 = vsub.f32 %v3472_v61, %v3473_v34  ;;  %v6140_v34 = vld [vmem:[#allocation43 + $0x40] sm:$0xff] }
 0xb27   :  { %v6136_v61 = vld [vmem:[#allocation43 + $0x20] sm:$0xff] }
 0xb28   :  { %v3475_v8 = vmax.f32 %v3474_v10, 0.0  ;;  %v6146_v10 = vld [vmem:[#allocation49 + $0x8] sm:$0xff] }
 0xb2a   :  { %v3476_v11 = vadd.f32 1e-05, %v3475_v8  ;;  %v6130_v8 = vld [vmem:[#allocation47 + $0x8] sm:$0xff] }
 0xb2c   :  { %6267 = vrsqrt.f32 %v3476_v11  ;;  %vm3483_vm7 = vweird.f32 %v3476_v11 }
 0xb32   :  { %v6268_v13 = vpop.eup %6267 }
 0xb33   :  { %v3478_v17 = vmul.f32 %v6268_v13, %v3476_v11  ;;  %vm3484_vm6 = vweird.f32 %v6268_v13  ;;  %v6135_v11 = vld [vmem:[#allocation43 + $0x18] sm:$0xff] }
 0xb34   :  { %vm3485_vm8 = vmor %vm3483_vm7, %vm3484_vm6 }
 0xb35   :  { %v3479_v25 = vmul.f32 %v6268_v13, %v3478_v17  ;;  %v6123_v17 = vld [vmem:[#allocation41 + $0x38] sm:$0xff] }
 0xb37   :  { %v3480_v59 = vmul.f32 0.5, %v3479_v25  ;;  %v6133_v25 = vld [vmem:[#allocation43 + $0x8] sm:$0xff] }
 0xb39   :  { %v3481_v18 = vsub.f32 1.5, %v3480_v59  ;;  %v6128_v59 = vld [vmem:[#allocation41 + $0x60] sm:$0xff] }
 0xb3b   :  { %v3482_v5 = vmul.f32 %v6268_v13, %v3481_v18  ;;  %v6122_v18 = vld [vmem:[#allocation41 + $0x30] sm:$0xff] }
 0xb3d   :  { %v3486_v58 = vsel %vm3485_vm8, %v6268_v13, %v3482_v5  ;;  %v6134_v13 = vld [vmem:[#allocation43 + $0x10] sm:$0xff]  ;;  %v6147_v5 = vld [vmem:[#allocation49 + $0x10] sm:$0xff] }
 0xb3e   :  { %v3487_v20 = vmul.f32 %v3486_v58, %v3326_v19  ;;  %v6132_v19 = vld [vmem:[#allocation43] sm:$0xff] }
 0xb3f   :  { %v6121_v58 = vld [vmem:[#allocation41 + $0x28] sm:$0xff] }
 0xb40   :  { %v3488_v22 = vmul.f32 %v3487_v20, %v3428_v30  ;;  %5624 = vmatmul.msk.f32.vlgmr.msrb.gmra.mxu1 %vm737_vm2, %v3487_v20  ;;  %v6141_v30 = vld [vmem:[#allocation43 + $0x48] sm:$0xff] }
 0xb41   :  { %3550 = vmatpush.msrb.mxu1 %v3324_v56 }
 0xb42   :  { %v3489_v51 = vsub.f32 %v3327_v47, %v3488_v22  ;;  %v6120_v47 = vld [vmem:[#allocation41 + $0x20] sm:$0xff]  ;;  %v3775_v22 = vld [vmem:[#allocation49 + $0x18] sm:$0xf] }
 0xb43   :  { %3551 = vmatpush.msrb.mxu1 %v3322_v63  ;;  %v6143_v63 = vld [vmem:[#allocation43 + $0x58] sm:$0xff] }
 0xb44   :  { %5627 = vmatmul.msk.f32.vlgmr.msrb.gmra.mxu3 %vm737_vm2, %v3489_v51 }
 0xb48   :  { %5625 = vmatmul.msk.f32.vlgmr.msra.gmra.mxu1 %vm737_vm2, %v3487_v20  ;;  %v6131_v20 = vld [vmem:[#allocation47 + $0x10] sm:$0xff] }
 0xb50   :  { %5626 = vmatmul.msk.f32.vlgmr.msrb.gmra.mxu1 %vm737_vm2, %v3489_v51  ;;  %vm3672_vm2 = vcmask 1044480   ;;  %v6119_v51 = vld [vmem:[#allocation41 + $0x18] sm:$0xff] }
 0xbbd   :  { %v3510_v24 = vpop.f32.mrf.mxu1 }
 0xbbe   :  { %v3576_v31 = vperm.slane %v3510_v24, 0  ;;  %v3789_v24 = vunpack.c.l.b16 %v3775_v22  ;;  %v6163_v22 = vld [vmem:[#allocation50 + $0x10] sm:$0xff] }
 0xbc0   :  { %v3582_v36 = vmul.f32 %v3576_v31, %v7986_v48  ;;  %v3584_v62 = vmul.f32 %v3576_v31, %v8009_v0 }
 0xbc5   :  { %v3530_v26 = vpop.f32.mrf.mxu1 }
 0xbc6   :  { %v3577_v28 = vperm.slane %v3530_v26, 0  ;;  %v3640_v26 = vld [vmem:[#allocation47 + $0x18] sm:$0xf] }
 0xbc7   :  { %v3573_v16 = vpop.f32.mrf.mxu3 }
 0xbc8   :  { %v3579_v38 = vmul.f32 %v3577_v28, %v7993_v50  ;;  %v3581_v41 = vmul.f32 %v3577_v28, %v7991_v49  ;;  %v3583_v42 = vmul.f32 %v3577_v28, %v7998_v55  ;;  %v3585_v53 = vmul.f32 %v3577_v28, %v8031_v21 }
 0xbc9   :  { %v3587_v7 = vperm.slane %v3573_v16, 0  ;;  %v3578_v49 = vmul.f32 %v3576_v31, %v7984_v45  ;;  %v3580_v55 = vmul.f32 %v3576_v31, %v7980_v3  ;;  %v3654_v28 = vunpack.c.l.b16 %v3640_v26  ;;  %v6125_v31 = vld [vmem:[#allocation41 + $0x48] sm:$0xff] }
 0xbca   :  { %v3793_v16 = vpack.c.b16 %v3789_v24, %v3789_v24 }
 0xbcb   :  { %v3593_v43 = vadd.f32 %v3587_v7, %v3583_v42  ;;  %v3595_v44 = vadd.f32 %v3587_v7, %v3585_v53  ;;  %v3589_v46 = vadd.f32 %v3587_v7, %v3579_v38  ;;  %v3591_v57 = vadd.f32 %v3587_v7, %v3581_v41  ;;  %v6127_v41 = vld [vmem:[#allocation41 + $0x58] sm:$0xff]  ;;  %v6118_v42 = vld [vmem:[#allocation41 + $0x10] sm:$0xff]  ;;  %v6117_v7 = vld [vmem:[#allocation41 + $0x8] sm:$0xff] }
 0xbcc   :  { %v3658_v38 = vpack.c.b16 %v3654_v28, %v3654_v28  ;;  %v6126_v53 = vld [vmem:[#allocation41 + $0x50] sm:$0xff]  ;;  %v6155_v28 = vld [vmem:[#allocation44 + $0x38] sm:$0xff] }
 0xbcd   :  { %v3553_v27 = vpop.f32.mrf.mxu1  ;;  %v3601_v39 = vmax.f32 %v3593_v43, 0.0  ;;  %v3603_v12 = vmax.f32 %v3595_v44, 0.0  ;;  %v3597_v33 = vmax.f32 %v3589_v46, 0.0  ;;  %v3599_v6 = vmax.f32 %v3591_v57, 0.0  ;;  %v6116_v43 = vld [vmem:[#allocation41] sm:$0xff] }
 0xbce   :  { %v3586_v50 = vperm.slane %v3553_v27, 0  ;;  %v6124_v44 = vld [vmem:[#allocation41 + $0x40] sm:$0xff] }
 0xbcf   :  { %v3607_v21 = vpack.c.bf16 %v3603_v12, %v3601_v39  ;;  %v8061_v45 = vpack.c.bf16 %v3599_v6, %v3597_v33 }
 0xbd0   :  { %v3592_v14 = vadd.f32 %v3586_v50, %v3582_v36  ;;  %v3594_v37 = vadd.f32 %v3586_v50, %v3584_v62  ;;  %v3588_v52 = vadd.f32 %v3586_v50, %v3578_v49  ;;  %v3590_v35 = vadd.f32 %v3586_v50, %v3580_v55 }
 0xbd1   :  { %v8057_v54 = vsel %vm3672_vm2, %v3607_v21, 0 }
 0xbd2   :  { %3713 = vmatpush.bf16.msra.mxu1 %v8057_v54  ;;  %3840 = vmatpush.bf16.msra.mxu3 %v8057_v54  ;;  %v3600_v48 = vmax.f32 %v3592_v14, 0.0  ;;  %v3602_v0 = vmax.f32 %v3594_v37, 0.0  ;;  %v3596_v32 = vmax.f32 %v3588_v52, 0.0  ;;  %v3598_v56 = vmax.f32 %v3590_v35, 0.0 }
 0xbd4   :  { %v3606_v3 = vpack.c.bf16 %v3602_v0, %v3600_v48  ;;  %v8071_v4 = vpack.c.bf16 %v3598_v56, %v3596_v32 }
 0xbd6   :  { %3714 = vmatpush.bf16.msra.mxu1 %v8061_v45  ;;  %3841 = vmatpush.bf16.msra.mxu3 %v8061_v45  ;;  %v8066_v40 = vsel %vm3672_vm2, %v3606_v3, 0 }
 0xbd7   :  { %3685 = vmatpush.bf16.msrb.mxu0 %v8066_v40  ;;  %3812 = vmatpush.bf16.msra.mxu2 %v8066_v40 }
 0xbd9   :  { %5664 = vmatmul.msk.bf16.vlgmr.msra.gmra.mxu3 %vm3659_vm9, %v6145_v29  ;;  %5644 = vmatmul.msk.bf16.vlgmr.msra.gmra.mxu1 %vm3659_vm9, %v6129_v1 }
 0xbda   :  { %3991 = vmatpush.bf16.msrb.mxu1 %v6144_v60  ;;  %4137 = vmatpush.bf16.msrb.mxu3 %v6128_v59 }
 0xbdb   :  { %3686 = vmatpush.bf16.msrb.mxu0 %v8071_v4  ;;  %3813 = vmatpush.bf16.msra.mxu2 %v8071_v4 }
 0xbde   :  { %3992 = vmatpush.bf16.msrb.mxu1 %v6143_v63  ;;  %5640 = vmatmul.msk.bf16.vlgmr.msrb.gmra.mxu0 %vm3659_vm9, %v6129_v1 }
 0xbdf   :  { %3960 = vmatpush.bf16.msra.mxu0 %v6139_v2  ;;  %5660 = vmatmul.msk.bf16.vlgmr.msra.gmra.mxu2 %vm3659_vm9, %v6145_v29 }
 0xbe0   :  { %4106 = vmatpush.bf16.msrb.mxu2 %v6123_v17  ;;  %4138 = vmatpush.bf16.msrb.mxu3 %v6127_v41  ;;  %v6154_v41 = vld [vmem:[#allocation44 + $0x30] sm:$0xff] }
 0xbe2   :  { %3993 = vmatpush.bf16.msrb.mxu1 %v6142_v9 }
 0xbe3   :  { %3961 = vmatpush.bf16.msra.mxu0 %v6138_v23 }
 0xbe4   :  { %4107 = vmatpush.bf16.msrb.mxu2 %v6122_v18  ;;  %4139 = vmatpush.bf16.msrb.mxu3 %v6126_v53 }
 0xbe6   :  { %3994 = vmatpush.bf16.msrb.mxu1 %v6141_v30 }
 0xbe7   :  { %3962 = vmatpush.bf16.msra.mxu0 %v6137_v15 }
 0xbe8   :  { %4108 = vmatpush.bf16.msrb.mxu2 %v6121_v58  ;;  %4140 = vmatpush.bf16.msrb.mxu3 %v6125_v31 }
 0xbe9   :  { %5665 = vmatmul.msk.bf16.gmra.mxu3 %vm3659_vm9, %v6146_v10  ;;  %5645 = vmatmul.msk.bf16.gmra.mxu1 %vm3659_vm9, %v6130_v8 }
 0xbea   :  { %3995 = vmatpush.bf16.msrb.mxu1 %v6140_v34 }
 0xbeb   :  { %3963 = vmatpush.bf16.msra.mxu0 %v6136_v61 }
 0xbec   :  { %4109 = vmatpush.bf16.msrb.mxu2 %v6120_v47  ;;  %4141 = vmatpush.bf16.msrb.mxu3 %v6124_v44  ;;  %v6162_v47 = vld [vmem:[#allocation50 + $0x8] sm:$0xff] }
 0xbee   :  { %4259 = vmatpush.bf16.msra.mxu1 %v8057_v54  ;;  %5641 = vmatmul.msk.bf16.gmra.mxu0 %vm3659_vm9, %v6130_v8 }
 0xbef   :  { %3964 = vmatpush.bf16.msra.mxu0 %v6135_v11  ;;  %5661 = vmatmul.msk.bf16.gmra.mxu2 %vm3659_vm9, %v6146_v10 }
 0xbf0   :  { %4110 = vmatpush.bf16.msrb.mxu2 %v6119_v51  ;;  %v4194_v51 = vld [vmem:[#allocation50 + $0x18] sm:$0xf] }
 0xbf1   :  { %v4208_v24 = vunpack.c.l.b16 %v4194_v51 }
 0xbf2   :  { %4260 = vmatpush.bf16.msra.mxu1 %v8061_v45 }
 0xbf3   :  { %3965 = vmatpush.bf16.msra.mxu0 %v6134_v13  ;;  %v4212_v26 = vpack.c.b16 %v4208_v24, %v4208_v24 }
 0xbf4   :  { %4111 = vmatpush.bf16.msrb.mxu2 %v6118_v42 }
 0xbf7   :  { %3966 = vmatpush.bf16.msra.mxu0 %v6133_v25 }
 0xbf8   :  { %4112 = vmatpush.bf16.msrb.mxu2 %v6117_v7  ;;  %v6159_v7 = vld [vmem:[#allocation44 + $0x58] sm:$0xff] }
 0xbf9   :  { %5666 = vmatmul.msk.bf16.gmra.mxu3 %vm3659_vm9, %v6147_v5  ;;  %5646 = vmatmul.msk.bf16.gmra.mxu1 %vm3659_vm9, %v6131_v20 }
 0xbfb   :  { %3967 = vmatpush.bf16.msra.mxu0 %v6132_v19 }
 0xbfc   :  { %4113 = vmatpush.bf16.msrb.mxu2 %v6116_v43 }
 0xbfe   :  { %5642 = vmatmul.msk.bf16.gmra.mxu0 %vm3659_vm9, %v6131_v20  ;;  %v6161_v20 = vld [vmem:[#allocation50] sm:$0xff] }
 0xbff   :  { %4231 = vmatpush.bf16.msrb.mxu0 %v8066_v40  ;;  %5662 = vmatmul.msk.bf16.gmra.mxu2 %vm3659_vm9, %v6147_v5 }
 0xc00   :  { %4379 = vmatpush.bf16.msra.mxu2 %v6155_v28 }
 0xc03   :  { %4232 = vmatpush.bf16.msrb.mxu0 %v8071_v4 }
 0xc04   :  { %4380 = vmatpush.bf16.msra.mxu2 %v6154_v41 }
 0xc09   :  { %5667 = vmatmul.msk.bf16.gmra.mxu3 %vm3659_vm9, %v3793_v16  ;;  %5647 = vmatmul.msk.bf16.gmra.mxu1 %vm3659_vm9, %v3658_v38 }
 0xc0e   :  { %5643 = vmatmul.msk.bf16.gmra.mxu0 %vm3659_vm9, %v3658_v38  ;;  %v6177_v38 = vld [vmem:[#allocation52] sm:$0xff] }
 0xc0f   :  { %5663 = vmatmul.msk.bf16.gmra.mxu2 %vm3659_vm9, %v3793_v16  ;;  %v6160_v16 = vld [vmem:[#allocation44 + $0x60] sm:$0xff] }
 0xc10   :  { %4410 = vmatpush.bf16.msra.mxu3 %v6160_v16  ;;  %v6171_v16 = vld [vmem:[#allocation46 + $0x38] sm:$0xff] }
 0xc14   :  { %4411 = vmatpush.bf16.msra.mxu3 %v6159_v7 }
 0xc56   :  { %v3716_v46 = vpop.f32.mrf.mxu1 }
 0xc5b   :  { %v3688_v57 = vpop.f32.mrf.mxu0 }
 0xc5c   :  { %v3843_v27 = vpop.f32.mrf.mxu3 }
 0xc5e   :  { %v3718_v39 = vpop.f32.mrf.mxu1 }
 0xc5f   :  { %v3736_v12 = vpack.c.bf16 %v3718_v39, %v3716_v46  ;;  %v6153_v46 = vld [vmem:[#allocation44 + $0x28] sm:$0xff] }
 0xc60   :  { %4381 = vmatpush.bf16.msra.mxu2 %v6153_v46  ;;  %v6170_v46 = vld [vmem:[#allocation46 + $0x30] sm:$0xff] }
 0xc61   :  { %5776 = vmatmul.msk.bf16.vlgmr.msrb.gmra.mxu3 %vm3339_vm4, %v3736_v12 }
 0xc62   :  { %v3815_v36 = vpop.f32.mrf.mxu2 }
 0xc63   :  { %v3690_v62 = vpop.f32.mrf.mxu0 }
 0xc64   :  { %v3845_v50 = vpop.f32.mrf.mxu3  ;;  %v3735_v49 = vpack.c.bf16 %v3690_v62, %v3688_v57 }
 0xc65   :  { %v3863_v55 = vpack.c.bf16 %v3845_v50, %v3843_v27 }
 0xc66   :  { %4114 = vmatmul.bf16.vlgmr.msrb.gmra.mxu2 %v3735_v49  ;;  %v3721_v21 = vpop.f32.mrf.mxu1  ;;  %v6178_v49 = vld [vmem:[#allocation52 + $0x8] sm:$0xff] }
 0xc67   :  { %5720 = vmatmul.msk.bf16.vlgmr.msrb.gmra.mxu1 %vm3339_vm4, %v3863_v55  ;;  %v6152_v55 = vld [vmem:[#allocation44 + $0x20] sm:$0xff] }
 0xc68   :  { %4539 = vmatpush.bf16.msrb.mxu1 %v8057_v54  ;;  %4382 = vmatpush.bf16.msra.mxu2 %v6152_v55 }
 0xc6a   :  { %v3817_v33 = vpop.f32.mrf.mxu2 }
 0xc6b   :  { %v3862_v6 = vpack.c.bf16 %v3817_v33, %v3815_v36  ;;  %v3693_v14 = vpop.f32.mrf.mxu0 }
 0xc6c   :  { %4540 = vmatpush.bf16.msrb.mxu1 %v8061_v45  ;;  %v3848_v37 = vpop.f32.mrf.mxu3 }
 0xc6d   :  { %3968 = vmatmul.bf16.vlgmr.msra.gmra.mxu0 %v3862_v6 }
 0xc6e   :  { %4511 = vmatpush.bf16.msra.mxu0 %v8066_v40  ;;  %v3723_v52 = vpop.f32.mrf.mxu1 }
 0xc6f   :  { %v3738_v35 = vpack.c.bf16 %v3723_v52, %v3721_v21 }
 0xc71   :  { %5777 = vmatmul.msk.bf16.gmra.mxu3 %vm3339_vm4, %v3738_v35 }
 0xc72   :  { %4512 = vmatpush.bf16.msra.mxu0 %v8071_v4  ;;  %v3820_v48 = vpop.f32.mrf.mxu2 }
 0xc73   :  { %v3695_v0 = vpop.f32.mrf.mxu0 }
 0xc74   :  { %v3850_v60 = vpop.f32.mrf.mxu3  ;;  %v3737_v3 = vpack.c.bf16 %v3695_v0, %v3693_v14  ;;  %v6158_v14 = vld [vmem:[#allocation44 + $0x50] sm:$0xff]  ;;  %v6151_v0 = vld [vmem:[#allocation44 + $0x18] sm:$0xff] }
 0xc75   :  { %v3865_v54 = vpack.c.bf16 %v3850_v60, %v3848_v37  ;;  %4412 = vmatpush.bf16.msra.mxu3 %v6158_v14  ;;  %4383 = vmatpush.bf16.msra.mxu2 %v6151_v0  ;;  %v6173_v0 = vld [vmem:[#allocation46 + $0x48] sm:$0xff] }
 0xc76   :  { %4119 = vmatmul.bf16.gmra.mxu2 %v3737_v3  ;;  %v3726_v29 = vpop.f32.mrf.mxu1 }
 0xc77   :  { %5721 = vmatmul.msk.bf16.gmra.mxu1 %vm3339_vm4, %v3865_v54 }
 0xc7a   :  { %v3822_v45 = vpop.f32.mrf.mxu2 }
 0xc7b   :  { %v3864_v32 = vpack.c.bf16 %v3822_v45, %v3820_v48  ;;  %v3698_v56 = vpop.f32.mrf.mxu0 }
 0xc7c   :  { %v3853_v63 = vpop.f32.mrf.mxu3 }
 0xc7d   :  { %3973 = vmatmul.bf16.gmra.mxu0 %v3864_v32 }
 0xc7e   :  { %v3728_v40 = vpop.f32.mrf.mxu1 }
 0xc7f   :  { %v3740_v1 = vpack.c.bf16 %v3728_v40, %v3726_v29  ;;  %v6157_v29 = vld [vmem:[#allocation44 + $0x48] sm:$0xff] }
 0xc80   :  { %4413 = vmatpush.bf16.msra.mxu3 %v6157_v29 }
 0xc81   :  { %5778 = vmatmul.msk.bf16.gmra.mxu3 %vm3339_vm4, %v3740_v1  ;;  %v6179_v1 = vld [vmem:[#allocation52 + $0x10] sm:$0xff] }
 0xc82   :  { %v3825_v2 = vpop.f32.mrf.mxu2 }
 0xc83   :  { %v3700_v4 = vpop.f32.mrf.mxu0 }
 0xc84   :  { %v3855_v9 = vpop.f32.mrf.mxu3  ;;  %v3739_v23 = vpack.c.bf16 %v3700_v4, %v3698_v56 }
 0xc85   :  { %v3867_v30 = vpack.c.bf16 %v3855_v9, %v3853_v63  ;;  %v6150_v63 = vld [vmem:[#allocation44 + $0x10] sm:$0xff] }
 0xc86   :  { %4124 = vmatmul.bf16.gmra.mxu2 %v3739_v23  ;;  %v3731_v15 = vpop.f32.mrf.mxu1 }
 0xc87   :  { %5722 = vmatmul.msk.bf16.gmra.mxu1 %vm3339_vm4, %v3867_v30  ;;  %v3742_v11 = vpack.c.bf16 %v3731_v15, %v3731_v15  ;;  %4384 = vmatpush.bf16.msra.mxu2 %v6150_v63  ;;  %v6172_v63 = vld [vmem:[#allocation46 + $0x40] sm:$0xff] }
 0xc8a   :  { %v3827_v34 = vpop.f32.mrf.mxu2 }
 0xc8b   :  { %v3866_v61 = vpack.c.bf16 %v3827_v34, %v3825_v2  ;;  %v3703_v10 = vpop.f32.mrf.mxu0  ;;  %v6149_v34 = vld [vmem:[#allocation44 + $0x8] sm:$0xff] }
 0xc8c   :  { %v3858_v8 = vpop.f32.mrf.mxu3  ;;  %v3741_v25 = vpack.c.bf16 %v3703_v10, %v3703_v10  ;;  %v6156_v10 = vld [vmem:[#allocation44 + $0x40] sm:$0xff]  ;;  %4385 = vmatpush.bf16.msra.mxu2 %v6149_v34 }
 0xc8d   :  { %3978 = vmatmul.bf16.gmra.mxu0 %v3866_v61  ;;  %v3869_v59 = vpack.c.bf16 %v3858_v8, %v3858_v8  ;;  %4414 = vmatpush.bf16.msra.mxu3 %v6156_v10 }
 0xc8e   :  { %v3733_v13 = vpop.f32.mrf.mxu1 }
 0xc91   :  { %5779 = vmatmul.msk.bf16.gmra.mxu3 %vm3339_vm4, %v3742_v11  ;;  %v4474_v11 = vld [vmem:[#allocation52 + $0x18] sm:$0xf] }
 0xc92   :  { %v3830_v17 = vpop.f32.mrf.mxu2 }
 0xc93   :  { %v3705_v18 = vpop.f32.mrf.mxu0  ;;  %v3868_v5 = vpack.c.bf16 %v3830_v17, %v3830_v17 }
 0xc94   :  { %v3860_v19 = vpop.f32.mrf.mxu3 }
 0xc95   :  { %v6148_v19 = vld [vmem:[#allocation44] sm:$0xff] }
 0xc96   :  { %4129 = vmatmul.bf16.gmra.mxu2 %v3741_v25 }
 0xc97   :  { %5723 = vmatmul.msk.bf16.gmra.mxu1 %vm3339_vm4, %v3869_v59  ;;  %v4488_v59 = vunpack.c.l.b16 %v4474_v11  ;;  %4386 = vmatpush.bf16.msra.mxu2 %v6148_v19 }
 0xc9a   :  { %v3832_v58 = vpop.f32.mrf.mxu2 }
 0xc9b   :  { %4659 = vmatpush.bf16.msrb.mxu2 %v6171_v16 }
 0xc9d   :  { %3983 = vmatmul.bf16.gmra.mxu0 %v3868_v5 }
 0xc9f   :  { %4660 = vmatpush.bf16.msrb.mxu2 %v6170_v46 }
 0xca7   :  { %5796 = vmatmul.msk.bf16.vlgmr.msra.gmra.mxu1 %vm3659_vm9, %v6161_v20 }
 0xcad   :  { %5792 = vmatmul.msk.bf16.vlgmr.msrb.gmra.mxu0 %vm3659_vm9, %v6161_v20  ;;  %v4492_v20 = vpack.c.b16 %v4488_v59, %v4488_v59 }
 0xcb7   :  { %5797 = vmatmul.msk.bf16.gmra.mxu1 %vm3659_vm9, %v6162_v47 }
 0xcbd   :  { %5793 = vmatmul.msk.bf16.gmra.mxu0 %vm3659_vm9, %v6162_v47 }
 0xcc7   :  { %5798 = vmatmul.msk.bf16.gmra.mxu1 %vm3659_vm9, %v6163_v22 }
 0xccd   :  { %5794 = vmatmul.msk.bf16.gmra.mxu0 %vm3659_vm9, %v6163_v22 }
 0xcd7   :  { %5799 = vmatmul.msk.bf16.gmra.mxu1 %vm3659_vm9, %v4212_v26 }
 0xcdd   :  { %5795 = vmatmul.msk.bf16.gmra.mxu0 %vm3659_vm9, %v4212_v26 }
 0xce4   :  { %v3997_v42 = vpop.f32.mrf.mxu1  ;;  %v4143_v53 = vpop.f32.mrf.mxu3 }
 0xce7   :  { %5872 = vmatmul.msk.bf16.vlgmr.msrb.gmra.mxu1 %vm3659_vm9, %v6177_v38 }
 0xce9   :  { %v4115_v31 = vpop.f32.mrf.mxu2 }
 0xcea   :  { %v3969_v43 = vpop.f32.mrf.mxu0 }
 0xceb   :  { %v3998_v44 = vadd.f32 %v3997_v42, %v3969_v43 }
 0xcec   :  { %v3999_v57 = vpop.f32.mrf.mxu1  ;;  %v4145_v27 = vpop.f32.mrf.mxu3 }
 0xced   :  { %v4116_v39 = vadd.f32 %v4115_v31, %v3998_v44  ;;  %5868 = vmatmul.msk.bf16.vlgmr.msra.gmra.mxu0 %vm3659_vm9, %v6177_v38  ;;  %v6176_v38 = vld [vmem:[#allocation46 + $0x60] sm:$0xff] }
 0xcee   :  { %4690 = vmatpush.bf16.msrb.mxu3 %v6176_v38 }
 0xcef   :  { %v8116_v12 = vadd.f32 %v4143_v53, %v4116_v39 }
 0xcf1   :  { %v4117_v36 = vpop.f32.mrf.mxu2 }
 0xcf2   :  { %v3971_v62 = vpop.f32.mrf.mxu0 }
 0xcf3   :  { %v4000_v50 = vadd.f32 %v3999_v57, %v3971_v62 }
 0xcf4   :  { %v4002_v21 = vpop.f32.mrf.mxu1  ;;  %v4148_v33 = vpop.f32.mrf.mxu3 }
 0xcf5   :  { %v4118_v6 = vadd.f32 %v4117_v36, %v4000_v50  ;;  %v6169_v36 = vld [vmem:[#allocation46 + $0x28] sm:$0xff] }
 0xcf6   :  { %4661 = vmatpush.bf16.msrb.mxu2 %v6169_v36 }
 0xcf7   :  { %v8118_v37 = vadd.f32 %v4145_v27, %v4118_v6  ;;  %5873 = vmatmul.msk.bf16.gmra.mxu1 %vm3659_vm9, %v6178_v49  ;;  %v6175_v27 = vld [vmem:[#allocation46 + $0x58] sm:$0xff]  ;;  %v6174_v6 = vld [vmem:[#allocation46 + $0x50] sm:$0xff] }
 0xcf8   :  { %4691 = vmatpush.bf16.msrb.mxu3 %v6175_v27 }
 0xcf9   :  { %v4120_v52 = vpop.f32.mrf.mxu2 }
 0xcfa   :  { %v3974_v35 = vpop.f32.mrf.mxu0 }
 0xcfb   :  { %v4003_v48 = vadd.f32 %v4002_v21, %v3974_v35  ;;  %v6168_v21 = vld [vmem:[#allocation46 + $0x20] sm:$0xff] }
 0xcfc   :  { %v4004_v60 = vpop.f32.mrf.mxu1  ;;  %v4150_v3 = vpop.f32.mrf.mxu3  ;;  %4662 = vmatpush.bf16.msrb.mxu2 %v6168_v21  ;;  %4692 = vmatpush.bf16.msrb.mxu3 %v6174_v6 }
 0xcfd   :  { %v4121_v54 = vadd.f32 %v4120_v52, %v4003_v48  ;;  %5869 = vmatmul.msk.bf16.gmra.mxu0 %vm3659_vm9, %v6178_v49  ;;  %v6167_v52 = vld [vmem:[#allocation46 + $0x18] sm:$0xff] }
 0xcff   :  { %v8122_v45 = vadd.f32 %v4148_v33, %v4121_v54 }
 0xd00   :  { %4663 = vmatpush.bf16.msrb.mxu2 %v6167_v52  ;;  %4693 = vmatpush.bf16.msrb.mxu3 %v6173_v0 }
 0xd01   :  { %v4122_v32 = vpop.f32.mrf.mxu2 }
 0xd02   :  { %v3976_v56 = vpop.f32.mrf.mxu0 }
 0xd03   :  { %v4005_v40 = vadd.f32 %v4004_v60, %v3976_v56  ;;  %v6165_v56 = vld [vmem:[#allocation46 + $0x8] sm:$0xff] }
 0xd04   :  { %v4007_v2 = vpop.f32.mrf.mxu1  ;;  %v4153_v9 = vpop.f32.mrf.mxu3  ;;  %4694 = vmatpush.bf16.msrb.mxu3 %v6172_v63 }
 0xd05   :  { %v4123_v4 = vadd.f32 %v4122_v32, %v4005_v40 }
 0xd07   :  { %v8124_v23 = vadd.f32 %v4150_v3, %v4123_v4  ;;  %5874 = vmatmul.msk.bf16.gmra.mxu1 %vm3659_vm9, %v6179_v1  ;;  %v6166_v3 = vld [vmem:[#allocation46 + $0x10] sm:$0xff] }
 0xd08   :  { %4664 = vmatpush.bf16.msrb.mxu2 %v6166_v3 }
 0xd09   :  { %v4125_v30 = vpop.f32.mrf.mxu2 }
 0xd0a   :  { %v3979_v15 = vpop.f32.mrf.mxu0 }
 0xd0b   :  { %v4008_v61 = vadd.f32 %v4007_v2, %v3979_v15  ;;  %v6164_v2 = vld [vmem:[#allocation46] sm:$0xff] }
 0xd0c   :  { %v4009_v8 = vpop.f32.mrf.mxu1  ;;  %v4155_v17 = vpop.f32.mrf.mxu3  ;;  %4665 = vmatpush.bf16.msrb.mxu2 %v6165_v56 }
 0xd0d   :  { %v4126_v13 = vadd.f32 %v4125_v30, %v4008_v61  ;;  %5870 = vmatmul.msk.bf16.gmra.mxu0 %vm3659_vm9, %v6179_v1 }
 0xd0f   :  { %v8128_v25 = vadd.f32 %v4153_v9, %v4126_v13 }
 0xd10   :  { %4666 = vmatpush.bf16.msrb.mxu2 %v6164_v2 }
 0xd11   :  { %v4127_v18 = vpop.f32.mrf.mxu2 }
 0xd12   :  { %v3981_v5 = vpop.f32.mrf.mxu0 }
 0xd13   :  { %v4010_v58 = vadd.f32 %v4009_v8, %v3981_v5 }
 0xd14   :  { %v4012_v47 = vpop.f32.mrf.mxu1  ;;  %v4158_v51 = vpop.f32.mrf.mxu3 }
 0xd15   :  { %v4128_v22 = vadd.f32 %v4127_v18, %v4010_v58 }
 0xd17   :  { %v8130_v24 = vadd.f32 %v4155_v17, %v4128_v22  ;;  %5875 = vmatmul.msk.bf16.gmra.mxu1 %vm3659_vm9, %v4492_v20 }
 0xd19   :  { %v4130_v26 = vpop.f32.mrf.mxu2 }
 0xd1a   :  { %v3984_v28 = vpop.f32.mrf.mxu0 }
 0xd1b   :  { %v4013_v41 = vadd.f32 %v4012_v47, %v3984_v28 }
 0xd1c   :  { %v4014_v42 = vpop.f32.mrf.mxu1  ;;  %v4160_v7 = vpop.f32.mrf.mxu3 }
 0xd1d   :  { %v4131_v53 = vadd.f32 %v4130_v26, %v4013_v41  ;;  %5871 = vmatmul.msk.bf16.gmra.mxu0 %vm3659_vm9, %v4492_v20 }
 0xd1f   :  { %v8134_v31 = vadd.f32 %v4158_v51, %v4131_v53 }
 0xd21   :  { %v4132_v43 = vpop.f32.mrf.mxu2 }
 0xd22   :  { %v3986_v44 = vpop.f32.mrf.mxu0 }
 0xd24   :  { %v4262_v57 = vpop.f32.mrf.mxu1 }
 0xd2a   :  { %v4234_v39 = vpop.f32.mrf.mxu0 }
 0xd2c   :  { %v4264_v62 = vpop.f32.mrf.mxu1 }
 0xd2d   :  { %v4282_v50 = vpack.c.bf16 %v4264_v62, %v4262_v57 }
 0xd2f   :  { %5852 = vmatmul.msk.bf16.vlgmr.msra.gmra.mxu3 %vm3339_vm4, %v4282_v50 }
 0xd32   :  { %v4236_v49 = vpop.f32.mrf.mxu0 }
 0xd33   :  { %v4281_v55 = vpack.c.bf16 %v4236_v49, %v4234_v39 }
 0xd34   :  { %v4267_v33 = vpop.f32.mrf.mxu1 }
 0xd35   :  { %4387 = vmatmul.bf16.vlgmr.msra.gmra.mxu2 %v4281_v55 }
 0xd3a   :  { %v4239_v14 = vpop.f32.mrf.mxu0 }
 0xd3c   :  { %v4269_v35 = vpop.f32.mrf.mxu1 }
 0xd3d   :  { %v4284_v48 = vpack.c.bf16 %v4269_v35, %v4267_v33 }
 0xd3f   :  { %5853 = vmatmul.msk.bf16.gmra.mxu3 %vm3339_vm4, %v4284_v48 }
 0xd42   :  { %v4241_v60 = vpop.f32.mrf.mxu0 }
 0xd43   :  { %v4283_v54 = vpack.c.bf16 %v4241_v60, %v4239_v14 }
 0xd44   :  { %v4272_v29 = vpop.f32.mrf.mxu1 }
 0xd45   :  { %4392 = vmatmul.bf16.gmra.mxu2 %v4283_v54 }
 0xd4a   :  { %v4244_v32 = vpop.f32.mrf.mxu0 }
 0xd4c   :  { %v4274_v40 = vpop.f32.mrf.mxu1 }
 0xd4d   :  { %v4286_v1 = vpack.c.bf16 %v4274_v40, %v4272_v29 }
 0xd4f   :  { %5854 = vmatmul.msk.bf16.gmra.mxu3 %vm3339_vm4, %v4286_v1 }
 0xd52   :  { %v4246_v4 = vpop.f32.mrf.mxu0 }
 0xd53   :  { %v4285_v9 = vpack.c.bf16 %v4246_v4, %v4244_v32 }
 0xd54   :  { %v4277_v30 = vpop.f32.mrf.mxu1 }
 0xd55   :  { %4397 = vmatmul.bf16.gmra.mxu2 %v4285_v9  ;;  %v4288_v61 = vpack.c.bf16 %v4277_v30, %v4277_v30 }
 0xd5a   :  { %v4249_v15 = vpop.f32.mrf.mxu0 }
 0xd5b   :  { %v4287_v8 = vpack.c.bf16 %v4249_v15, %v4249_v15 }
 0xd5c   :  { %v4279_v34 = vpop.f32.mrf.mxu1 }
 0xd5d   :  { %v6262_v34 = vld [vmem:[%s7430_s13] ss:$0 sm:$0xff]  ;;  %s7216_s13 = smov [#allocation53]  }
 0xd5e   :  { %s4752_s20 = sshll.u32 %s7216_s13, 4  ;;  %s4753_s20 = int_to_ptr.vmem [resolvable:$true] %s4752_s20 }
 0xd5f   :  { %5855 = vmatmul.msk.bf16.gmra.mxu3 %vm3339_vm4, %v4288_v61 }
 0xd62   :  { %v4251_v10 = vpop.f32.mrf.mxu0 }
 0xd64   :  { %v4542_v11 = vpop.f32.mrf.mxu1 }
 0xd65   :  { %4402 = vmatmul.bf16.gmra.mxu2 %v4287_v8 }
 0xd6a   :  { %v4514_v13 = vpop.f32.mrf.mxu0 }
 0xd6c   :  { %v4544_v17 = vpop.f32.mrf.mxu1 }
 0xd6d   :  { %v4562_v59 = vpack.c.bf16 %v4544_v17, %v4542_v11 }
 0xd6f   :  { %5928 = vmatmul.msk.bf16.vlgmr.msrb.gmra.mxu3 %vm3339_vm4, %v4562_v59 }
 0xd72   :  { %v4516_v18 = vpop.f32.mrf.mxu0 }
 0xd73   :  { %v4561_v19 = vpack.c.bf16 %v4516_v18, %v4514_v13 }
 0xd74   :  { %v4547_v5 = vpop.f32.mrf.mxu1 }
 0xd75   :  { %4667 = vmatmul.bf16.vlgmr.msrb.gmra.mxu2 %v4561_v19 }
 0xd7a   :  { %v4519_v58 = vpop.f32.mrf.mxu0 }
 0xd7c   :  { %v4549_v20 = vpop.f32.mrf.mxu1 }
 0xd7d   :  { %v4564_v47 = vpack.c.bf16 %v4549_v20, %v4547_v5 }
 0xd7f   :  { %5929 = vmatmul.msk.bf16.gmra.mxu3 %vm3339_vm4, %v4564_v47 }
 0xd82   :  { %v4521_v22 = vpop.f32.mrf.mxu0 }
 0xd83   :  { %v4563_v51 = vpack.c.bf16 %v4521_v22, %v4519_v58 }
 0xd84   :  { %v4552_v26 = vpop.f32.mrf.mxu1 }
 0xd85   :  { %4672 = vmatmul.bf16.gmra.mxu2 %v4563_v51 }
 0xd8a   :  { %v4524_v28 = vpop.f32.mrf.mxu0 }
 0xd8c   :  { %v4554_v16 = vpop.f32.mrf.mxu1 }
 0xd8d   :  { %v4566_v38 = vpack.c.bf16 %v4554_v16, %v4552_v26 }
 0xd8f   :  { %5930 = vmatmul.msk.bf16.gmra.mxu3 %vm3339_vm4, %v4566_v38 }
 0xd92   :  { %v4526_v41 = vpop.f32.mrf.mxu0 }
 0xd93   :  { %v4565_v42 = vpack.c.bf16 %v4526_v41, %v4524_v28 }
 0xd94   :  { %v4557_v53 = vpop.f32.mrf.mxu1 }
 0xd95   :  { %4677 = vmatmul.bf16.gmra.mxu2 %v4565_v42  ;;  %v4568_v43 = vpack.c.bf16 %v4557_v53, %v4557_v53 }
 0xd9a   :  { %v4529_v7 = vpop.f32.mrf.mxu0 }
 0xd9b   :  { %v4567_v46 = vpack.c.bf16 %v4529_v7, %v4529_v7 }
 0xd9c   :  { %v4559_v44 = vpop.f32.mrf.mxu1 }
 0xd9f   :  { %5931 = vmatmul.msk.bf16.gmra.mxu3 %vm3339_vm4, %v4568_v43 }
 0xda2   :  { %v4531_v57 = vpop.f32.mrf.mxu0 }
 0xda5   :  { %4682 = vmatmul.bf16.gmra.mxu2 %v4567_v46 }
 0xdb2   :  { %v4416_v27 = vpop.f32.mrf.mxu3 }
 0xdb8   :  { %v4388_v39 = vpop.f32.mrf.mxu2 }
 0xdb9   :  { %v4417_v36 = vadd.f32 %v4416_v27, %v4388_v39 }
 0xdba   :  { %v4418_v62 = vpop.f32.mrf.mxu3 }
 0xdbb   :  { %v4435_v50 = vadd.f32 %v4417_v36, %v8116_v12 }
 0xdc0   :  { %v4390_v49 = vpop.f32.mrf.mxu2 }
 0xdc1   :  { %v4419_v55 = vadd.f32 %v4418_v62, %v4390_v49 }
 0xdc2   :  { %v4421_v21 = vpop.f32.mrf.mxu3 }
 0xdc3   :  { %v4436_v33 = vadd.f32 %v4419_v55, %v8118_v37 }
 0xdc8   :  { %v4393_v6 = vpop.f32.mrf.mxu2 }
 0xdc9   :  { %v4422_v14 = vadd.f32 %v4421_v21, %v4393_v6 }
 0xdca   :  { %v4423_v52 = vpop.f32.mrf.mxu3 }
 0xdcb   :  { %v4437_v35 = vadd.f32 %v4422_v14, %v8122_v45 }
 0xdd0   :  { %v4395_v48 = vpop.f32.mrf.mxu2 }
 0xdd1   :  { %v4424_v0 = vadd.f32 %v4423_v52, %v4395_v48 }
 0xdd2   :  { %v4426_v60 = vpop.f32.mrf.mxu3 }
 0xdd3   :  { %v4438_v3 = vadd.f32 %v4424_v0, %v8124_v23 }
 0xdd8   :  { %v4398_v54 = vpop.f32.mrf.mxu2 }
 0xdd9   :  { %v4427_v29 = vadd.f32 %v4426_v60, %v4398_v54 }
 0xdda   :  { %v4428_v32 = vpop.f32.mrf.mxu3 }
 0xddb   :  { %v4439_v12 = vadd.f32 %v4427_v29, %v8128_v25 }
 0xde0   :  { %v4400_v56 = vpop.f32.mrf.mxu2 }
 0xde1   :  { %v4429_v63 = vadd.f32 %v4428_v32, %v4400_v56 }
 0xde2   :  { %v4431_v40 = vpop.f32.mrf.mxu3 }
 0xde3   :  { %v4440_v37 = vadd.f32 %v4429_v63, %v8130_v24 }
 0xde8   :  { %v4403_v1 = vpop.f32.mrf.mxu2 }
 0xde9   :  { %v4432_v2 = vadd.f32 %v4431_v40, %v4403_v1 }
 0xdea   :  { %v4433_v4 = vpop.f32.mrf.mxu3 }
 0xdeb   :  { %v4441_v45 = vadd.f32 %v4432_v2, %v8134_v31 }
 0xdf0   :  { %v4405_v9 = vpop.f32.mrf.mxu2 }
 0xdf2   :  { %v4696_v30 = vpop.f32.mrf.mxu3 }
 0xdf8   :  { %v4668_v15 = vpop.f32.mrf.mxu2 }
 0xdf9   :  { %v4697_v23 = vadd.f32 %v4696_v30, %v4668_v15 }
 0xdfa   :  { %v4698_v61 = vpop.f32.mrf.mxu3 }
 0xdfb   :  { %v4715_v10 = vadd.f32 %v4697_v23, %v4435_v50 }
 0xdfd   :  { %v4726_v8 = vadd.f32 %v6262_v34, %v4715_v10 }
 0xdff   :  { %6269 = vtanh.f32 %v4726_v8 }
 0xe00   :  { %v4670_v25 = vpop.f32.mrf.mxu2 }
 0xe01   :  { %v4699_v11 = vadd.f32 %v4698_v61, %v4670_v25 }
 0xe02   :  { %v4701_v13 = vpop.f32.mrf.mxu3 }
 0xe03   :  { %v4716_v17 = vadd.f32 %v4699_v11, %v4436_v33 }
 0xe05   :  { %v6270_v24 = vpop.eup %6269  ;;  %v4727_v59 = vadd.f32 %v6262_v34, %v4716_v17 }
 0xe06   :  { %4741 = vst.msk [vmem:[#allocation53] sm:$0xff] %vm4740_vm10, %v6270_v24 }
 0xe07   :  { %6271 = vtanh.f32 %v4727_v59 }
 0xe08   :  { %v4673_v31 = vpop.f32.mrf.mxu2 }
 0xe09   :  { %v4702_v18 = vadd.f32 %v4701_v13, %v4673_v31 }
 0xe0a   :  { %v4703_v19 = vpop.f32.mrf.mxu3 }
 0xe0b   :  { %v4717_v5 = vadd.f32 %v4702_v18, %v4437_v35 }
 0xe0d   :  { %v6272_v58 = vpop.eup %6271  ;;  %v4728_v20 = vadd.f32 %v6262_v34, %v4717_v5 }
 0xe0e   :  { %4742 = vst.msk [vmem:[#allocation53 + $0x8] sm:$0xff] %vm4740_vm10, %v6272_v58 }
 0xe0f   :  { %6273 = vtanh.f32 %v4728_v20 }
 0xe10   :  { %v4675_v47 = vpop.f32.mrf.mxu2 }
 0xe11   :  { %v4704_v22 = vadd.f32 %v4703_v19, %v4675_v47 }
 0xe12   :  { %v4706_v51 = vpop.f32.mrf.mxu3 }
 0xe13   :  { %v4718_v26 = vadd.f32 %v4704_v22, %v4438_v3 }
 0xe15   :  { %v6274_v28 = vpop.eup %6273  ;;  %v4729_v16 = vadd.f32 %v6262_v34, %v4718_v26 }
 0xe16   :  { %4743 = vst.msk [vmem:[#allocation53 + $0x10] sm:$0xff] %vm4740_vm10, %v6274_v28 }
 0xe17   :  { %6275 = vtanh.f32 %v4729_v16 }
 0xe18   :  { %v4678_v38 = vpop.f32.mrf.mxu2 }
 0xe19   :  { %v4707_v41 = vadd.f32 %v4706_v51, %v4678_v38 }
 0xe1a   :  { %v4708_v42 = vpop.f32.mrf.mxu3 }
 0xe1b   :  { %v4719_v53 = vadd.f32 %v4707_v41, %v4439_v12 }
 0xe1d   :  { %v6276_v7 = vpop.eup %6275  ;;  %v4730_v43 = vadd.f32 %v6262_v34, %v4719_v53 }
 0xe1e   :  { %4744 = vst.msk [vmem:[#allocation53 + $0x18] sm:$0xff] %vm4740_vm10, %v6276_v7 }
 0xe1f   :  { %6277 = vtanh.f32 %v4730_v43 }
 0xe20   :  { %v4680_v44 = vpop.f32.mrf.mxu2 }
 0xe21   :  { %v4709_v46 = vadd.f32 %v4708_v42, %v4680_v44 }
 0xe22   :  { %v4711_v57 = vpop.f32.mrf.mxu3 }
 0xe23   :  { %v4720_v27 = vadd.f32 %v4709_v46, %v4440_v37 }
 0xe25   :  { %v6278_v39 = vpop.eup %6277  ;;  %v4731_v36 = vadd.f32 %v6262_v34, %v4720_v27 }
 0xe26   :  { %4745 = vst.msk [vmem:[#allocation53 + $0x20] sm:$0xff] %vm4740_vm10, %v6278_v39 }
 0xe27   :  { %6279 = vtanh.f32 %v4731_v36 }
 0xe28   :  { %v4683_v62 = vpop.f32.mrf.mxu2 }
 0xe29   :  { %v4712_v50 = vadd.f32 %v4711_v57, %v4683_v62 }
 0xe2a   :  { %v4713_v49 = vpop.f32.mrf.mxu3 }
 0xe2b   :  { %v4721_v55 = vadd.f32 %v4712_v50, %v4441_v45 }
 0xe2d   :  { %v6280_v21 = vpop.eup %6279  ;;  %v4732_v33 = vadd.f32 %v6262_v34, %v4721_v55 }
 0xe2e   :  { %4746 = vst.msk [vmem:[#allocation53 + $0x28] sm:$0xff] %vm4740_vm10, %v6280_v21 }
 0xe2f   :  { %6281 = vtanh.f32 %v4732_v33 }
 0xe30   :  { %v4685_v6 = vpop.f32.mrf.mxu2 }
 0xe35   :  { %v6282_v14 = vpop.eup %6281 }
 0xe36   :  { %4747 = vst.msk [vmem:[#allocation53 + $0x30] sm:$0xff] %vm4740_vm10, %v6282_v14 }
 0xe37   :  { %7098 = shalt.err (!%p7095_p1)
}
 0xe38   :  { %4760 = dma.vmem_to_hbm [thread:$0]  %s4753_s20, 896, %s4755_s0, [#allocation4], %s7178_s28, %s7178_s28, %s7179_s1  }
 0xe39   :  { %7133 = dma.done.wait [#allocation4], 896  }
 0xe3a   :  { %7134 = vsyncadd [#allocation4], 4294966400 }
 0xe3b   :  { %4765 = vsyncpa [#allocation3], 1 }
 0xe3c   :  { %4766 = vsyncpa [#allocation6], 1 }
 0xe3d   :  { %4767 = vsyncpa [#allocation9], 1 }
 0xe3e   :  { %4768 = vsyncpa [#allocation12], 1 }
 0xe3f   :  { %4769 = vsyncpa [#allocation15], 1 }
 0xe40   :  { %4770 = vsyncpa [#allocation18], 1 }
 0xe41   :  { %4771 = vsyncpa [#allocation21], 1 }
 0xe42   :  { %4772 = vsyncpa [#allocation24], 1 }
 0xe43   :  { %4773 = vsyncpa [#allocation27], 1 }
 0xe44   :  { %4774 = vsyncpa [#allocation30], 1 }
 0xe45   :  { %4775 = vsyncpa [#allocation33], 1 }
 0xe46   :  { %4776 = vsyncpa [#allocation36], 1 }
 0xe47   :  { %4777 = vsyncpa [#allocation39], 1 }
 0xe48   :  { %4778 = vsyncpa [#allocation42], 1 }
 0xe49   :  { %4779 = vsyncpa [#allocation45], 1 }
 0xe4a   :  { %4780 = vsyncpa [#allocation48], 1 }
 0xe4b   :  { %4781 = vsyncpa [#allocation51], 1 }
 0xe4c   :  { %4782 = vsyncpa [#allocation4], 1 }

</bundles_post_ra>
